<compile_context>
chip_gen: v7x
topology: tpu7x:2x2x1
jax: 0.10.0
libtpu: 0.0.40
codegen_flags: <defaults>
</compile_context>

<pallas_src>
import math
from functools import partial

import jax
import jax.numpy as jnp
from jax.experimental import pallas as pl
from jax.experimental.pallas import tpu as pltpu


_COMPILER_PARAMS = pltpu.CompilerParams(
    dimension_semantics=("parallel",),       # shard per-image work across TCs
    vmem_limit_bytes=32 * 1024 * 1024,       # explicit budget (safe on 64 MiB VMEM)
)

# TODO(synk): reference Resizer not provided; slope chosen to match common resizer impls.
LEAKY_SLOPE = 0.2


# ---------------------------------------------------------------------------
# "flatpad" layout helpers (plain JAX, model boundary only)
# ---------------------------------------------------------------------------
def _layout(s):
    """Per-image flatpad geometry for spatial size s (3x3 SAME conv, pad=1)."""
    sp = s + 2                                   # zero-padded side length
    gf = sp + 1                                  # front guard >= max |tap offset|
    d = sp * sp                                  # padded-image span
    lp = -(-(gf + d + sp + 1) // 128) * 128      # row length rounded to lane multiple
    return sp, gf, d, lp


def to_flatpad(x_nchw, s):
    """(N, C, s, s) -> (N, C, Lp) bf16 flatpad rows (guards + padding zeroed)."""
    n, c, h, w = x_nchw.shape
    assert h == s and w == s
    _, gf, d, lp = _layout(s)
    xp = jnp.pad(x_nchw.astype(jnp.float32), ((0, 0), (0, 0), (1, 1), (1, 1)))
    flat = xp.reshape(n, c, d)
    flat = jnp.pad(flat, ((0, 0), (0, 0), (gf, lp - gf - d)))
    return flat.astype(jnp.bfloat16)


def make_mask(s):
    """(1, Lp) f32: 1.0 at interior pixel positions, 0 at padding / guards."""
    sp, gf, d, lp = _layout(s)
    m = jnp.zeros((sp, sp), jnp.float32).at[1:-1, 1:-1].set(1.0)
    row = jnp.zeros((lp,), jnp.float32).at[gf:gf + d].set(m.reshape(-1))
    return row.reshape(1, lp)


def _bilinear_matrix(out_size, in_size):
    """1-D interp matrix matching F.interpolate(bilinear, align_corners=False)."""
    scale = in_size / out_size
    dst = jnp.arange(out_size, dtype=jnp.float32)
    src = jnp.clip((dst + 0.5) * scale - 0.5, 0.0, in_size - 1.0)
    lo = jnp.floor(src).astype(jnp.int32)
    hi = jnp.minimum(lo + 1, in_size - 1)
    w_hi = src - lo.astype(jnp.float32)
    rows = jnp.arange(out_size)
    m = jnp.zeros((out_size, in_size), jnp.float32)
    m = m.at[rows, lo].add(1.0 - w_hi)
    m = m.at[rows, hi].add(w_hi)
    return m


def make_resize_matrix(s_in, s_out):
    """(D_in, Lp_out) bf16: bilinear 2-D resize of a flatpad data span into a
    full flatpad output row.  Rows at input padding positions and columns at
    output padding/guard positions are zero, so resize + re-pad is one dot."""
    sp_i, _, d_i, _ = _layout(s_in)
    sp_o, gf_o, _, lp_o = _layout(s_out)
    mh = _bilinear_matrix(s_out, s_in)
    mw = _bilinear_matrix(s_out, s_in)
    w4 = jnp.einsum("or,pc->rcop", mh, mw).reshape(s_in * s_in, s_out * s_out)
    ri = jnp.arange(s_in) + 1
    ro = jnp.arange(s_out) + 1
    rows = (ri[:, None] * sp_i + ri[None, :]).reshape(-1)
    cols = (gf_o + ro[:, None] * sp_o + ro[None, :]).reshape(-1)
    r = jnp.zeros((d_i, lp_o), jnp.float32)
    r = r.at[rows[:, None], cols[None, :]].set(w4)
    return r.astype(jnp.bfloat16)


# ---------------------------------------------------------------------------
# In-kernel helpers
# ---------------------------------------------------------------------------
def _leaky_relu(x):
    return jnp.where(x >= 0.0, x, LEAKY_SLOPE * x)


def _conv_taps(x_ref, w_ref, s):
    """Fused im2col: 9 shifted lane slices -> bf16 MXU dots -> f32 (cout, D)."""
    sp, gf, d, _ = _layout(s)
    cout = w_ref.shape[1]
    acc = jnp.zeros((cout, d), jnp.float32)
    t = 0
    for di in range(3):
        for dj in range(3):
            off = (di - 1) * sp + (dj - 1)
            xs = x_ref[:, gf + off:gf + off + d]          # (cin, D) bf16
            acc = acc + jnp.dot(w_ref[t], xs, preferred_element_type=jnp.float32)
            t += 1
    return acc


def _store_padded(buf_ref, acc, gf):
    """Write a (c, D) span into a full flatpad row; guards / tail stay zero."""
    d = acc.shape[1]
    buf_ref[...] = jnp.zeros(buf_ref.shape, buf_ref.dtype)
    buf_ref[:, gf:gf + d] = acc.astype(buf_ref.dtype)


# ---------------------------------------------------------------------------
# Single fused kernel: resizer + backbone + GAP + FC
# ---------------------------------------------------------------------------
def _make_fused_kernel(s_in, s_out, in_ch, out_ch, apply_resizer):
    sp_i, gf_i, d_i, lp_i = _layout(s_in)
    s_bb = s_out if apply_resizer else s_in
    _, gf_b, d_b, lp_b = _layout(s_bb)
    has_skip = apply_resizer and (in_ch == out_ch)
    inv_hw = 1.0 / float(s_bb * s_bb)

    def kernel(*refs):
        it = iter(refs)
        x_ref = next(it)
        if apply_resizer:
            w1, b1, rd = next(it), next(it), next(it)
            w2, b2, w3, b3 = next(it), next(it), next(it), next(it)
        mask = next(it)
        ws, bs = next(it), next(it)
        wb1, bb1 = next(it), next(it)
        wb2, bb2 = next(it), next(it)
        fcw, fcb = next(it), next(it)
        o_ref = next(it)
        if apply_resizer:
            sc_y, sc_a, sc_b = next(it), next(it), next(it)
            sc_skip = next(it) if has_skip else None
        sc_stem, sc_r1 = next(it), next(it)

        mdat = mask[:, gf_b:gf_b + d_b]                    # (1, D_bb)

        # ------------------------------ resizer ------------------------------
        if apply_resizer:
            # rz_conv1 + LeakyReLU, then bilinear resize fused as one MXU dot.
            a1 = _leaky_relu(_conv_taps(x_ref, w1, s_in) + b1[...])
            y = jnp.dot(a1.astype(jnp.bfloat16), rd[...],
                        preferred_element_type=jnp.float32)        # (hid, Lp_out)
            sc_y[...] = y.astype(sc_y.dtype)                       # full lane-dense row
            if has_skip:
                skip = jnp.dot(x_ref[:, gf_i:gf_i + d_i], rd[...],
                               preferred_element_type=jnp.float32)  # (cin, Lp_out)
                sc_skip[...] = skip.astype(sc_skip.dtype)

            # rz_conv2 + LeakyReLU
            a2 = _leaky_relu(_conv_taps(sc_y, w2, s_out) + b2[...])
            a2 = jnp.where(mdat > 0.0, a2, 0.0)
            _store_padded(sc_a, a2, gf_b)

            # rz_conv3 (+ resized-input residual when channel counts match)
            a3 = _conv_taps(sc_a, w3, s_out) + b3[...]
            if has_skip:
                a3 = a3 + sc_skip[:, gf_b:gf_b + d_b].astype(jnp.float32)
            a3 = jnp.where(mdat > 0.0, a3, 0.0)
            _store_padded(sc_b, a3, gf_b)
            bb_in = sc_b
        else:
            bb_in = x_ref

        # ----------------------------- backbone ------------------------------
        h0 = jnp.maximum(_conv_taps(bb_in, ws, s_bb) + bs[...], 0.0)
        h0 = jnp.where(mdat > 0.0, h0, 0.0)                        # (hid, D_bb)
        _store_padded(sc_stem, h0, gf_b)

        h1 = jnp.maximum(_conv_taps(sc_stem, wb1, s_bb) + bb1[...], 0.0)
        h1 = jnp.where(mdat > 0.0, h1, 0.0)
        _store_padded(sc_r1, h1, gf_b)

        h2 = _conv_taps(sc_r1, wb2, s_bb) + bb2[...] + h0          # residual add (f32)
        h2 = jnp.maximum(h2, 0.0)
        h2 = jnp.where(mdat > 0.0, h2, 0.0)

        # Fused GAP + FC: project to classes on the MXU, lane-reduce, add bias.
        proj = jnp.dot(fcw[...], h2.astype(jnp.bfloat16),
                       preferred_element_type=jnp.float32)          # (K, D_bb)
        logits = jnp.sum(proj, axis=1, keepdims=True) * inv_hw + fcb[...]
        o_ref[...] = logits.astype(o_ref.dtype)                     # (K, 1)

    return kernel


# ---------------------------------------------------------------------------
# Parameters + model forward (mirrors ResNetResizer.forward)
# ---------------------------------------------------------------------------
def _conv_init(key, cin, cout):
    fan_in = 9 * cin
    w = jax.random.normal(key, (9, cout, cin), jnp.float32) / math.sqrt(fan_in)
    return w.astype(jnp.bfloat16), jnp.zeros((cout, 1), jnp.float32)


def init_params(key, in_ch, out_ch, num_classes, hidden=16, apply_resizer=True):
    ks = jax.random.split(key, 7)
    bb_in = out_ch if apply_resizer else in_ch
    p = {
        "rz_conv1": _conv_init(ks[0], in_ch, hidden),
        "rz_conv2": _conv_init(ks[1], hidden, hidden),
        "rz_conv3": _conv_init(ks[2], hidden, out_ch),
        "bb_stem": _conv_init(ks[3], bb_in, hidden),
        "bb_block1": _conv_init(ks[4], hidden, hidden),
        "bb_block2": _conv_init(ks[5], hidden, hidden),
    }
    fc_w = jax.random.normal(ks[6], (num_classes, hidden), jnp.float32) / math.sqrt(hidden)
    p["fc_w_t"] = fc_w.astype(jnp.bfloat16)          # (num_classes, hidden)
    p["fc_b"] = jnp.zeros((num_classes, 1), jnp.float32)
    return p


def resnet_resizer_forward(p, x_nchw, out_size, apply_resizer=True):
    """Full ResNetResizer forward: one fused Pallas kernel, grid=(N,)."""
    n, in_ch, h, w = x_nchw.shape
    s_in = h
    s_bb = out_size if apply_resizer else s_in
    hidden = p["bb_stem"][0].shape[1]
    out_ch = p["rz_conv3"][0].shape[1]
    num_classes = p["fc_w_t"].shape[0]
    has_skip = apply_resizer and (in_ch == out_ch)

    _, _, _, lp_i = _layout(s_in)
    _, _, _, lp_b = _layout(s_bb)

    x_fp = to_flatpad(x_nchw, s_in)                  # NCHW boundary -> flatpad bf16
    mask = make_mask(s_bb)

    kernel = _make_fused_kernel(s_in, out_size, in_ch, out_ch, apply_resizer)

    def full_spec(a):
        nd = a.ndim
        return pl.BlockSpec(a.shape, lambda i, _nd=nd: (0,) * _nd)

    inputs = [x_fp]
    if apply_resizer:
        rd = make_resize_matrix(s_in, out_size)
        w1, b1 = p["rz_conv1"]
        w2, b2 = p["rz_conv2"]
        w3, b3 = p["rz_conv3"]
        inputs += [w1, b1, rd, w2, b2, w3, b3]
    inputs += [mask]
    inputs += list(p["bb_stem"]) + list(p["bb_block1"]) + list(p["bb_block2"])
    inputs += [p["fc_w_t"], p["fc_b"]]

    in_specs = [pl.BlockSpec((None, in_ch, lp_i), lambda i: (i, 0, 0))]
    in_specs += [full_spec(a) for a in inputs[1:]]

    scratch = []
    if apply_resizer:
        scratch += [pltpu.VMEM((hidden, lp_b), jnp.bfloat16),   # conv1 + resize
                    pltpu.VMEM((hidden, lp_b), jnp.bfloat16),   # conv2
                    pltpu.VMEM((out_ch, lp_b), jnp.bfloat16)]   # conv3 (backbone in)
        if has_skip:
            scratch += [pltpu.VMEM((in_ch, lp_b), jnp.bfloat16)]  # resized skip
    scratch += [pltpu.VMEM((hidden, lp_b), jnp.bfloat16),       # stem
                pltpu.VMEM((hidden, lp_b), jnp.bfloat16)]       # block1

    logits = pl.pallas_call(
        kernel,
        grid=(n,),
        in_specs=in_specs,
        out_specs=pl.BlockSpec((None, num_classes, 1), lambda i: (i, 0, 0)),
        out_shape=jax.ShapeDtypeStruct((n, num_classes, 1), jnp.float32),
        scratch_shapes=scratch,
        compiler_params=_COMPILER_PARAMS,
    )(*inputs)
    return logits[:, :, 0]


# ---------------------------------------------------------------------------
if __name__ == "__main__":
    key = jax.random.PRNGKey(0)
    k_x, k_p = jax.random.split(key)

    B, IN_CH, H, W = 2, 4, 16, 16
    OUT_CH = 4          # resizer output channels (== backbone input channels)
    OUT_SIZE = 8        # resizer target spatial size
    NUM_CLASSES = 10
    HIDDEN = 16

    x = jax.random.normal(k_x, (B, IN_CH, H, W), jnp.float32)
    params = init_params(k_p, IN_CH, OUT_CH, NUM_CLASSES, hidden=HIDDEN,
                         apply_resizer=True)

    fwd = jax.jit(partial(resnet_resizer_forward, out_size=OUT_SIZE,
                          apply_resizer=True))
    logits = jax.block_until_ready(fwd(params, x))

    assert logits.shape == (B, NUM_CLASSES), logits.shape
    assert bool(jnp.all(jnp.isfinite(logits)))
    print("KERNEL_OK")
</pallas_src>

<mosaic_0001>
module attributes {stable_mosaic.version = 11 : i64} {
  func.func @kernel(%arg0: i32, %arg1: memref<1x4x384xbf16, #tpu.memory_space<vmem>>, %arg2: memref<9x16x4xbf16, #tpu.memory_space<vmem>>, %arg3: memref<16x1xf32, #tpu.memory_space<vmem>>, %arg4: memref<324x128xbf16, #tpu.memory_space<vmem>>, %arg5: memref<9x16x16xbf16, #tpu.memory_space<vmem>>, %arg6: memref<16x1xf32, #tpu.memory_space<vmem>>, %arg7: memref<9x4x16xbf16, #tpu.memory_space<vmem>>, %arg8: memref<4x1xf32, #tpu.memory_space<vmem>>, %arg9: memref<1x128xf32, #tpu.memory_space<vmem>>, %arg10: memref<9x16x4xbf16, #tpu.memory_space<vmem>>, %arg11: memref<16x1xf32, #tpu.memory_space<vmem>>, %arg12: memref<9x16x16xbf16, #tpu.memory_space<vmem>>, %arg13: memref<16x1xf32, #tpu.memory_space<vmem>>, %arg14: memref<9x16x16xbf16, #tpu.memory_space<vmem>>, %arg15: memref<16x1xf32, #tpu.memory_space<vmem>>, %arg16: memref<10x16xbf16, #tpu.memory_space<vmem>>, %arg17: memref<10x1xf32, #tpu.memory_space<vmem>>, %arg18: memref<1x10x1xf32, #tpu.memory_space<vmem>>, %arg19: memref<16x128xbf16, #tpu.memory_space<vmem>>, %arg20: memref<16x128xbf16, #tpu.memory_space<vmem>>, %arg21: memref<4x128xbf16, #tpu.memory_space<vmem>>, %arg22: memref<4x128xbf16, #tpu.memory_space<vmem>>, %arg23: memref<16x128xbf16, #tpu.memory_space<vmem>>, %arg24: memref<16x128xbf16, #tpu.memory_space<vmem>>) attributes {dimension_semantics = [#tpu.dimension_semantics<parallel>], iteration_bounds = array<i64: 2>, scalar_prefetch = 0 : i64, scratch_operands = 6 : i64, tpu.core_type = #tpu.core_type<tc>, window_params = [{transform_indices = @transform_0, window_bounds = array<i64: 1, 4, 384>}, {pipeline_mode = #tpu.pipeline_mode<synchronous>, transform_indices = @transform_1, window_bounds = array<i64: 9, 16, 4>}, {pipeline_mode = #tpu.pipeline_mode<synchronous>, transform_indices = @transform_2, window_bounds = array<i64: 16, 1>}, {pipeline_mode = #tpu.pipeline_mode<synchronous>, transform_indices = @transform_3, window_bounds = array<i64: 324, 128>}, {pipeline_mode = #tpu.pipeline_mode<synchronous>, transform_indices = @transform_4, window_bounds = array<i64: 9, 16, 16>}, {pipeline_mode = #tpu.pipeline_mode<synchronous>, transform_indices = @transform_5, window_bounds = array<i64: 16, 1>}, {pipeline_mode = #tpu.pipeline_mode<synchronous>, transform_indices = @transform_6, window_bounds = array<i64: 9, 4, 16>}, {pipeline_mode = #tpu.pipeline_mode<synchronous>, transform_indices = @transform_7, window_bounds = array<i64: 4, 1>}, {pipeline_mode = #tpu.pipeline_mode<synchronous>, transform_indices = @transform_8, window_bounds = array<i64: 1, 128>}, {pipeline_mode = #tpu.pipeline_mode<synchronous>, transform_indices = @transform_9, window_bounds = array<i64: 9, 16, 4>}, {pipeline_mode = #tpu.pipeline_mode<synchronous>, transform_indices = @transform_10, window_bounds = array<i64: 16, 1>}, {pipeline_mode = #tpu.pipeline_mode<synchronous>, transform_indices = @transform_11, window_bounds = array<i64: 9, 16, 16>}, {pipeline_mode = #tpu.pipeline_mode<synchronous>, transform_indices = @transform_12, window_bounds = array<i64: 16, 1>}, {pipeline_mode = #tpu.pipeline_mode<synchronous>, transform_indices = @transform_13, window_bounds = array<i64: 9, 16, 16>}, {pipeline_mode = #tpu.pipeline_mode<synchronous>, transform_indices = @transform_14, window_bounds = array<i64: 16, 1>}, {pipeline_mode = #tpu.pipeline_mode<synchronous>, transform_indices = @transform_15, window_bounds = array<i64: 10, 16>}, {pipeline_mode = #tpu.pipeline_mode<synchronous>, transform_indices = @transform_16, window_bounds = array<i64: 10, 1>}, {transform_indices = @transform_17, window_bounds = array<i64: 1, 10, 1>}]} {
    %c0 = arith.constant 0 : index
    %c11 = arith.constant 11 : index
    %0 = vector.load %arg9[%c0, %c11] : memref<1x128xf32, #tpu.memory_space<vmem>>, vector<1x100xf32>
    %cst = arith.constant 0.000000e+00 : f32
    %1 = vector.broadcast %cst : f32 to vector<16x324xf32>
    %c0_0 = arith.constant 0 : index
    %c0_1 = arith.constant 0 : index
    %c0_2 = arith.constant 0 : index
    %2 = vector.load %arg1[%c0_0, %c0_1, %c0_2] : memref<1x4x384xbf16, #tpu.memory_space<vmem>>, vector<1x4x324xbf16>
    %3 = vector.shape_cast %2 : vector<1x4x324xbf16> to vector<4x324xbf16>
    %c0_3 = arith.constant 0 : index
    %c0_4 = arith.constant 0 : index
    %c0_5 = arith.constant 0 : index
    %4 = vector.load %arg2[%c0_3, %c0_4, %c0_5] : memref<9x16x4xbf16, #tpu.memory_space<vmem>>, vector<1x16x4xbf16>
    %5 = vector.shape_cast %4 : vector<1x16x4xbf16> to vector<16x4xbf16>
    %cst_6 = arith.constant dense<0.000000e+00> : vector<16x324xf32>
    %6 = tpu.matmul %5, %3, %cst_6 {dimension_numbers = #tpu.dot_dimension_numbers<[1], [0], [0], [1], [0, 0, 1, 1], [], []>} : vector<16x4xbf16>, vector<4x324xbf16>, vector<16x324xf32> -> vector<16x324xf32>
    %7 = arith.addf %1, %6 : vector<16x324xf32>
    %c0_7 = arith.constant 0 : index
    %c0_8 = arith.constant 0 : index
    %c1 = arith.constant 1 : index
    %8 = vector.load %arg1[%c0_7, %c0_8, %c1] : memref<1x4x384xbf16, #tpu.memory_space<vmem>>, vector<1x4x324xbf16>
    %9 = vector.shape_cast %8 : vector<1x4x324xbf16> to vector<4x324xbf16>
    %c1_9 = arith.constant 1 : index
    %c0_10 = arith.constant 0 : index
    %c0_11 = arith.constant 0 : index
    %10 = vector.load %arg2[%c1_9, %c0_10, %c0_11] : memref<9x16x4xbf16, #tpu.memory_space<vmem>>, vector<1x16x4xbf16>
    %11 = vector.shape_cast %10 : vector<1x16x4xbf16> to vector<16x4xbf16>
    %cst_12 = arith.constant dense<0.000000e+00> : vector<16x324xf32>
    %12 = tpu.matmul %11, %9, %cst_12 {dimension_numbers = #tpu.dot_dimension_numbers<[1], [0], [0], [1], [0, 0, 1, 1], [], []>} : vector<16x4xbf16>, vector<4x324xbf16>, vector<16x324xf32> -> vector<16x324xf32>
    %13 = arith.addf %7, %12 : vector<16x324xf32>
    %c0_13 = arith.constant 0 : index
    %c0_14 = arith.constant 0 : index
    %c2 = arith.constant 2 : index
    %14 = vector.load %arg1[%c0_13, %c0_14, %c2] : memref<1x4x384xbf16, #tpu.memory_space<vmem>>, vector<1x4x324xbf16>
    %15 = vector.shape_cast %14 : vector<1x4x324xbf16> to vector<4x324xbf16>
    %c2_15 = arith.constant 2 : index
    %c0_16 = arith.constant 0 : index
    %c0_17 = arith.constant 0 : index
    %16 = vector.load %arg2[%c2_15, %c0_16, %c0_17] : memref<9x16x4xbf16, #tpu.memory_space<vmem>>, vector<1x16x4xbf16>
    %17 = vector.shape_cast %16 : vector<1x16x4xbf16> to vector<16x4xbf16>
    %cst_18 = arith.constant dense<0.000000e+00> : vector<16x324xf32>
    %18 = tpu.matmul %17, %15, %cst_18 {dimension_numbers = #tpu.dot_dimension_numbers<[1], [0], [0], [1], [0, 0, 1, 1], [], []>} : vector<16x4xbf16>, vector<4x324xbf16>, vector<16x324xf32> -> vector<16x324xf32>
    %19 = arith.addf %13, %18 : vector<16x324xf32>
    %c0_19 = arith.constant 0 : index
    %c0_20 = arith.constant 0 : index
    %c18 = arith.constant 18 : index
    %20 = vector.load %arg1[%c0_19, %c0_20, %c18] : memref<1x4x384xbf16, #tpu.memory_space<vmem>>, vector<1x4x324xbf16>
    %21 = vector.shape_cast %20 : vector<1x4x324xbf16> to vector<4x324xbf16>
    %c3 = arith.constant 3 : index
    %c0_21 = arith.constant 0 : index
    %c0_22 = arith.constant 0 : index
    %22 = vector.load %arg2[%c3, %c0_21, %c0_22] : memref<9x16x4xbf16, #tpu.memory_space<vmem>>, vector<1x16x4xbf16>
    %23 = vector.shape_cast %22 : vector<1x16x4xbf16> to vector<16x4xbf16>
    %cst_23 = arith.constant dense<0.000000e+00> : vector<16x324xf32>
    %24 = tpu.matmul %23, %21, %cst_23 {dimension_numbers = #tpu.dot_dimension_numbers<[1], [0], [0], [1], [0, 0, 1, 1], [], []>} : vector<16x4xbf16>, vector<4x324xbf16>, vector<16x324xf32> -> vector<16x324xf32>
    %25 = arith.addf %19, %24 : vector<16x324xf32>
    %c0_24 = arith.constant 0 : index
    %c0_25 = arith.constant 0 : index
    %c19 = arith.constant 19 : index
    %26 = vector.load %arg1[%c0_24, %c0_25, %c19] : memref<1x4x384xbf16, #tpu.memory_space<vmem>>, vector<1x4x324xbf16>
    %27 = vector.shape_cast %26 : vector<1x4x324xbf16> to vector<4x324xbf16>
    %c4 = arith.constant 4 : index
    %c0_26 = arith.constant 0 : index
    %c0_27 = arith.constant 0 : index
    %28 = vector.load %arg2[%c4, %c0_26, %c0_27] : memref<9x16x4xbf16, #tpu.memory_space<vmem>>, vector<1x16x4xbf16>
    %29 = vector.shape_cast %28 : vector<1x16x4xbf16> to vector<16x4xbf16>
    %cst_28 = arith.constant dense<0.000000e+00> : vector<16x324xf32>
    %30 = tpu.matmul %29, %27, %cst_28 {dimension_numbers = #tpu.dot_dimension_numbers<[1], [0], [0], [1], [0, 0, 1, 1], [], []>} : vector<16x4xbf16>, vector<4x324xbf16>, vector<16x324xf32> -> vector<16x324xf32>
    %31 = arith.addf %25, %30 : vector<16x324xf32>
    %c0_29 = arith.constant 0 : index
    %c0_30 = arith.constant 0 : index
    %c20 = arith.constant 20 : index
    %32 = vector.load %arg1[%c0_29, %c0_30, %c20] : memref<1x4x384xbf16, #tpu.memory_space<vmem>>, vector<1x4x324xbf16>
    %33 = vector.shape_cast %32 : vector<1x4x324xbf16> to vector<4x324xbf16>
    %c5 = arith.constant 5 : index
    %c0_31 = arith.constant 0 : index
    %c0_32 = arith.constant 0 : index
    %34 = vector.load %arg2[%c5, %c0_31, %c0_32] : memref<9x16x4xbf16, #tpu.memory_space<vmem>>, vector<1x16x4xbf16>
    %35 = vector.shape_cast %34 : vector<1x16x4xbf16> to vector<16x4xbf16>
    %cst_33 = arith.constant dense<0.000000e+00> : vector<16x324xf32>
    %36 = tpu.matmul %35, %33, %cst_33 {dimension_numbers = #tpu.dot_dimension_numbers<[1], [0], [0], [1], [0, 0, 1, 1], [], []>} : vector<16x4xbf16>, vector<4x324xbf16>, vector<16x324xf32> -> vector<16x324xf32>
    %37 = arith.addf %31, %36 : vector<16x324xf32>
    %c0_34 = arith.constant 0 : index
    %c0_35 = arith.constant 0 : index
    %c36 = arith.constant 36 : index
    %38 = vector.load %arg1[%c0_34, %c0_35, %c36] : memref<1x4x384xbf16, #tpu.memory_space<vmem>>, vector<1x4x324xbf16>
    %39 = vector.shape_cast %38 : vector<1x4x324xbf16> to vector<4x324xbf16>
    %c6 = arith.constant 6 : index
    %c0_36 = arith.constant 0 : index
    %c0_37 = arith.constant 0 : index
    %40 = vector.load %arg2[%c6, %c0_36, %c0_37] : memref<9x16x4xbf16, #tpu.memory_space<vmem>>, vector<1x16x4xbf16>
    %41 = vector.shape_cast %40 : vector<1x16x4xbf16> to vector<16x4xbf16>
    %cst_38 = arith.constant dense<0.000000e+00> : vector<16x324xf32>
    %42 = tpu.matmul %41, %39, %cst_38 {dimension_numbers = #tpu.dot_dimension_numbers<[1], [0], [0], [1], [0, 0, 1, 1], [], []>} : vector<16x4xbf16>, vector<4x324xbf16>, vector<16x324xf32> -> vector<16x324xf32>
    %43 = arith.addf %37, %42 : vector<16x324xf32>
    %c0_39 = arith.constant 0 : index
    %c0_40 = arith.constant 0 : index
    %c37 = arith.constant 37 : index
    %44 = vector.load %arg1[%c0_39, %c0_40, %c37] : memref<1x4x384xbf16, #tpu.memory_space<vmem>>, vector<1x4x324xbf16>
    %45 = vector.shape_cast %44 : vector<1x4x324xbf16> to vector<4x324xbf16>
    %c7 = arith.constant 7 : index
    %c0_41 = arith.constant 0 : index
    %c0_42 = arith.constant 0 : index
    %46 = vector.load %arg2[%c7, %c0_41, %c0_42] : memref<9x16x4xbf16, #tpu.memory_space<vmem>>, vector<1x16x4xbf16>
    %47 = vector.shape_cast %46 : vector<1x16x4xbf16> to vector<16x4xbf16>
    %cst_43 = arith.constant dense<0.000000e+00> : vector<16x324xf32>
    %48 = tpu.matmul %47, %45, %cst_43 {dimension_numbers = #tpu.dot_dimension_numbers<[1], [0], [0], [1], [0, 0, 1, 1], [], []>} : vector<16x4xbf16>, vector<4x324xbf16>, vector<16x324xf32> -> vector<16x324xf32>
    %49 = arith.addf %43, %48 : vector<16x324xf32>
    %c0_44 = arith.constant 0 : index
    %c0_45 = arith.constant 0 : index
    %c38 = arith.constant 38 : index
    %50 = vector.load %arg1[%c0_44, %c0_45, %c38] : memref<1x4x384xbf16, #tpu.memory_space<vmem>>, vector<1x4x324xbf16>
    %51 = vector.shape_cast %50 : vector<1x4x324xbf16> to vector<4x324xbf16>
    %c8 = arith.constant 8 : index
    %c0_46 = arith.constant 0 : index
    %c0_47 = arith.constant 0 : index
    %52 = vector.load %arg2[%c8, %c0_46, %c0_47] : memref<9x16x4xbf16, #tpu.memory_space<vmem>>, vector<1x16x4xbf16>
    %53 = vector.shape_cast %52 : vector<1x16x4xbf16> to vector<16x4xbf16>
    %cst_48 = arith.constant dense<0.000000e+00> : vector<16x324xf32>
    %54 = tpu.matmul %53, %51, %cst_48 {dimension_numbers = #tpu.dot_dimension_numbers<[1], [0], [0], [1], [0, 0, 1, 1], [], []>} : vector<16x4xbf16>, vector<4x324xbf16>, vector<16x324xf32> -> vector<16x324xf32>
    %55 = arith.addf %49, %54 : vector<16x324xf32>
    %c0_49 = arith.constant 0 : index
    %c0_50 = arith.constant 0 : index
    %56 = vector.load %arg3[%c0_49, %c0_50] : memref<16x1xf32, #tpu.memory_space<vmem>>, vector<16x1xf32>
    %57 = vector.broadcast %56 : vector<16x1xf32> to vector<16x324xf32>
    %58 = arith.addf %55, %57 : vector<16x324xf32>
    %cst_51 = arith.constant 0.000000e+00 : f32
    %59 = vector.broadcast %cst_51 : f32 to vector<16x324xf32>
    %60 = arith.cmpf oge, %58, %59 : vector<16x324xf32>
    %cst_52 = arith.constant 2.000000e-01 : f32
    %61 = vector.broadcast %cst_52 : f32 to vector<16x324xf32>
    %62 = arith.mulf %61, %58 : vector<16x324xf32>
    %63 = arith.select %60, %58, %62 : vector<16x324xi1>, vector<16x324xf32>
    %64 = arith.truncf %63 : vector<16x324xf32> to vector<16x324xbf16>
    %c0_53 = arith.constant 0 : index
    %c0_54 = arith.constant 0 : index
    %65 = vector.load %arg4[%c0_53, %c0_54] : memref<324x128xbf16, #tpu.memory_space<vmem>>, vector<324x128xbf16>
    %cst_55 = arith.constant dense<0.000000e+00> : vector<16x128xf32>
    %66 = tpu.matmul %64, %65, %cst_55 {dimension_numbers = #tpu.dot_dimension_numbers<[1], [0], [0], [1], [0, 0, 1, 1], [], []>} : vector<16x324xbf16>, vector<324x128xbf16>, vector<16x128xf32> -> vector<16x128xf32>
    %67 = arith.truncf %66 : vector<16x128xf32> to vector<16x128xbf16>
    %c0_56 = arith.constant 0 : index
    %c0_57 = arith.constant 0 : index
    %68 = vector.load %arg19[%c0_56, %c0_57] : memref<16x128xbf16, #tpu.memory_space<vmem>>, vector<16x128xbf16>
    tpu.vector_store %arg19[%c0_56, %c0_57], %67 {strides = array<i32>} : memref<16x128xbf16, #tpu.memory_space<vmem>>, vector<16x128xbf16>,
    %c0_58 = arith.constant 0 : index
    %c0_59 = arith.constant 0 : index
    %c19_60 = arith.constant 19 : index
    %69 = vector.load %arg1[%c0_58, %c0_59, %c19_60] : memref<1x4x384xbf16, #tpu.memory_space<vmem>>, vector<1x4x324xbf16>
    %70 = vector.shape_cast %69 : vector<1x4x324xbf16> to vector<4x324xbf16>
    %c0_61 = arith.constant 0 : index
    %c0_62 = arith.constant 0 : index
    %71 = vector.load %arg4[%c0_61, %c0_62] : memref<324x128xbf16, #tpu.memory_space<vmem>>, vector<324x128xbf16>
    %cst_63 = arith.constant dense<0.000000e+00> : vector<4x128xf32>
    %72 = tpu.matmul %70, %71, %cst_63 {dimension_numbers = #tpu.dot_dimension_numbers<[1], [0], [0], [1], [0, 0, 1, 1], [], []>} : vector<4x324xbf16>, vector<324x128xbf16>, vector<4x128xf32> -> vector<4x128xf32>
    %73 = arith.truncf %72 : vector<4x128xf32> to vector<4x128xbf16>
    %c0_64 = arith.constant 0 : index
    %c0_65 = arith.constant 0 : index
    %74 = vector.load %arg22[%c0_64, %c0_65] : memref<4x128xbf16, #tpu.memory_space<vmem>>, vector<4x128xbf16>
    tpu.vector_store %arg22[%c0_64, %c0_65], %73 {strides = array<i32>} : memref<4x128xbf16, #tpu.memory_space<vmem>>, vector<4x128xbf16>,
    %cst_66 = arith.constant 0.000000e+00 : f32
    %75 = vector.broadcast %cst_66 : f32 to vector<16x100xf32>
    %c0_67 = arith.constant 0 : index
    %c0_68 = arith.constant 0 : index
    %76 = vector.load %arg19[%c0_67, %c0_68] : memref<16x128xbf16, #tpu.memory_space<vmem>>, vector<16x100xbf16>
    %c0_69 = arith.constant 0 : index
    %c0_70 = arith.constant 0 : index
    %c0_71 = arith.constant 0 : index
    %77 = vector.load %arg5[%c0_69, %c0_70, %c0_71] : memref<9x16x16xbf16, #tpu.memory_space<vmem>>, vector<1x16x16xbf16>
    %78 = vector.shape_cast %77 : vector<1x16x16xbf16> to vector<16x16xbf16>
    %cst_72 = arith.constant dense<0.000000e+00> : vector<16x100xf32>
    %79 = tpu.matmul %78, %76, %cst_72 {dimension_numbers = #tpu.dot_dimension_numbers<[1], [0], [0], [1], [0, 0, 1, 1], [], []>} : vector<16x16xbf16>, vector<16x100xbf16>, vector<16x100xf32> -> vector<16x100xf32>
    %80 = arith.addf %75, %79 : vector<16x100xf32>
    %c0_73 = arith.constant 0 : index
    %c1_74 = arith.constant 1 : index
    %81 = vector.load %arg19[%c0_73, %c1_74] : memref<16x128xbf16, #tpu.memory_space<vmem>>, vector<16x100xbf16>
    %c1_75 = arith.constant 1 : index
    %c0_76 = arith.constant 0 : index
    %c0_77 = arith.constant 0 : index
    %82 = vector.load %arg5[%c1_75, %c0_76, %c0_77] : memref<9x16x16xbf16, #tpu.memory_space<vmem>>, vector<1x16x16xbf16>
    %83 = vector.shape_cast %82 : vector<1x16x16xbf16> to vector<16x16xbf16>
    %cst_78 = arith.constant dense<0.000000e+00> : vector<16x100xf32>
    %84 = tpu.matmul %83, %81, %cst_78 {dimension_numbers = #tpu.dot_dimension_numbers<[1], [0], [0], [1], [0, 0, 1, 1], [], []>} : vector<16x16xbf16>, vector<16x100xbf16>, vector<16x100xf32> -> vector<16x100xf32>
    %85 = arith.addf %80, %84 : vector<16x100xf32>
    %c0_79 = arith.constant 0 : index
    %c2_80 = arith.constant 2 : index
    %86 = vector.load %arg19[%c0_79, %c2_80] : memref<16x128xbf16, #tpu.memory_space<vmem>>, vector<16x100xbf16>
    %c2_81 = arith.constant 2 : index
    %c0_82 = arith.constant 0 : index
    %c0_83 = arith.constant 0 : index
    %87 = vector.load %arg5[%c2_81, %c0_82, %c0_83] : memref<9x16x16xbf16, #tpu.memory_space<vmem>>, vector<1x16x16xbf16>
    %88 = vector.shape_cast %87 : vector<1x16x16xbf16> to vector<16x16xbf16>
    %cst_84 = arith.constant dense<0.000000e+00> : vector<16x100xf32>
    %89 = tpu.matmul %88, %86, %cst_84 {dimension_numbers = #tpu.dot_dimension_numbers<[1], [0], [0], [1], [0, 0, 1, 1], [], []>} : vector<16x16xbf16>, vector<16x100xbf16>, vector<16x100xf32> -> vector<16x100xf32>
    %90 = arith.addf %85, %89 : vector<16x100xf32>
    %c0_85 = arith.constant 0 : index
    %c10 = arith.constant 10 : index
    %91 = vector.load %arg19[%c0_85, %c10] : memref<16x128xbf16, #tpu.memory_space<vmem>>, vector<16x100xbf16>
    %c3_86 = arith.constant 3 : index
    %c0_87 = arith.constant 0 : index
    %c0_88 = arith.constant 0 : index
    %92 = vector.load %arg5[%c3_86, %c0_87, %c0_88] : memref<9x16x16xbf16, #tpu.memory_space<vmem>>, vector<1x16x16xbf16>
    %93 = vector.shape_cast %92 : vector<1x16x16xbf16> to vector<16x16xbf16>
    %cst_89 = arith.constant dense<0.000000e+00> : vector<16x100xf32>
    %94 = tpu.matmul %93, %91, %cst_89 {dimension_numbers = #tpu.dot_dimension_numbers<[1], [0], [0], [1], [0, 0, 1, 1], [], []>} : vector<16x16xbf16>, vector<16x100xbf16>, vector<16x100xf32> -> vector<16x100xf32>
    %95 = arith.addf %90, %94 : vector<16x100xf32>
    %c0_90 = arith.constant 0 : index
    %c11_91 = arith.constant 11 : index
    %96 = vector.load %arg19[%c0_90, %c11_91] : memref<16x128xbf16, #tpu.memory_space<vmem>>, vector<16x100xbf16>
    %c4_92 = arith.constant 4 : index
    %c0_93 = arith.constant 0 : index
    %c0_94 = arith.constant 0 : index
    %97 = vector.load %arg5[%c4_92, %c0_93, %c0_94] : memref<9x16x16xbf16, #tpu.memory_space<vmem>>, vector<1x16x16xbf16>
    %98 = vector.shape_cast %97 : vector<1x16x16xbf16> to vector<16x16xbf16>
    %cst_95 = arith.constant dense<0.000000e+00> : vector<16x100xf32>
    %99 = tpu.matmul %98, %96, %cst_95 {dimension_numbers = #tpu.dot_dimension_numbers<[1], [0], [0], [1], [0, 0, 1, 1], [], []>} : vector<16x16xbf16>, vector<16x100xbf16>, vector<16x100xf32> -> vector<16x100xf32>
    %100 = arith.addf %95, %99 : vector<16x100xf32>
    %c0_96 = arith.constant 0 : index
    %c12 = arith.constant 12 : index
    %101 = vector.load %arg19[%c0_96, %c12] : memref<16x128xbf16, #tpu.memory_space<vmem>>, vector<16x100xbf16>
    %c5_97 = arith.constant 5 : index
    %c0_98 = arith.constant 0 : index
    %c0_99 = arith.constant 0 : index
    %102 = vector.load %arg5[%c5_97, %c0_98, %c0_99] : memref<9x16x16xbf16, #tpu.memory_space<vmem>>, vector<1x16x16xbf16>
    %103 = vector.shape_cast %102 : vector<1x16x16xbf16> to vector<16x16xbf16>
    %cst_100 = arith.constant dense<0.000000e+00> : vector<16x100xf32>
    %104 = tpu.matmul %103, %101, %cst_100 {dimension_numbers = #tpu.dot_dimension_numbers<[1], [0], [0], [1], [0, 0, 1, 1], [], []>} : vector<16x16xbf16>, vector<16x100xbf16>, vector<16x100xf32> -> vector<16x100xf32>
    %105 = arith.addf %100, %104 : vector<16x100xf32>
    %c0_101 = arith.constant 0 : index
    %c20_102 = arith.constant 20 : index
    %106 = vector.load %arg19[%c0_101, %c20_102] : memref<16x128xbf16, #tpu.memory_space<vmem>>, vector<16x100xbf16>
    %c6_103 = arith.constant 6 : index
    %c0_104 = arith.constant 0 : index
    %c0_105 = arith.constant 0 : index
    %107 = vector.load %arg5[%c6_103, %c0_104, %c0_105] : memref<9x16x16xbf16, #tpu.memory_space<vmem>>, vector<1x16x16xbf16>
    %108 = vector.shape_cast %107 : vector<1x16x16xbf16> to vector<16x16xbf16>
    %cst_106 = arith.constant dense<0.000000e+00> : vector<16x100xf32>
    %109 = tpu.matmul %108, %106, %cst_106 {dimension_numbers = #tpu.dot_dimension_numbers<[1], [0], [0], [1], [0, 0, 1, 1], [], []>} : vector<16x16xbf16>, vector<16x100xbf16>, vector<16x100xf32> -> vector<16x100xf32>
    %110 = arith.addf %105, %109 : vector<16x100xf32>
    %c0_107 = arith.constant 0 : index
    %c21 = arith.constant 21 : index
    %111 = vector.load %arg19[%c0_107, %c21] : memref<16x128xbf16, #tpu.memory_space<vmem>>, vector<16x100xbf16>
    %c7_108 = arith.constant 7 : index
    %c0_109 = arith.constant 0 : index
    %c0_110 = arith.constant 0 : index
    %112 = vector.load %arg5[%c7_108, %c0_109, %c0_110] : memref<9x16x16xbf16, #tpu.memory_space<vmem>>, vector<1x16x16xbf16>
    %113 = vector.shape_cast %112 : vector<1x16x16xbf16> to vector<16x16xbf16>
    %cst_111 = arith.constant dense<0.000000e+00> : vector<16x100xf32>
    %114 = tpu.matmul %113, %111, %cst_111 {dimension_numbers = #tpu.dot_dimension_numbers<[1], [0], [0], [1], [0, 0, 1, 1], [], []>} : vector<16x16xbf16>, vector<16x100xbf16>, vector<16x100xf32> -> vector<16x100xf32>
    %115 = arith.addf %110, %114 : vector<16x100xf32>
    %c0_112 = arith.constant 0 : index
    %c22 = arith.constant 22 : index
    %116 = vector.load %arg19[%c0_112, %c22] : memref<16x128xbf16, #tpu.memory_space<vmem>>, vector<16x100xbf16>
    %c8_113 = arith.constant 8 : index
    %c0_114 = arith.constant 0 : index
    %c0_115 = arith.constant 0 : index
    %117 = vector.load %arg5[%c8_113, %c0_114, %c0_115] : memref<9x16x16xbf16, #tpu.memory_space<vmem>>, vector<1x16x16xbf16>
    %118 = vector.shape_cast %117 : vector<1x16x16xbf16> to vector<16x16xbf16>
    %cst_116 = arith.constant dense<0.000000e+00> : vector<16x100xf32>
    %119 = tpu.matmul %118, %116, %cst_116 {dimension_numbers = #tpu.dot_dimension_numbers<[1], [0], [0], [1], [0, 0, 1, 1], [], []>} : vector<16x16xbf16>, vector<16x100xbf16>, vector<16x100xf32> -> vector<16x100xf32>
    %120 = arith.addf %115, %119 : vector<16x100xf32>
    %c0_117 = arith.constant 0 : index
    %c0_118 = arith.constant 0 : index
    %121 = vector.load %arg6[%c0_117, %c0_118] : memref<16x1xf32, #tpu.memory_space<vmem>>, vector<16x1xf32>
    %122 = vector.broadcast %121 : vector<16x1xf32> to vector<16x100xf32>
    %123 = arith.addf %120, %122 : vector<16x100xf32>
    %cst_119 = arith.constant 0.000000e+00 : f32
    %124 = vector.broadcast %cst_119 : f32 to vector<16x100xf32>
    %125 = arith.cmpf oge, %123, %124 : vector<16x100xf32>
    %cst_120 = arith.constant 2.000000e-01 : f32
    %126 = vector.broadcast %cst_120 : f32 to vector<16x100xf32>
    %127 = arith.mulf %126, %123 : vector<16x100xf32>
    %128 = arith.select %125, %123, %127 : vector<16x100xi1>, vector<16x100xf32>
    %cst_121 = arith.constant 0.000000e+00 : f32
    %129 = vector.broadcast %cst_121 : f32 to vector<1x100xf32>
    %130 = arith.cmpf ogt, %0, %129 : vector<1x100xf32>
    %cst_122 = arith.constant 0.000000e+00 : f32
    %131 = vector.shape_cast %130 : vector<1x100xi1> to vector<1x100xi1>
    %132 = vector.broadcast %131 : vector<1x100xi1> to vector<16x100xi1>
    %133 = vector.broadcast %cst_122 : f32 to vector<16x100xf32>
    %134 = arith.select %132, %128, %133 : vector<16x100xi1>, vector<16x100xf32>
    %cst_123 = arith.constant 0.000000e+00 : bf16
    %135 = vector.broadcast %cst_123 : bf16 to vector<16x128xbf16>
    %c0_124 = arith.constant 0 : index
    %c0_125 = arith.constant 0 : index
    %136 = vector.load %arg20[%c0_124, %c0_125] : memref<16x128xbf16, #tpu.memory_space<vmem>>, vector<16x128xbf16>
    tpu.vector_store %arg20[%c0_124, %c0_125], %135 {strides = array<i32>} : memref<16x128xbf16, #tpu.memory_space<vmem>>, vector<16x128xbf16>,
    %137 = arith.truncf %134 : vector<16x100xf32> to vector<16x100xbf16>
    %c0_126 = arith.constant 0 : index
    %c11_127 = arith.constant 11 : index
    %138 = vector.load %arg20[%c0_126, %c11_127] : memref<16x128xbf16, #tpu.memory_space<vmem>>, vector<16x100xbf16>
    tpu.vector_store %arg20[%c0_126, %c11_127], %137 {strides = array<i32>} : memref<16x128xbf16, #tpu.memory_space<vmem>>, vector<16x100xbf16>,
    %cst_128 = arith.constant 0.000000e+00 : f32
    %139 = vector.broadcast %cst_128 : f32 to vector<4x100xf32>
    %c0_129 = arith.constant 0 : index
    %c0_130 = arith.constant 0 : index
    %140 = vector.load %arg20[%c0_129, %c0_130] : memref<16x128xbf16, #tpu.memory_space<vmem>>, vector<16x100xbf16>
    %c0_131 = arith.constant 0 : index
    %c0_132 = arith.constant 0 : index
    %c0_133 = arith.constant 0 : index
    %141 = vector.load %arg7[%c0_131, %c0_132, %c0_133] : memref<9x4x16xbf16, #tpu.memory_space<vmem>>, vector<1x4x16xbf16>
    %142 = vector.shape_cast %141 : vector<1x4x16xbf16> to vector<4x16xbf16>
    %cst_134 = arith.constant dense<0.000000e+00> : vector<4x100xf32>
    %143 = tpu.matmul %142, %140, %cst_134 {dimension_numbers = #tpu.dot_dimension_numbers<[1], [0], [0], [1], [0, 0, 1, 1], [], []>} : vector<4x16xbf16>, vector<16x100xbf16>, vector<4x100xf32> -> vector<4x100xf32>
    %144 = arith.addf %139, %143 : vector<4x100xf32>
    %c0_135 = arith.constant 0 : index
    %c1_136 = arith.constant 1 : index
    %145 = vector.load %arg20[%c0_135, %c1_136] : memref<16x128xbf16, #tpu.memory_space<vmem>>, vector<16x100xbf16>
    %c1_137 = arith.constant 1 : index
    %c0_138 = arith.constant 0 : index
    %c0_139 = arith.constant 0 : index
    %146 = vector.load %arg7[%c1_137, %c0_138, %c0_139] : memref<9x4x16xbf16, #tpu.memory_space<vmem>>, vector<1x4x16xbf16>
    %147 = vector.shape_cast %146 : vector<1x4x16xbf16> to vector<4x16xbf16>
    %cst_140 = arith.constant dense<0.000000e+00> : vector<4x100xf32>
    %148 = tpu.matmul %147, %145, %cst_140 {dimension_numbers = #tpu.dot_dimension_numbers<[1], [0], [0], [1], [0, 0, 1, 1], [], []>} : vector<4x16xbf16>, vector<16x100xbf16>, vector<4x100xf32> -> vector<4x100xf32>
    %149 = arith.addf %144, %148 : vector<4x100xf32>
    %c0_141 = arith.constant 0 : index
    %c2_142 = arith.constant 2 : index
    %150 = vector.load %arg20[%c0_141, %c2_142] : memref<16x128xbf16, #tpu.memory_space<vmem>>, vector<16x100xbf16>
    %c2_143 = arith.constant 2 : index
    %c0_144 = arith.constant 0 : index
    %c0_145 = arith.constant 0 : index
    %151 = vector.load %arg7[%c2_143, %c0_144, %c0_145] : memref<9x4x16xbf16, #tpu.memory_space<vmem>>, vector<1x4x16xbf16>
    %152 = vector.shape_cast %151 : vector<1x4x16xbf16> to vector<4x16xbf16>
    %cst_146 = arith.constant dense<0.000000e+00> : vector<4x100xf32>
    %153 = tpu.matmul %152, %150, %cst_146 {dimension_numbers = #tpu.dot_dimension_numbers<[1], [0], [0], [1], [0, 0, 1, 1], [], []>} : vector<4x16xbf16>, vector<16x100xbf16>, vector<4x100xf32> -> vector<4x100xf32>
    %154 = arith.addf %149, %153 : vector<4x100xf32>
    %c0_147 = arith.constant 0 : index
    %c10_148 = arith.constant 10 : index
    %155 = vector.load %arg20[%c0_147, %c10_148] : memref<16x128xbf16, #tpu.memory_space<vmem>>, vector<16x100xbf16>
    %c3_149 = arith.constant 3 : index
    %c0_150 = arith.constant 0 : index
    %c0_151 = arith.constant 0 : index
    %156 = vector.load %arg7[%c3_149, %c0_150, %c0_151] : memref<9x4x16xbf16, #tpu.memory_space<vmem>>, vector<1x4x16xbf16>
    %157 = vector.shape_cast %156 : vector<1x4x16xbf16> to vector<4x16xbf16>
    %cst_152 = arith.constant dense<0.000000e+00> : vector<4x100xf32>
    %158 = tpu.matmul %157, %155, %cst_152 {dimension_numbers = #tpu.dot_dimension_numbers<[1], [0], [0], [1], [0, 0, 1, 1], [], []>} : vector<4x16xbf16>, vector<16x100xbf16>, vector<4x100xf32> -> vector<4x100xf32>
    %159 = arith.addf %154, %158 : vector<4x100xf32>
    %c0_153 = arith.constant 0 : index
    %c11_154 = arith.constant 11 : index
    %160 = vector.load %arg20[%c0_153, %c11_154] : memref<16x128xbf16, #tpu.memory_space<vmem>>, vector<16x100xbf16>
    %c4_155 = arith.constant 4 : index
    %c0_156 = arith.constant 0 : index
    %c0_157 = arith.constant 0 : index
    %161 = vector.load %arg7[%c4_155, %c0_156, %c0_157] : memref<9x4x16xbf16, #tpu.memory_space<vmem>>, vector<1x4x16xbf16>
    %162 = vector.shape_cast %161 : vector<1x4x16xbf16> to vector<4x16xbf16>
    %cst_158 = arith.constant dense<0.000000e+00> : vector<4x100xf32>
    %163 = tpu.matmul %162, %160, %cst_158 {dimension_numbers = #tpu.dot_dimension_numbers<[1], [0], [0], [1], [0, 0, 1, 1], [], []>} : vector<4x16xbf16>, vector<16x100xbf16>, vector<4x100xf32> -> vector<4x100xf32>
    %164 = arith.addf %159, %163 : vector<4x100xf32>
    %c0_159 = arith.constant 0 : index
    %c12_160 = arith.constant 12 : index
    %165 = vector.load %arg20[%c0_159, %c12_160] : memref<16x128xbf16, #tpu.memory_space<vmem>>, vector<16x100xbf16>
    %c5_161 = arith.constant 5 : index
    %c0_162 = arith.constant 0 : index
    %c0_163 = arith.constant 0 : index
    %166 = vector.load %arg7[%c5_161, %c0_162, %c0_163] : memref<9x4x16xbf16, #tpu.memory_space<vmem>>, vector<1x4x16xbf16>
    %167 = vector.shape_cast %166 : vector<1x4x16xbf16> to vector<4x16xbf16>
    %cst_164 = arith.constant dense<0.000000e+00> : vector<4x100xf32>
    %168 = tpu.matmul %167, %165, %cst_164 {dimension_numbers = #tpu.dot_dimension_numbers<[1], [0], [0], [1], [0, 0, 1, 1], [], []>} : vector<4x16xbf16>, vector<16x100xbf16>, vector<4x100xf32> -> vector<4x100xf32>
    %169 = arith.addf %164, %168 : vector<4x100xf32>
    %c0_165 = arith.constant 0 : index
    %c20_166 = arith.constant 20 : index
    %170 = vector.load %arg20[%c0_165, %c20_166] : memref<16x128xbf16, #tpu.memory_space<vmem>>, vector<16x100xbf16>
    %c6_167 = arith.constant 6 : index
    %c0_168 = arith.constant 0 : index
    %c0_169 = arith.constant 0 : index
    %171 = vector.load %arg7[%c6_167, %c0_168, %c0_169] : memref<9x4x16xbf16, #tpu.memory_space<vmem>>, vector<1x4x16xbf16>
    %172 = vector.shape_cast %171 : vector<1x4x16xbf16> to vector<4x16xbf16>
    %cst_170 = arith.constant dense<0.000000e+00> : vector<4x100xf32>
    %173 = tpu.matmul %172, %170, %cst_170 {dimension_numbers = #tpu.dot_dimension_numbers<[1], [0], [0], [1], [0, 0, 1, 1], [], []>} : vector<4x16xbf16>, vector<16x100xbf16>, vector<4x100xf32> -> vector<4x100xf32>
    %174 = arith.addf %169, %173 : vector<4x100xf32>
    %c0_171 = arith.constant 0 : index
    %c21_172 = arith.constant 21 : index
    %175 = vector.load %arg20[%c0_171, %c21_172] : memref<16x128xbf16, #tpu.memory_space<vmem>>, vector<16x100xbf16>
    %c7_173 = arith.constant 7 : index
    %c0_174 = arith.constant 0 : index
    %c0_175 = arith.constant 0 : index
    %176 = vector.load %arg7[%c7_173, %c0_174, %c0_175] : memref<9x4x16xbf16, #tpu.memory_space<vmem>>, vector<1x4x16xbf16>
    %177 = vector.shape_cast %176 : vector<1x4x16xbf16> to vector<4x16xbf16>
    %cst_176 = arith.constant dense<0.000000e+00> : vector<4x100xf32>
    %178 = tpu.matmul %177, %175, %cst_176 {dimension_numbers = #tpu.dot_dimension_numbers<[1], [0], [0], [1], [0, 0, 1, 1], [], []>} : vector<4x16xbf16>, vector<16x100xbf16>, vector<4x100xf32> -> vector<4x100xf32>
    %179 = arith.addf %174, %178 : vector<4x100xf32>
    %c0_177 = arith.constant 0 : index
    %c22_178 = arith.constant 22 : index
    %180 = vector.load %arg20[%c0_177, %c22_178] : memref<16x128xbf16, #tpu.memory_space<vmem>>, vector<16x100xbf16>
    %c8_179 = arith.constant 8 : index
    %c0_180 = arith.constant 0 : index
    %c0_181 = arith.constant 0 : index
    %181 = vector.load %arg7[%c8_179, %c0_180, %c0_181] : memref<9x4x16xbf16, #tpu.memory_space<vmem>>, vector<1x4x16xbf16>
    %182 = vector.shape_cast %181 : vector<1x4x16xbf16> to vector<4x16xbf16>
    %cst_182 = arith.constant dense<0.000000e+00> : vector<4x100xf32>
    %183 = tpu.matmul %182, %180, %cst_182 {dimension_numbers = #tpu.dot_dimension_numbers<[1], [0], [0], [1], [0, 0, 1, 1], [], []>} : vector<4x16xbf16>, vector<16x100xbf16>, vector<4x100xf32> -> vector<4x100xf32>
    %184 = arith.addf %179, %183 : vector<4x100xf32>
    %c0_183 = arith.constant 0 : index
    %c0_184 = arith.constant 0 : index
    %185 = vector.load %arg8[%c0_183, %c0_184] : memref<4x1xf32, #tpu.memory_space<vmem>>, vector<4x1xf32>
    %186 = vector.broadcast %185 : vector<4x1xf32> to vector<4x100xf32>
    %187 = arith.addf %184, %186 : vector<4x100xf32>
    %c0_185 = arith.constant 0 : index
    %c11_186 = arith.constant 11 : index
    %188 = vector.load %arg22[%c0_185, %c11_186] : memref<4x128xbf16, #tpu.memory_space<vmem>>, vector<4x100xbf16>
    %189 = arith.extf %188 : vector<4x100xbf16> to vector<4x100xf32>
    %190 = arith.addf %187, %189 : vector<4x100xf32>
    %cst_187 = arith.constant 0.000000e+00 : f32
    %191 = vector.broadcast %cst_187 : f32 to vector<1x100xf32>
    %192 = arith.cmpf ogt, %0, %191 : vector<1x100xf32>
    %cst_188 = arith.constant 0.000000e+00 : f32
    %193 = vector.shape_cast %192 : vector<1x100xi1> to vector<1x100xi1>
    %194 = vector.broadcast %193 : vector<1x100xi1> to vector<4x100xi1>
    %195 = vector.broadcast %cst_188 : f32 to vector<4x100xf32>
    %196 = arith.select %194, %190, %195 : vector<4x100xi1>, vector<4x100xf32>
    %cst_189 = arith.constant 0.000000e+00 : bf16
    %197 = vector.broadcast %cst_189 : bf16 to vector<4x128xbf16>
    %c0_190 = arith.constant 0 : index
    %c0_191 = arith.constant 0 : index
    %198 = vector.load %arg21[%c0_190, %c0_191] : memref<4x128xbf16, #tpu.memory_space<vmem>>, vector<4x128xbf16>
    tpu.vector_store %arg21[%c0_190, %c0_191], %197 {strides = array<i32>} : memref<4x128xbf16, #tpu.memory_space<vmem>>, vector<4x128xbf16>,
    %199 = arith.truncf %196 : vector<4x100xf32> to vector<4x100xbf16>
    %c0_192 = arith.constant 0 : index
    %c11_193 = arith.constant 11 : index
    %200 = vector.load %arg21[%c0_192, %c11_193] : memref<4x128xbf16, #tpu.memory_space<vmem>>, vector<4x100xbf16>
    tpu.vector_store %arg21[%c0_192, %c11_193], %199 {strides = array<i32>} : memref<4x128xbf16, #tpu.memory_space<vmem>>, vector<4x100xbf16>,
    %cst_194 = arith.constant 0.000000e+00 : f32
    %201 = vector.broadcast %cst_194 : f32 to vector<16x100xf32>
    %c0_195 = arith.constant 0 : index
    %c0_196 = arith.constant 0 : index
    %202 = vector.load %arg21[%c0_195, %c0_196] : memref<4x128xbf16, #tpu.memory_space<vmem>>, vector<4x100xbf16>
    %c0_197 = arith.constant 0 : index
    %c0_198 = arith.constant 0 : index
    %c0_199 = arith.constant 0 : index
    %203 = vector.load %arg10[%c0_197, %c0_198, %c0_199] : memref<9x16x4xbf16, #tpu.memory_space<vmem>>, vector<1x16x4xbf16>
    %204 = vector.shape_cast %203 : vector<1x16x4xbf16> to vector<16x4xbf16>
    %cst_200 = arith.constant dense<0.000000e+00> : vector<16x100xf32>
    %205 = tpu.matmul %204, %202, %cst_200 {dimension_numbers = #tpu.dot_dimension_numbers<[1], [0], [0], [1], [0, 0, 1, 1], [], []>} : vector<16x4xbf16>, vector<4x100xbf16>, vector<16x100xf32> -> vector<16x100xf32>
    %206 = arith.addf %201, %205 : vector<16x100xf32>
    %c0_201 = arith.constant 0 : index
    %c1_202 = arith.constant 1 : index
    %207 = vector.load %arg21[%c0_201, %c1_202] : memref<4x128xbf16, #tpu.memory_space<vmem>>, vector<4x100xbf16>
    %c1_203 = arith.constant 1 : index
    %c0_204 = arith.constant 0 : index
    %c0_205 = arith.constant 0 : index
    %208 = vector.load %arg10[%c1_203, %c0_204, %c0_205] : memref<9x16x4xbf16, #tpu.memory_space<vmem>>, vector<1x16x4xbf16>
    %209 = vector.shape_cast %208 : vector<1x16x4xbf16> to vector<16x4xbf16>
    %cst_206 = arith.constant dense<0.000000e+00> : vector<16x100xf32>
    %210 = tpu.matmul %209, %207, %cst_206 {dimension_numbers = #tpu.dot_dimension_numbers<[1], [0], [0], [1], [0, 0, 1, 1], [], []>} : vector<16x4xbf16>, vector<4x100xbf16>, vector<16x100xf32> -> vector<16x100xf32>
    %211 = arith.addf %206, %210 : vector<16x100xf32>
    %c0_207 = arith.constant 0 : index
    %c2_208 = arith.constant 2 : index
    %212 = vector.load %arg21[%c0_207, %c2_208] : memref<4x128xbf16, #tpu.memory_space<vmem>>, vector<4x100xbf16>
    %c2_209 = arith.constant 2 : index
    %c0_210 = arith.constant 0 : index
    %c0_211 = arith.constant 0 : index
    %213 = vector.load %arg10[%c2_209, %c0_210, %c0_211] : memref<9x16x4xbf16, #tpu.memory_space<vmem>>, vector<1x16x4xbf16>
    %214 = vector.shape_cast %213 : vector<1x16x4xbf16> to vector<16x4xbf16>
    %cst_212 = arith.constant dense<0.000000e+00> : vector<16x100xf32>
    %215 = tpu.matmul %214, %212, %cst_212 {dimension_numbers = #tpu.dot_dimension_numbers<[1], [0], [0], [1], [0, 0, 1, 1], [], []>} : vector<16x4xbf16>, vector<4x100xbf16>, vector<16x100xf32> -> vector<16x100xf32>
    %216 = arith.addf %211, %215 : vector<16x100xf32>
    %c0_213 = arith.constant 0 : index
    %c10_214 = arith.constant 10 : index
    %217 = vector.load %arg21[%c0_213, %c10_214] : memref<4x128xbf16, #tpu.memory_space<vmem>>, vector<4x100xbf16>
    %c3_215 = arith.constant 3 : index
    %c0_216 = arith.constant 0 : index
    %c0_217 = arith.constant 0 : index
    %218 = vector.load %arg10[%c3_215, %c0_216, %c0_217] : memref<9x16x4xbf16, #tpu.memory_space<vmem>>, vector<1x16x4xbf16>
    %219 = vector.shape_cast %218 : vector<1x16x4xbf16> to vector<16x4xbf16>
    %cst_218 = arith.constant dense<0.000000e+00> : vector<16x100xf32>
    %220 = tpu.matmul %219, %217, %cst_218 {dimension_numbers = #tpu.dot_dimension_numbers<[1], [0], [0], [1], [0, 0, 1, 1], [], []>} : vector<16x4xbf16>, vector<4x100xbf16>, vector<16x100xf32> -> vector<16x100xf32>
    %221 = arith.addf %216, %220 : vector<16x100xf32>
    %c0_219 = arith.constant 0 : index
    %c11_220 = arith.constant 11 : index
    %222 = vector.load %arg21[%c0_219, %c11_220] : memref<4x128xbf16, #tpu.memory_space<vmem>>, vector<4x100xbf16>
    %c4_221 = arith.constant 4 : index
    %c0_222 = arith.constant 0 : index
    %c0_223 = arith.constant 0 : index
    %223 = vector.load %arg10[%c4_221, %c0_222, %c0_223] : memref<9x16x4xbf16, #tpu.memory_space<vmem>>, vector<1x16x4xbf16>
    %224 = vector.shape_cast %223 : vector<1x16x4xbf16> to vector<16x4xbf16>
    %cst_224 = arith.constant dense<0.000000e+00> : vector<16x100xf32>
    %225 = tpu.matmul %224, %222, %cst_224 {dimension_numbers = #tpu.dot_dimension_numbers<[1], [0], [0], [1], [0, 0, 1, 1], [], []>} : vector<16x4xbf16>, vector<4x100xbf16>, vector<16x100xf32> -> vector<16x100xf32>
    %226 = arith.addf %221, %225 : vector<16x100xf32>
    %c0_225 = arith.constant 0 : index
    %c12_226 = arith.constant 12 : index
    %227 = vector.load %arg21[%c0_225, %c12_226] : memref<4x128xbf16, #tpu.memory_space<vmem>>, vector<4x100xbf16>
    %c5_227 = arith.constant 5 : index
    %c0_228 = arith.constant 0 : index
    %c0_229 = arith.constant 0 : index
    %228 = vector.load %arg10[%c5_227, %c0_228, %c0_229] : memref<9x16x4xbf16, #tpu.memory_space<vmem>>, vector<1x16x4xbf16>
    %229 = vector.shape_cast %228 : vector<1x16x4xbf16> to vector<16x4xbf16>
    %cst_230 = arith.constant dense<0.000000e+00> : vector<16x100xf32>
    %230 = tpu.matmul %229, %227, %cst_230 {dimension_numbers = #tpu.dot_dimension_numbers<[1], [0], [0], [1], [0, 0, 1, 1], [], []>} : vector<16x4xbf16>, vector<4x100xbf16>, vector<16x100xf32> -> vector<16x100xf32>
    %231 = arith.addf %226, %230 : vector<16x100xf32>
    %c0_231 = arith.constant 0 : index
    %c20_232 = arith.constant 20 : index
    %232 = vector.load %arg21[%c0_231, %c20_232] : memref<4x128xbf16, #tpu.memory_space<vmem>>, vector<4x100xbf16>
    %c6_233 = arith.constant 6 : index
    %c0_234 = arith.constant 0 : index
    %c0_235 = arith.constant 0 : index
    %233 = vector.load %arg10[%c6_233, %c0_234, %c0_235] : memref<9x16x4xbf16, #tpu.memory_space<vmem>>, vector<1x16x4xbf16>
    %234 = vector.shape_cast %233 : vector<1x16x4xbf16> to vector<16x4xbf16>
    %cst_236 = arith.constant dense<0.000000e+00> : vector<16x100xf32>
    %235 = tpu.matmul %234, %232, %cst_236 {dimension_numbers = #tpu.dot_dimension_numbers<[1], [0], [0], [1], [0, 0, 1, 1], [], []>} : vector<16x4xbf16>, vector<4x100xbf16>, vector<16x100xf32> -> vector<16x100xf32>
    %236 = arith.addf %231, %235 : vector<16x100xf32>
    %c0_237 = arith.constant 0 : index
    %c21_238 = arith.constant 21 : index
    %237 = vector.load %arg21[%c0_237, %c21_238] : memref<4x128xbf16, #tpu.memory_space<vmem>>, vector<4x100xbf16>
    %c7_239 = arith.constant 7 : index
    %c0_240 = arith.constant 0 : index
    %c0_241 = arith.constant 0 : index
    %238 = vector.load %arg10[%c7_239, %c0_240, %c0_241] : memref<9x16x4xbf16, #tpu.memory_space<vmem>>, vector<1x16x4xbf16>
    %239 = vector.shape_cast %238 : vector<1x16x4xbf16> to vector<16x4xbf16>
    %cst_242 = arith.constant dense<0.000000e+00> : vector<16x100xf32>
    %240 = tpu.matmul %239, %237, %cst_242 {dimension_numbers = #tpu.dot_dimension_numbers<[1], [0], [0], [1], [0, 0, 1, 1], [], []>} : vector<16x4xbf16>, vector<4x100xbf16>, vector<16x100xf32> -> vector<16x100xf32>
    %241 = arith.addf %236, %240 : vector<16x100xf32>
    %c0_243 = arith.constant 0 : index
    %c22_244 = arith.constant 22 : index
    %242 = vector.load %arg21[%c0_243, %c22_244] : memref<4x128xbf16, #tpu.memory_space<vmem>>, vector<4x100xbf16>
    %c8_245 = arith.constant 8 : index
    %c0_246 = arith.constant 0 : index
    %c0_247 = arith.constant 0 : index
    %243 = vector.load %arg10[%c8_245, %c0_246, %c0_247] : memref<9x16x4xbf16, #tpu.memory_space<vmem>>, vector<1x16x4xbf16>
    %244 = vector.shape_cast %243 : vector<1x16x4xbf16> to vector<16x4xbf16>
    %cst_248 = arith.constant dense<0.000000e+00> : vector<16x100xf32>
    %245 = tpu.matmul %244, %242, %cst_248 {dimension_numbers = #tpu.dot_dimension_numbers<[1], [0], [0], [1], [0, 0, 1, 1], [], []>} : vector<16x4xbf16>, vector<4x100xbf16>, vector<16x100xf32> -> vector<16x100xf32>
    %246 = arith.addf %241, %245 : vector<16x100xf32>
    %c0_249 = arith.constant 0 : index
    %c0_250 = arith.constant 0 : index
    %247 = vector.load %arg11[%c0_249, %c0_250] : memref<16x1xf32, #tpu.memory_space<vmem>>, vector<16x1xf32>
    %248 = vector.broadcast %247 : vector<16x1xf32> to vector<16x100xf32>
    %249 = arith.addf %246, %248 : vector<16x100xf32>
    %cst_251 = arith.constant 0.000000e+00 : f32
    %250 = vector.broadcast %cst_251 : f32 to vector<16x100xf32>
    %251 = arith.maximumf %249, %250 : vector<16x100xf32>
    %cst_252 = arith.constant 0.000000e+00 : f32
    %252 = vector.broadcast %cst_252 : f32 to vector<1x100xf32>
    %253 = arith.cmpf ogt, %0, %252 : vector<1x100xf32>
    %cst_253 = arith.constant 0.000000e+00 : f32
    %254 = vector.shape_cast %253 : vector<1x100xi1> to vector<1x100xi1>
    %255 = vector.broadcast %254 : vector<1x100xi1> to vector<16x100xi1>
    %256 = vector.broadcast %cst_253 : f32 to vector<16x100xf32>
    %257 = arith.select %255, %251, %256 : vector<16x100xi1>, vector<16x100xf32>
    %cst_254 = arith.constant 0.000000e+00 : bf16
    %258 = vector.broadcast %cst_254 : bf16 to vector<16x128xbf16>
    %c0_255 = arith.constant 0 : index
    %c0_256 = arith.constant 0 : index
    %259 = vector.load %arg23[%c0_255, %c0_256] : memref<16x128xbf16, #tpu.memory_space<vmem>>, vector<16x128xbf16>
    tpu.vector_store %arg23[%c0_255, %c0_256], %258 {strides = array<i32>} : memref<16x128xbf16, #tpu.memory_space<vmem>>, vector<16x128xbf16>,
    %260 = arith.truncf %257 : vector<16x100xf32> to vector<16x100xbf16>
    %c0_257 = arith.constant 0 : index
    %c11_258 = arith.constant 11 : index
    %261 = vector.load %arg23[%c0_257, %c11_258] : memref<16x128xbf16, #tpu.memory_space<vmem>>, vector<16x100xbf16>
    tpu.vector_store %arg23[%c0_257, %c11_258], %260 {strides = array<i32>} : memref<16x128xbf16, #tpu.memory_space<vmem>>, vector<16x100xbf16>,
    %cst_259 = arith.constant 0.000000e+00 : f32
    %262 = vector.broadcast %cst_259 : f32 to vector<16x100xf32>
    %c0_260 = arith.constant 0 : index
    %c0_261 = arith.constant 0 : index
    %263 = vector.load %arg23[%c0_260, %c0_261] : memref<16x128xbf16, #tpu.memory_space<vmem>>, vector<16x100xbf16>
    %c0_262 = arith.constant 0 : index
    %c0_263 = arith.constant 0 : index
    %c0_264 = arith.constant 0 : index
    %264 = vector.load %arg12[%c0_262, %c0_263, %c0_264] : memref<9x16x16xbf16, #tpu.memory_space<vmem>>, vector<1x16x16xbf16>
    %265 = vector.shape_cast %264 : vector<1x16x16xbf16> to vector<16x16xbf16>
    %cst_265 = arith.constant dense<0.000000e+00> : vector<16x100xf32>
    %266 = tpu.matmul %265, %263, %cst_265 {dimension_numbers = #tpu.dot_dimension_numbers<[1], [0], [0], [1], [0, 0, 1, 1], [], []>} : vector<16x16xbf16>, vector<16x100xbf16>, vector<16x100xf32> -> vector<16x100xf32>
    %267 = arith.addf %262, %266 : vector<16x100xf32>
    %c0_266 = arith.constant 0 : index
    %c1_267 = arith.constant 1 : index
    %268 = vector.load %arg23[%c0_266, %c1_267] : memref<16x128xbf16, #tpu.memory_space<vmem>>, vector<16x100xbf16>
    %c1_268 = arith.constant 1 : index
    %c0_269 = arith.constant 0 : index
    %c0_270 = arith.constant 0 : index
    %269 = vector.load %arg12[%c1_268, %c0_269, %c0_270] : memref<9x16x16xbf16, #tpu.memory_space<vmem>>, vector<1x16x16xbf16>
    %270 = vector.shape_cast %269 : vector<1x16x16xbf16> to vector<16x16xbf16>
    %cst_271 = arith.constant dense<0.000000e+00> : vector<16x100xf32>
    %271 = tpu.matmul %270, %268, %cst_271 {dimension_numbers = #tpu.dot_dimension_numbers<[1], [0], [0], [1], [0, 0, 1, 1], [], []>} : vector<16x16xbf16>, vector<16x100xbf16>, vector<16x100xf32> -> vector<16x100xf32>
    %272 = arith.addf %267, %271 : vector<16x100xf32>
    %c0_272 = arith.constant 0 : index
    %c2_273 = arith.constant 2 : index
    %273 = vector.load %arg23[%c0_272, %c2_273] : memref<16x128xbf16, #tpu.memory_space<vmem>>, vector<16x100xbf16>
    %c2_274 = arith.constant 2 : index
    %c0_275 = arith.constant 0 : index
    %c0_276 = arith.constant 0 : index
    %274 = vector.load %arg12[%c2_274, %c0_275, %c0_276] : memref<9x16x16xbf16, #tpu.memory_space<vmem>>, vector<1x16x16xbf16>
    %275 = vector.shape_cast %274 : vector<1x16x16xbf16> to vector<16x16xbf16>
    %cst_277 = arith.constant dense<0.000000e+00> : vector<16x100xf32>
    %276 = tpu.matmul %275, %273, %cst_277 {dimension_numbers = #tpu.dot_dimension_numbers<[1], [0], [0], [1], [0, 0, 1, 1], [], []>} : vector<16x16xbf16>, vector<16x100xbf16>, vector<16x100xf32> -> vector<16x100xf32>
    %277 = arith.addf %272, %276 : vector<16x100xf32>
    %c0_278 = arith.constant 0 : index
    %c10_279 = arith.constant 10 : index
    %278 = vector.load %arg23[%c0_278, %c10_279] : memref<16x128xbf16, #tpu.memory_space<vmem>>, vector<16x100xbf16>
    %c3_280 = arith.constant 3 : index
    %c0_281 = arith.constant 0 : index
    %c0_282 = arith.constant 0 : index
    %279 = vector.load %arg12[%c3_280, %c0_281, %c0_282] : memref<9x16x16xbf16, #tpu.memory_space<vmem>>, vector<1x16x16xbf16>
    %280 = vector.shape_cast %279 : vector<1x16x16xbf16> to vector<16x16xbf16>
    %cst_283 = arith.constant dense<0.000000e+00> : vector<16x100xf32>
    %281 = tpu.matmul %280, %278, %cst_283 {dimension_numbers = #tpu.dot_dimension_numbers<[1], [0], [0], [1], [0, 0, 1, 1], [], []>} : vector<16x16xbf16>, vector<16x100xbf16>, vector<16x100xf32> -> vector<16x100xf32>
    %282 = arith.addf %277, %281 : vector<16x100xf32>
    %c0_284 = arith.constant 0 : index
    %c11_285 = arith.constant 11 : index
    %283 = vector.load %arg23[%c0_284, %c11_285] : memref<16x128xbf16, #tpu.memory_space<vmem>>, vector<16x100xbf16>
    %c4_286 = arith.constant 4 : index
    %c0_287 = arith.constant 0 : index
    %c0_288 = arith.constant 0 : index
    %284 = vector.load %arg12[%c4_286, %c0_287, %c0_288] : memref<9x16x16xbf16, #tpu.memory_space<vmem>>, vector<1x16x16xbf16>
    %285 = vector.shape_cast %284 : vector<1x16x16xbf16> to vector<16x16xbf16>
    %cst_289 = arith.constant dense<0.000000e+00> : vector<16x100xf32>
    %286 = tpu.matmul %285, %283, %cst_289 {dimension_numbers = #tpu.dot_dimension_numbers<[1], [0], [0], [1], [0, 0, 1, 1], [], []>} : vector<16x16xbf16>, vector<16x100xbf16>, vector<16x100xf32> -> vector<16x100xf32>
    %287 = arith.addf %282, %286 : vector<16x100xf32>
    %c0_290 = arith.constant 0 : index
    %c12_291 = arith.constant 12 : index
    %288 = vector.load %arg23[%c0_290, %c12_291] : memref<16x128xbf16, #tpu.memory_space<vmem>>, vector<16x100xbf16>
    %c5_292 = arith.constant 5 : index
    %c0_293 = arith.constant 0 : index
    %c0_294 = arith.constant 0 : index
    %289 = vector.load %arg12[%c5_292, %c0_293, %c0_294] : memref<9x16x16xbf16, #tpu.memory_space<vmem>>, vector<1x16x16xbf16>
    %290 = vector.shape_cast %289 : vector<1x16x16xbf16> to vector<16x16xbf16>
    %cst_295 = arith.constant dense<0.000000e+00> : vector<16x100xf32>
    %291 = tpu.matmul %290, %288, %cst_295 {dimension_numbers = #tpu.dot_dimension_numbers<[1], [0], [0], [1], [0, 0, 1, 1], [], []>} : vector<16x16xbf16>, vector<16x100xbf16>, vector<16x100xf32> -> vector<16x100xf32>
    %292 = arith.addf %287, %291 : vector<16x100xf32>
    %c0_296 = arith.constant 0 : index
    %c20_297 = arith.constant 20 : index
    %293 = vector.load %arg23[%c0_296, %c20_297] : memref<16x128xbf16, #tpu.memory_space<vmem>>, vector<16x100xbf16>
    %c6_298 = arith.constant 6 : index
    %c0_299 = arith.constant 0 : index
    %c0_300 = arith.constant 0 : index
    %294 = vector.load %arg12[%c6_298, %c0_299, %c0_300] : memref<9x16x16xbf16, #tpu.memory_space<vmem>>, vector<1x16x16xbf16>
    %295 = vector.shape_cast %294 : vector<1x16x16xbf16> to vector<16x16xbf16>
    %cst_301 = arith.constant dense<0.000000e+00> : vector<16x100xf32>
    %296 = tpu.matmul %295, %293, %cst_301 {dimension_numbers = #tpu.dot_dimension_numbers<[1], [0], [0], [1], [0, 0, 1, 1], [], []>} : vector<16x16xbf16>, vector<16x100xbf16>, vector<16x100xf32> -> vector<16x100xf32>
    %297 = arith.addf %292, %296 : vector<16x100xf32>
    %c0_302 = arith.constant 0 : index
    %c21_303 = arith.constant 21 : index
    %298 = vector.load %arg23[%c0_302, %c21_303] : memref<16x128xbf16, #tpu.memory_space<vmem>>, vector<16x100xbf16>
    %c7_304 = arith.constant 7 : index
    %c0_305 = arith.constant 0 : index
    %c0_306 = arith.constant 0 : index
    %299 = vector.load %arg12[%c7_304, %c0_305, %c0_306] : memref<9x16x16xbf16, #tpu.memory_space<vmem>>, vector<1x16x16xbf16>
    %300 = vector.shape_cast %299 : vector<1x16x16xbf16> to vector<16x16xbf16>
    %cst_307 = arith.constant dense<0.000000e+00> : vector<16x100xf32>
    %301 = tpu.matmul %300, %298, %cst_307 {dimension_numbers = #tpu.dot_dimension_numbers<[1], [0], [0], [1], [0, 0, 1, 1], [], []>} : vector<16x16xbf16>, vector<16x100xbf16>, vector<16x100xf32> -> vector<16x100xf32>
    %302 = arith.addf %297, %301 : vector<16x100xf32>
    %c0_308 = arith.constant 0 : index
    %c22_309 = arith.constant 22 : index
    %303 = vector.load %arg23[%c0_308, %c22_309] : memref<16x128xbf16, #tpu.memory_space<vmem>>, vector<16x100xbf16>
    %c8_310 = arith.constant 8 : index
    %c0_311 = arith.constant 0 : index
    %c0_312 = arith.constant 0 : index
    %304 = vector.load %arg12[%c8_310, %c0_311, %c0_312] : memref<9x16x16xbf16, #tpu.memory_space<vmem>>, vector<1x16x16xbf16>
    %305 = vector.shape_cast %304 : vector<1x16x16xbf16> to vector<16x16xbf16>
    %cst_313 = arith.constant dense<0.000000e+00> : vector<16x100xf32>
    %306 = tpu.matmul %305, %303, %cst_313 {dimension_numbers = #tpu.dot_dimension_numbers<[1], [0], [0], [1], [0, 0, 1, 1], [], []>} : vector<16x16xbf16>, vector<16x100xbf16>, vector<16x100xf32> -> vector<16x100xf32>
    %307 = arith.addf %302, %306 : vector<16x100xf32>
    %c0_314 = arith.constant 0 : index
    %c0_315 = arith.constant 0 : index
    %308 = vector.load %arg13[%c0_314, %c0_315] : memref<16x1xf32, #tpu.memory_space<vmem>>, vector<16x1xf32>
    %309 = vector.broadcast %308 : vector<16x1xf32> to vector<16x100xf32>
    %310 = arith.addf %307, %309 : vector<16x100xf32>
    %cst_316 = arith.constant 0.000000e+00 : f32
    %311 = vector.broadcast %cst_316 : f32 to vector<16x100xf32>
    %312 = arith.maximumf %310, %311 : vector<16x100xf32>
    %cst_317 = arith.constant 0.000000e+00 : f32
    %313 = vector.broadcast %cst_317 : f32 to vector<1x100xf32>
    %314 = arith.cmpf ogt, %0, %313 : vector<1x100xf32>
    %cst_318 = arith.constant 0.000000e+00 : f32
    %315 = vector.shape_cast %314 : vector<1x100xi1> to vector<1x100xi1>
    %316 = vector.broadcast %315 : vector<1x100xi1> to vector<16x100xi1>
    %317 = vector.broadcast %cst_318 : f32 to vector<16x100xf32>
    %318 = arith.select %316, %312, %317 : vector<16x100xi1>, vector<16x100xf32>
    %cst_319 = arith.constant 0.000000e+00 : bf16
    %319 = vector.broadcast %cst_319 : bf16 to vector<16x128xbf16>
    %c0_320 = arith.constant 0 : index
    %c0_321 = arith.constant 0 : index
    %320 = vector.load %arg24[%c0_320, %c0_321] : memref<16x128xbf16, #tpu.memory_space<vmem>>, vector<16x128xbf16>
    tpu.vector_store %arg24[%c0_320, %c0_321], %319 {strides = array<i32>} : memref<16x128xbf16, #tpu.memory_space<vmem>>, vector<16x128xbf16>,
    %321 = arith.truncf %318 : vector<16x100xf32> to vector<16x100xbf16>
    %c0_322 = arith.constant 0 : index
    %c11_323 = arith.constant 11 : index
    %322 = vector.load %arg24[%c0_322, %c11_323] : memref<16x128xbf16, #tpu.memory_space<vmem>>, vector<16x100xbf16>
    tpu.vector_store %arg24[%c0_322, %c11_323], %321 {strides = array<i32>} : memref<16x128xbf16, #tpu.memory_space<vmem>>, vector<16x100xbf16>,
    %cst_324 = arith.constant 0.000000e+00 : f32
    %323 = vector.broadcast %cst_324 : f32 to vector<16x100xf32>
    %c0_325 = arith.constant 0 : index
    %c0_326 = arith.constant 0 : index
    %324 = vector.load %arg24[%c0_325, %c0_326] : memref<16x128xbf16, #tpu.memory_space<vmem>>, vector<16x100xbf16>
    %c0_327 = arith.constant 0 : index
    %c0_328 = arith.constant 0 : index
    %c0_329 = arith.constant 0 : index
    %325 = vector.load %arg14[%c0_327, %c0_328, %c0_329] : memref<9x16x16xbf16, #tpu.memory_space<vmem>>, vector<1x16x16xbf16>
    %326 = vector.shape_cast %325 : vector<1x16x16xbf16> to vector<16x16xbf16>
    %cst_330 = arith.constant dense<0.000000e+00> : vector<16x100xf32>
    %327 = tpu.matmul %326, %324, %cst_330 {dimension_numbers = #tpu.dot_dimension_numbers<[1], [0], [0], [1], [0, 0, 1, 1], [], []>} : vector<16x16xbf16>, vector<16x100xbf16>, vector<16x100xf32> -> vector<16x100xf32>
    %328 = arith.addf %323, %327 : vector<16x100xf32>
    %c0_331 = arith.constant 0 : index
    %c1_332 = arith.constant 1 : index
    %329 = vector.load %arg24[%c0_331, %c1_332] : memref<16x128xbf16, #tpu.memory_space<vmem>>, vector<16x100xbf16>
    %c1_333 = arith.constant 1 : index
    %c0_334 = arith.constant 0 : index
    %c0_335 = arith.constant 0 : index
    %330 = vector.load %arg14[%c1_333, %c0_334, %c0_335] : memref<9x16x16xbf16, #tpu.memory_space<vmem>>, vector<1x16x16xbf16>
    %331 = vector.shape_cast %330 : vector<1x16x16xbf16> to vector<16x16xbf16>
    %cst_336 = arith.constant dense<0.000000e+00> : vector<16x100xf32>
    %332 = tpu.matmul %331, %329, %cst_336 {dimension_numbers = #tpu.dot_dimension_numbers<[1], [0], [0], [1], [0, 0, 1, 1], [], []>} : vector<16x16xbf16>, vector<16x100xbf16>, vector<16x100xf32> -> vector<16x100xf32>
    %333 = arith.addf %328, %332 : vector<16x100xf32>
    %c0_337 = arith.constant 0 : index
    %c2_338 = arith.constant 2 : index
    %334 = vector.load %arg24[%c0_337, %c2_338] : memref<16x128xbf16, #tpu.memory_space<vmem>>, vector<16x100xbf16>
    %c2_339 = arith.constant 2 : index
    %c0_340 = arith.constant 0 : index
    %c0_341 = arith.constant 0 : index
    %335 = vector.load %arg14[%c2_339, %c0_340, %c0_341] : memref<9x16x16xbf16, #tpu.memory_space<vmem>>, vector<1x16x16xbf16>
    %336 = vector.shape_cast %335 : vector<1x16x16xbf16> to vector<16x16xbf16>
    %cst_342 = arith.constant dense<0.000000e+00> : vector<16x100xf32>
    %337 = tpu.matmul %336, %334, %cst_342 {dimension_numbers = #tpu.dot_dimension_numbers<[1], [0], [0], [1], [0, 0, 1, 1], [], []>} : vector<16x16xbf16>, vector<16x100xbf16>, vector<16x100xf32> -> vector<16x100xf32>
    %338 = arith.addf %333, %337 : vector<16x100xf32>
    %c0_343 = arith.constant 0 : index
    %c10_344 = arith.constant 10 : index
    %339 = vector.load %arg24[%c0_343, %c10_344] : memref<16x128xbf16, #tpu.memory_space<vmem>>, vector<16x100xbf16>
    %c3_345 = arith.constant 3 : index
    %c0_346 = arith.constant 0 : index
    %c0_347 = arith.constant 0 : index
    %340 = vector.load %arg14[%c3_345, %c0_346, %c0_347] : memref<9x16x16xbf16, #tpu.memory_space<vmem>>, vector<1x16x16xbf16>
    %341 = vector.shape_cast %340 : vector<1x16x16xbf16> to vector<16x16xbf16>
    %cst_348 = arith.constant dense<0.000000e+00> : vector<16x100xf32>
    %342 = tpu.matmul %341, %339, %cst_348 {dimension_numbers = #tpu.dot_dimension_numbers<[1], [0], [0], [1], [0, 0, 1, 1], [], []>} : vector<16x16xbf16>, vector<16x100xbf16>, vector<16x100xf32> -> vector<16x100xf32>
    %343 = arith.addf %338, %342 : vector<16x100xf32>
    %c0_349 = arith.constant 0 : index
    %c11_350 = arith.constant 11 : index
    %344 = vector.load %arg24[%c0_349, %c11_350] : memref<16x128xbf16, #tpu.memory_space<vmem>>, vector<16x100xbf16>
    %c4_351 = arith.constant 4 : index
    %c0_352 = arith.constant 0 : index
    %c0_353 = arith.constant 0 : index
    %345 = vector.load %arg14[%c4_351, %c0_352, %c0_353] : memref<9x16x16xbf16, #tpu.memory_space<vmem>>, vector<1x16x16xbf16>
    %346 = vector.shape_cast %345 : vector<1x16x16xbf16> to vector<16x16xbf16>
    %cst_354 = arith.constant dense<0.000000e+00> : vector<16x100xf32>
    %347 = tpu.matmul %346, %344, %cst_354 {dimension_numbers = #tpu.dot_dimension_numbers<[1], [0], [0], [1], [0, 0, 1, 1], [], []>} : vector<16x16xbf16>, vector<16x100xbf16>, vector<16x100xf32> -> vector<16x100xf32>
    %348 = arith.addf %343, %347 : vector<16x100xf32>
    %c0_355 = arith.constant 0 : index
    %c12_356 = arith.constant 12 : index
    %349 = vector.load %arg24[%c0_355, %c12_356] : memref<16x128xbf16, #tpu.memory_space<vmem>>, vector<16x100xbf16>
    %c5_357 = arith.constant 5 : index
    %c0_358 = arith.constant 0 : index
    %c0_359 = arith.constant 0 : index
    %350 = vector.load %arg14[%c5_357, %c0_358, %c0_359] : memref<9x16x16xbf16, #tpu.memory_space<vmem>>, vector<1x16x16xbf16>
    %351 = vector.shape_cast %350 : vector<1x16x16xbf16> to vector<16x16xbf16>
    %cst_360 = arith.constant dense<0.000000e+00> : vector<16x100xf32>
    %352 = tpu.matmul %351, %349, %cst_360 {dimension_numbers = #tpu.dot_dimension_numbers<[1], [0], [0], [1], [0, 0, 1, 1], [], []>} : vector<16x16xbf16>, vector<16x100xbf16>, vector<16x100xf32> -> vector<16x100xf32>
    %353 = arith.addf %348, %352 : vector<16x100xf32>
    %c0_361 = arith.constant 0 : index
    %c20_362 = arith.constant 20 : index
    %354 = vector.load %arg24[%c0_361, %c20_362] : memref<16x128xbf16, #tpu.memory_space<vmem>>, vector<16x100xbf16>
    %c6_363 = arith.constant 6 : index
    %c0_364 = arith.constant 0 : index
    %c0_365 = arith.constant 0 : index
    %355 = vector.load %arg14[%c6_363, %c0_364, %c0_365] : memref<9x16x16xbf16, #tpu.memory_space<vmem>>, vector<1x16x16xbf16>
    %356 = vector.shape_cast %355 : vector<1x16x16xbf16> to vector<16x16xbf16>
    %cst_366 = arith.constant dense<0.000000e+00> : vector<16x100xf32>
    %357 = tpu.matmul %356, %354, %cst_366 {dimension_numbers = #tpu.dot_dimension_numbers<[1], [0], [0], [1], [0, 0, 1, 1], [], []>} : vector<16x16xbf16>, vector<16x100xbf16>, vector<16x100xf32> -> vector<16x100xf32>
    %358 = arith.addf %353, %357 : vector<16x100xf32>
    %c0_367 = arith.constant 0 : index
    %c21_368 = arith.constant 21 : index
    %359 = vector.load %arg24[%c0_367, %c21_368] : memref<16x128xbf16, #tpu.memory_space<vmem>>, vector<16x100xbf16>
    %c7_369 = arith.constant 7 : index
    %c0_370 = arith.constant 0 : index
    %c0_371 = arith.constant 0 : index
    %360 = vector.load %arg14[%c7_369, %c0_370, %c0_371] : memref<9x16x16xbf16, #tpu.memory_space<vmem>>, vector<1x16x16xbf16>
    %361 = vector.shape_cast %360 : vector<1x16x16xbf16> to vector<16x16xbf16>
    %cst_372 = arith.constant dense<0.000000e+00> : vector<16x100xf32>
    %362 = tpu.matmul %361, %359, %cst_372 {dimension_numbers = #tpu.dot_dimension_numbers<[1], [0], [0], [1], [0, 0, 1, 1], [], []>} : vector<16x16xbf16>, vector<16x100xbf16>, vector<16x100xf32> -> vector<16x100xf32>
    %363 = arith.addf %358, %362 : vector<16x100xf32>
    %c0_373 = arith.constant 0 : index
    %c22_374 = arith.constant 22 : index
    %364 = vector.load %arg24[%c0_373, %c22_374] : memref<16x128xbf16, #tpu.memory_space<vmem>>, vector<16x100xbf16>
    %c8_375 = arith.constant 8 : index
    %c0_376 = arith.constant 0 : index
    %c0_377 = arith.constant 0 : index
    %365 = vector.load %arg14[%c8_375, %c0_376, %c0_377] : memref<9x16x16xbf16, #tpu.memory_space<vmem>>, vector<1x16x16xbf16>
    %366 = vector.shape_cast %365 : vector<1x16x16xbf16> to vector<16x16xbf16>
    %cst_378 = arith.constant dense<0.000000e+00> : vector<16x100xf32>
    %367 = tpu.matmul %366, %364, %cst_378 {dimension_numbers = #tpu.dot_dimension_numbers<[1], [0], [0], [1], [0, 0, 1, 1], [], []>} : vector<16x16xbf16>, vector<16x100xbf16>, vector<16x100xf32> -> vector<16x100xf32>
    %368 = arith.addf %363, %367 : vector<16x100xf32>
    %c0_379 = arith.constant 0 : index
    %c0_380 = arith.constant 0 : index
    %369 = vector.load %arg15[%c0_379, %c0_380] : memref<16x1xf32, #tpu.memory_space<vmem>>, vector<16x1xf32>
    %370 = vector.broadcast %369 : vector<16x1xf32> to vector<16x100xf32>
    %371 = arith.addf %368, %370 : vector<16x100xf32>
    %372 = arith.addf %371, %257 : vector<16x100xf32>
    %cst_381 = arith.constant 0.000000e+00 : f32
    %373 = vector.broadcast %cst_381 : f32 to vector<16x100xf32>
    %374 = arith.maximumf %372, %373 : vector<16x100xf32>
    %cst_382 = arith.constant 0.000000e+00 : f32
    %375 = vector.broadcast %cst_382 : f32 to vector<1x100xf32>
    %376 = arith.cmpf ogt, %0, %375 : vector<1x100xf32>
    %cst_383 = arith.constant 0.000000e+00 : f32
    %377 = vector.shape_cast %376 : vector<1x100xi1> to vector<1x100xi1>
    %378 = vector.broadcast %377 : vector<1x100xi1> to vector<16x100xi1>
    %379 = vector.broadcast %cst_383 : f32 to vector<16x100xf32>
    %380 = arith.select %378, %374, %379 : vector<16x100xi1>, vector<16x100xf32>
    %c0_384 = arith.constant 0 : index
    %c0_385 = arith.constant 0 : index
    %381 = vector.load %arg16[%c0_384, %c0_385] : memref<10x16xbf16, #tpu.memory_space<vmem>>, vector<10x16xbf16>
    %382 = arith.truncf %380 : vector<16x100xf32> to vector<16x100xbf16>
    %cst_386 = arith.constant dense<0.000000e+00> : vector<10x100xf32>
    %383 = tpu.matmul %381, %382, %cst_386 {dimension_numbers = #tpu.dot_dimension_numbers<[1], [0], [0], [1], [0, 0, 1, 1], [], []>} : vector<10x16xbf16>, vector<16x100xbf16>, vector<10x100xf32> -> vector<10x100xf32>
    %cst_387 = arith.constant dense<0.000000e+00> : vector<10xf32>
    %384 = vector.multi_reduction <add>, %383, %cst_387 [1] : vector<10x100xf32> to vector<10xf32>
    %385 = vector.shape_cast %384 : vector<10xf32> to vector<10x1xf32>
    %cst_388 = arith.constant 1.562500e-02 : f32
    %386 = vector.broadcast %cst_388 : f32 to vector<10x1xf32>
    %387 = arith.mulf %385, %386 : vector<10x1xf32>
    %c0_389 = arith.constant 0 : index
    %c0_390 = arith.constant 0 : index
    %388 = vector.load %arg17[%c0_389, %c0_390] : memref<10x1xf32, #tpu.memory_space<vmem>>, vector<10x1xf32>
    %389 = arith.addf %387, %388 : vector<10x1xf32>
    %c0_391 = arith.constant 0 : index
    %c0_392 = arith.constant 0 : index
    %c0_393 = arith.constant 0 : index
    %390 = vector.load %arg18[%c0_391, %c0_392, %c0_393] : memref<1x10x1xf32, #tpu.memory_space<vmem>>, vector<1x10x1xf32>
    %391 = vector.shape_cast %390 : vector<1x10x1xf32> to vector<10x1xf32>
    %392 = vector.shape_cast %389 : vector<10x1xf32> to vector<1x10x1xf32>
    tpu.vector_store %arg18[%c0_391, %c0_392, %c0_393], %392 {strides = array<i32>} : memref<1x10x1xf32, #tpu.memory_space<vmem>>, vector<1x10x1xf32>,
    return
  }
  func.func @transform_0(%arg0: i32) -> (i32, i32, i32) {
    %c0_i32 = arith.constant 0 : i32
    %c0_i32_0 = arith.constant 0 : i32
    %c0_i32_1 = arith.constant 0 : i32
    return %arg0, %c0_i32, %c0_i32_0 : i32, i32, i32
  }
  func.func @transform_1(%arg0: i32) -> (i32, i32, i32) {
    %c0_i32 = arith.constant 0 : i32
    %c0_i32_0 = arith.constant 0 : i32
    %c0_i32_1 = arith.constant 0 : i32
    %c0_i32_2 = arith.constant 0 : i32
    return %c0_i32, %c0_i32_0, %c0_i32_1 : i32, i32, i32
  }
  func.func @transform_2(%arg0: i32) -> (i32, i32) {
    %c0_i32 = arith.constant 0 : i32
    %c0_i32_0 = arith.constant 0 : i32
    %c0_i32_1 = arith.constant 0 : i32
    return %c0_i32, %c0_i32_0 : i32, i32
  }
  func.func @transform_3(%arg0: i32) -> (i32, i32) {
    %c0_i32 = arith.constant 0 : i32
    %c0_i32_0 = arith.constant 0 : i32
    %c0_i32_1 = arith.constant 0 : i32
    return %c0_i32, %c0_i32_0 : i32, i32
  }
  func.func @transform_4(%arg0: i32) -> (i32, i32, i32) {
    %c0_i32 = arith.constant 0 : i32
    %c0_i32_0 = arith.constant 0 : i32
    %c0_i32_1 = arith.constant 0 : i32
    %c0_i32_2 = arith.constant 0 : i32
    return %c0_i32, %c0_i32_0, %c0_i32_1 : i32, i32, i32
  }
  func.func @transform_5(%arg0: i32) -> (i32, i32) {
    %c0_i32 = arith.constant 0 : i32
    %c0_i32_0 = arith.constant 0 : i32
    %c0_i32_1 = arith.constant 0 : i32
    return %c0_i32, %c0_i32_0 : i32, i32
  }
  func.func @transform_6(%arg0: i32) -> (i32, i32, i32) {
    %c0_i32 = arith.constant 0 : i32
    %c0_i32_0 = arith.constant 0 : i32
    %c0_i32_1 = arith.constant 0 : i32
    %c0_i32_2 = arith.constant 0 : i32
    return %c0_i32, %c0_i32_0, %c0_i32_1 : i32, i32, i32
  }
  func.func @transform_7(%arg0: i32) -> (i32, i32) {
    %c0_i32 = arith.constant 0 : i32
    %c0_i32_0 = arith.constant 0 : i32
    %c0_i32_1 = arith.constant 0 : i32
    return %c0_i32, %c0_i32_0 : i32, i32
  }
  func.func @transform_8(%arg0: i32) -> (i32, i32) {
    %c0_i32 = arith.constant 0 : i32
    %c0_i32_0 = arith.constant 0 : i32
    %c0_i32_1 = arith.constant 0 : i32
    return %c0_i32, %c0_i32_0 : i32, i32
  }
  func.func @transform_9(%arg0: i32) -> (i32, i32, i32) {
    %c0_i32 = arith.constant 0 : i32
    %c0_i32_0 = arith.constant 0 : i32
    %c0_i32_1 = arith.constant 0 : i32
    %c0_i32_2 = arith.constant 0 : i32
    return %c0_i32, %c0_i32_0, %c0_i32_1 : i32, i32, i32
  }
  func.func @transform_10(%arg0: i32) -> (i32, i32) {
    %c0_i32 = arith.constant 0 : i32
    %c0_i32_0 = arith.constant 0 : i32
    %c0_i32_1 = arith.constant 0 : i32
    return %c0_i32, %c0_i32_0 : i32, i32
  }
  func.func @transform_11(%arg0: i32) -> (i32, i32, i32) {
    %c0_i32 = arith.constant 0 : i32
    %c0_i32_0 = arith.constant 0 : i32
    %c0_i32_1 = arith.constant 0 : i32
    %c0_i32_2 = arith.constant 0 : i32
    return %c0_i32, %c0_i32_0, %c0_i32_1 : i32, i32, i32
  }
  func.func @transform_12(%arg0: i32) -> (i32, i32) {
    %c0_i32 = arith.constant 0 : i32
    %c0_i32_0 = arith.constant 0 : i32
    %c0_i32_1 = arith.constant 0 : i32
    return %c0_i32, %c0_i32_0 : i32, i32
  }
  func.func @transform_13(%arg0: i32) -> (i32, i32, i32) {
    %c0_i32 = arith.constant 0 : i32
    %c0_i32_0 = arith.constant 0 : i32
    %c0_i32_1 = arith.constant 0 : i32
    %c0_i32_2 = arith.constant 0 : i32
    return %c0_i32, %c0_i32_0, %c0_i32_1 : i32, i32, i32
  }
  func.func @transform_14(%arg0: i32) -> (i32, i32) {
    %c0_i32 = arith.constant 0 : i32
    %c0_i32_0 = arith.constant 0 : i32
    %c0_i32_1 = arith.constant 0 : i32
    return %c0_i32, %c0_i32_0 : i32, i32
  }
  func.func @transform_15(%arg0: i32) -> (i32, i32) {
    %c0_i32 = arith.constant 0 : i32
    %c0_i32_0 = arith.constant 0 : i32
    %c0_i32_1 = arith.constant 0 : i32
    return %c0_i32, %c0_i32_0 : i32, i32
  }
  func.func @transform_16(%arg0: i32) -> (i32, i32) {
    %c0_i32 = arith.constant 0 : i32
    %c0_i32_0 = arith.constant 0 : i32
    %c0_i32_1 = arith.constant 0 : i32
    return %c0_i32, %c0_i32_0 : i32, i32
  }
  func.func @transform_17(%arg0: i32) -> (i32, i32, i32) {
    %c0_i32 = arith.constant 0 : i32
    %c0_i32_0 = arith.constant 0 : i32
    %c0_i32_1 = arith.constant 0 : i32
    return %arg0, %c0_i32, %c0_i32_0 : i32, i32, i32
  }
}

</mosaic_0001>

<bundles_post_ra>
// kernel: resnet_resizer_forward.1
= control target key start
LH: loop header
LB: loop body
LE: loop exit
PB: predicated region body
PF: predicated region fallthrough
CT: control target
= control target key end

     0   :  { %s6245_s24 = smov 0   ;;  %s7056_s0 = inlined_call_operand.vmem [shape: bf16[2,4,384], index: 0, kind: input, shape index: {}]   ;;  %s7057_s1 = inlined_call_operand.vmem [shape: bf16[9,16,4], index: 1, kind: input, shape index: {}]   ;;  %s7058_s2 = inlined_call_operand.vmem [shape: f32[16,1], index: 2, kind: input, shape index: {}]   ;;  %s7059_s3 = inlined_call_operand.vmem [shape: bf16[324,128], index: 3, kind: input, shape index: {}]   ;;  %s7060_s4 = inlined_call_operand.vmem [shape: bf16[9,16,16], index: 4, kind: input, shape index: {}]   ;;  %s7061_s5 = inlined_call_operand.vmem [shape: f32[16,1], index: 5, kind: input, shape index: {}]   ;;  %s7062_s6 = inlined_call_operand.vmem [shape: bf16[9,4,16], index: 6, kind: input, shape index: {}]   ;;  %s7063_s7 = inlined_call_operand.vmem [shape: f32[4,1], index: 7, kind: input, shape index: {}]   ;;  %s7064_s8 = inlined_call_operand.vmem [shape: f32[1,128], index: 8, kind: input, shape index: {}]   ;;  %s7065_s9 = inlined_call_operand.vmem [shape: bf16[9,16,4], index: 9, kind: input, shape index: {}]   ;;  %s7066_s10 = inlined_call_operand.vmem [shape: f32[16,1], index: 10, kind: input, shape index: {}]   ;;  %s7067_s11 = inlined_call_operand.vmem [shape: bf16[9,16,16], index: 11, kind: input, shape index: {}]   ;;  %s7068_s12 = inlined_call_operand.vmem [shape: f32[16,1], index: 12, kind: input, shape index: {}]   ;;  %s7069_s13 = inlined_call_operand.vmem [shape: bf16[9,16,16], index: 13, kind: input, shape index: {}]   ;;  %s7070_s14 = inlined_call_operand.vmem [shape: f32[16,1], index: 14, kind: input, shape index: {}]   ;;  %s7071_s15 = inlined_call_operand.vmem [shape: bf16[10,16], index: 15, kind: input, shape index: {}]   ;;  %s7072_s16 = inlined_call_operand.vmem [shape: f32[10,1], index: 16, kind: input, shape index: {}]   ;;  %s7073_s17 = inlined_call_operand.vmem [shape: f32[2,10,1], index: 17, kind: output, shape index: {}]  }
   0x1   :  { %7091 = sst [smem:[#allocation8_spill]] %s7056_s0 }
   0x2   :  { %7092 = sst [smem:[#allocation9_spill]] %s7057_s1 }
   0x3   :  { %7093 = sst [smem:[#allocation10_spill]] %s7058_s2 }
   0x4   :  { %7094 = sst [smem:[#allocation11_spill]] %s7059_s3 }
   0x5   :  { %7095 = sst [smem:[#allocation12_spill]] %s7060_s4 }
   0x6 LB: > { %s5162_s25 = sadd.s32 4294967295, %s6135_s24   ;;  %p5166_p0 = scmp.ge.s32.totalorder %s6135_s24, 1  ;;  %s6135_s24 = sphi %s6245_s24, %s27_s24  }
   0x7   : > { %p487_p1 = scmp.lt.s32.totalorder %s6135_s24, 3 }
   0x9   : > { %p488_p2 = pnand %p5166_p0, %p487_p1 }
   0xa   : > { %p539_p3 = scmp.lt.s32.totalorder (!%p488_p2), %s5162_s25, 1  ;;  %v567_v0 = vlaneseq (!%p488_p2)  ;;  %v6137_v1 = vmov (!%p488_p2), 1983009808   ;;  %v6138_v3 = vmov (!%p488_p2), 0.0   ;;  %vm6139_vm0 = vmmov (!%p488_p2), 0   ;;  %s7096_s29 = sld [smem:[#allocation8_spill]] (!%p488_p2) }
   0xb   : > { %491 = sbr.rel (%p488_p2) target bundleno = 3658 (0xe4a), region = 88  ;;  %v565_v2 = vunpack.c.l.s4 (!%p488_p2), %v6137_v1  ;;  %5597 = vmatprep.subr.bf16.mxu1 (!%p488_p2), %v6138_v3  ;;  %5599 = vmatprep.mubr.msk.bf16.mxu1 (!%p488_p2), %vm6139_vm0, %v6138_v3  ;;  %v6140_v6 = vmov (!%p488_p2), 0   ;;  %s7077_s30 = smov (!%p488_p2), 127   ;;  %vm592_vm1 = vcmask (!%p488_p2), 1041408   ;;  %vm585_vm2 = vcmask (!%p488_p2), 1039360  }
   0xc   : > { %v6256_v4 = vshrl.u32 (!%p488_p2), %v567_v0, 7  ;;  %634 = vmatprep.mubr.bf16.mxu0 (!%p488_p2), %v6140_v6  ;;  %2865 = vst [vmem:[#allocation3] sm:$0xff] (!%p488_p2), %v6140_v6  ;;  %3325 = vst [vmem:[#allocation4] sm:$0x3] (!%p488_p2), %v6140_v6  ;;  %6014 = vset.pattern.permute.xlu0 (!%p488_p2), %v6140_v6  ;;  %s7079_s18 = smov (!%p488_p2), 126   ;;  %s6143_s19 = smov (!%p488_p2), 110  }
   0xd   : > { %v566_v5 = vunpack.c.0.s8 (!%p488_p2), %v565_v2  ;;  %3951 = vst [vmem:[#allocation6] sm:$0xff] (!%p488_p2), %v6140_v6  ;;  %4487 = vst [vmem:[#allocation7] sm:$0xff] (!%p488_p2), %v6140_v6  ;;  %6015 = vset.pattern.permute.xlu1 (!%p488_p2), %v6140_v6  ;;  %s6144_s1 = smov (!%p488_p2), 109   ;;  %s7075_s20 = smov (!%p488_p2), 108   ;;  %vm588_vm3 = vcmask (!%p488_p2), 31744   ;;  %vm819_vm4 = vcmask (!%p488_p2), 1031168  }
   0xe   : > { %s6146_s21 = smov (!%p488_p2), 92   ;;  %s6147_s22 = smov (!%p488_p2), 91   ;;  %vm956_vm5 = vcmask (!%p488_p2), 900096   ;;  %vm1093_vm6 = vcmask (!%p488_p2), 891904   ;;  %vm1230_vm7 = vcmask (!%p488_p2), 883712   ;;  %vm1367_vm8 = vcmask (!%p488_p2), 752640  }
   0xf   : > { %v6268_v7 = vsub.s32 (!%p488_p2), %v566_v5, %v6256_v4  ;;  %s6148_s23 = smov (!%p488_p2), 90   ;;  %s7097_s2 = sld [smem:[#allocation10_spill]] (!%p488_p2)  ;;  %vm1504_vm9 = vcmask (!%p488_p2), 744448   ;;  %vm1641_vm10 = vcmask (!%p488_p2), 736256   ;;  %vm1949_vm13 = vcmask (!%p488_p2), 556032  }
  0x10   : > { %s7099_s3 = sld [smem:[#allocation11_spill]] (!%p488_p2)  ;;  %s7101_s28 = smov (!%p488_p2), 127  }
  0x11   : > { %s7102_s4 = sld [smem:[#allocation12_spill]] (!%p488_p2)  ;;  %s7104_s27 = smov (!%p488_p2), 116  }
  0x12   : > { %s7110_s25 = smov (!%p539_p3, %s5162_s25), 1 }
  0x13   : > { %s5987_s26 = smul.u32 6, %s7110_s25 }
  0x15   : > { %s6274_s0 = scalar_lea.vmem %s7096_s29, %s5987_s26  ;;  %v1746_v48 = vld [vmem:[%s7097_s2] sm:$0xff]  ;;  %v1747_v49 = vld [vmem:[%s7097_s2 + $0x8] sm:$0xff]  ;;  %s7107_s2 = smov 11  }
  0x16   : > { %v551_v8 = vld [vmem:[%s6274_s0] sm:$0x3f]  ;;  %s7108_s26 = smov 117  }
  0x17   : > { %v6278_v9 = vrot.slane %v551_v8, %v6268_v7  ;;  %v563_v10 = vcombine.high %v551_v8, %v551_v8  ;;  %v787_v11 = vld [vmem:[%s6274_s0] sm:$0x3f] }
  0x18   : > { %v804_v14 = vrot.slane %v787_v11, %v6268_v7  ;;  %v797_v15 = vcombine.high %v787_v11, %v787_v11  ;;  %v924_v16 = vld [vmem:[%s6274_s0] sm:$0x3f] }
  0x19   : > { %579 = vrot.lane.b32.xlu0 %v6278_v9, %s7077_s30  ;;  %v6284_v12 = vrot.slane %v563_v10, %v6268_v7  ;;  %v6288_v13 = vcombine.high %v6278_v9, %v6278_v9  ;;  %v941_v19 = vrot.slane %v924_v16, %v6268_v7  ;;  %v934_v20 = vcombine.high %v924_v16, %v924_v16  ;;  %v1061_v22 = vld [vmem:[%s6274_s0] sm:$0x3f] }
  0x1a   : > { %v812_v17 = vcombine.high %v804_v14, %v804_v14  ;;  %v811_v18 = vrot.slane %v797_v15, %v6268_v7  ;;  %v1078_v24 = vrot.slane %v1061_v22, %v6268_v7  ;;  %v1071_v25 = vcombine.high %v1061_v22, %v1061_v22  ;;  %v1198_v27 = vld [vmem:[%s6274_s0] sm:$0x3f] }
  0x1b   : > { %583 = vrot.lane.b32.xlu1 %v6284_v12, %s7077_s30  ;;  %v949_v21 = vcombine.high %v941_v19, %v941_v19  ;;  %v948_v23 = vrot.slane %v934_v20, %v6268_v7  ;;  %v1215_v29 = vrot.slane %v1198_v27, %v6268_v7  ;;  %v1208_v30 = vcombine.high %v1198_v27, %v1198_v27  ;;  %v1335_v31 = vld [vmem:[%s6274_s0] sm:$0x3f] }
  0x1c   : > { %v1086_v26 = vcombine.high %v1078_v24, %v1078_v24  ;;  %v1085_v28 = vrot.slane %v1071_v25, %v6268_v7  ;;  %v1352_v34 = vrot.slane %v1335_v31, %v6268_v7  ;;  %v1345_v35 = vcombine.high %v1335_v31, %v1335_v31  ;;  %v1472_v36 = vld [vmem:[%s6274_s0] sm:$0x3f] }
  0x1d   : > { %581 = vrot.lane.b32.xlu0 %v6288_v13, %s7077_s30  ;;  %v1223_v32 = vcombine.high %v1215_v29, %v1215_v29  ;;  %v1222_v33 = vrot.slane %v1208_v30, %v6268_v7  ;;  %v1489_v39 = vrot.slane %v1472_v36, %v6268_v7  ;;  %v1482_v40 = vcombine.high %v1472_v36, %v1472_v36  ;;  %v1609_v42 = vld [vmem:[%s6274_s0] sm:$0x3f]  ;;  %s7100_s30 = smov 126  }
  0x1e   : > { %v1360_v37 = vcombine.high %v1352_v34, %v1352_v34  ;;  %v1359_v38 = vrot.slane %v1345_v35, %v6268_v7  ;;  %v1626_v44 = vrot.slane %v1609_v42, %v6268_v7  ;;  %v1619_v45 = vcombine.high %v1609_v42, %v1609_v42 }
  0x1f   : > { %813 = vrot.lane.b32.xlu1 %v804_v14, %s7079_s18  ;;  %v1497_v41 = vcombine.high %v1489_v39, %v1489_v39  ;;  %v1496_v43 = vrot.slane %v1482_v40, %v6268_v7  ;;  %v701_v57 = vsel %vm592_vm1, %v6284_v12, 0  ;;  %v695_v60 = vsel %vm592_vm1, %v6278_v9, 0 }
  0x20   : > { %v1634_v46 = vcombine.high %v1626_v44, %v1626_v44  ;;  %v1633_v47 = vrot.slane %v1619_v45, %v6268_v7 }
  0x21   : > { %815 = vrot.lane.b32.xlu0 %v812_v17, %s7079_s18 }
  0x23   : > { %817 = vrot.lane.b32.xlu1 %v811_v18, %s7079_s18  ;;  %s7106_s18 = smov 118  }
  0x25   : > { %950 = vrot.lane.b32.xlu0 %v941_v19, %s6143_s19 }
  0x27   : > { %952 = vrot.lane.b32.xlu1 %v949_v21, %s6143_s19 }
  0x29   : > { %954 = vrot.lane.b32.xlu0 %v948_v23, %s6143_s19  ;;  %s7087_s19 = smov 117  }
  0x2b   : > { %1087 = vrot.lane.b32.xlu1 %v1078_v24, %s6144_s1 }
  0x2d   : > { %1089 = vrot.lane.b32.xlu0 %v1086_v26, %s6144_s1 }
  0x2f   : > { %1091 = vrot.lane.b32.xlu1 %v1085_v28, %s6144_s1 }
  0x31   : > { %1224 = vrot.lane.b32.xlu0 %v1215_v29, %s7075_s20 }
  0x33   : > { %1226 = vrot.lane.b32.xlu1 %v1223_v32, %s7075_s20 }
  0x35   : > { %1228 = vrot.lane.b32.xlu0 %v1222_v33, %s7075_s20  ;;  %s7081_s20 = smov 106  }
  0x37   : > { %1361 = vrot.lane.b32.xlu1 %v1352_v34, %s6146_s21 }
  0x39   : > { %1363 = vrot.lane.b32.xlu0 %v1360_v37, %s6146_s21 }
  0x3b   : > { %1365 = vrot.lane.b32.xlu1 %v1359_v38, %s6146_s21  ;;  %s7085_s21 = smov 118  }
  0x3d   : > { %1498 = vrot.lane.b32.xlu0 %v1489_v39, %s6147_s22 }
  0x3f   : > { %1500 = vrot.lane.b32.xlu1 %v1497_v41, %s6147_s22 }
  0x41   : > { %1502 = vrot.lane.b32.xlu0 %v1496_v43, %s6147_s22  ;;  %s7098_s22 = sld [smem:[#allocation9_spill]] }
  0x43   : > { %1635 = vrot.lane.b32.xlu1 %v1626_v44, %s6148_s23 }
  0x45   : > { %1637 = vrot.lane.b32.xlu0 %v1634_v46, %s6148_s23 }
  0x47   : > { %1639 = vrot.lane.b32.xlu1 %v1633_v47, %s6148_s23  ;;  %v6039_v53 = vld [vmem:[%s7098_s22 + $0x8] sm:$0xff]   ;;  %v6040_v63 = vld [vmem:[%s7098_s22] sm:$0xff]   ;;  %v6041_v10 = vld [vmem:[%s7098_s22 + $0x10] sm:$0xff]   ;;  %s6153_s23 = smov 107  }
  0x48   : > { %v6042_v17 = vld [vmem:[%s7098_s22 + $0x18] sm:$0xff]   ;;  %v6043_v25 = vld [vmem:[%s7098_s22 + $0x20] sm:$0xff]   ;;  %v6044_v31 = vld [vmem:[%s7098_s22 + $0x28] sm:$0xff]  }
  0x49   : > { %1750 = vperm.xlu0 %6014, %v1746_v48   ;;  %v6045_v38 = vld [vmem:[%s7098_s22 + $0x30] sm:$0xff]   ;;  %v6046_v45 = vld [vmem:[%s7098_s22 + $0x38] sm:$0xff]   ;;  %v6047_v48 = vld [vmem:[%s7098_s22 + $0x40] sm:$0xff]  }
  0x4b   : > { %1755 = vperm.xlu1 %6015, %v1747_v49  }
  0x8b   : > { %v580_v50 = vpop.permute.xlu0 %579 }
  0x8d   : > { %v584_v51 = vpop.permute.xlu1 %583 }
  0x8e   : > { %v600_v52 = vsel %vm592_vm1, %v584_v51, 0 }
  0x8f   : > { %v582_v54 = vpop.permute.xlu0 %581  ;;  %5598 = vmatpush3.bf16.msra.mxu1 %v600_v52 }
  0x90   : > { %v587_v55 = vsel %vm585_vm2, %v582_v54, %v584_v51  ;;  %v586_v56 = vsel %vm585_vm2, %v580_v50, %v582_v54  ;;  %5603 = vmatprep.subr.bf16.mxu1 %v6138_v3 }
  0x91   : > { %5173 = vmatprep.subr.msk.bf16.mxu0 %vm592_vm1, %v587_v55  ;;  %v594_v58 = vsel %vm592_vm1, %v586_v56, 0  ;;  %v814_v59 = vpop.permute.xlu1 %813 }
  0x92   : > { %603 = vmatpush1.bf16.msra.mxu0 %v594_v58  ;;  %5600 = vmatmul.mubr.msk.bf16.vlgmr.msra.gmra.mrb[0].mxu1 %vm588_vm3, %v6039_v53  ;;  %v6049_v58 = vld [vmem:[%s7099_s3 + $0x88] sm:$0xff]  }
  0x93   : > { %5604 = vmatpush3.bf16.msra.mxu1 %v701_v57  ;;  %5177 = vmatprep.subr.msk.bf16.mxu0 %vm592_vm1, %v6288_v13  ;;  %v816_v61 = vpop.permute.xlu0 %815  ;;  %v6048_v57 = vld [vmem:[%s7099_s3 + $0x80] sm:$0xff]  }
  0x94   : > { %5605 = vmatprep.mubr.msk.bf16.mxu1 %vm6139_vm0, %v6138_v3  ;;  %5609 = vmatprep.subr.bf16.mxu1 %v6138_v3  ;;  %v820_v8 = vsel %vm819_vm4, %v814_v59, %v816_v61  ;;  %v6051_v59 = vld [vmem:[%s7099_s3 + $0x98] sm:$0xff]  }
  0x95   : > { %5174 = vmatmul.mubr.msk.bf16.vlgmr.msra.gmra.mrb[0].mxu0 %vm588_vm3, %v6039_v53  ;;  %v818_v62 = vpop.permute.xlu1 %817  ;;  %v826_v11 = vsel %vm592_vm1, %v820_v8, 0  ;;  %v6059_v8 = vld [vmem:[%s7099_s3 + $0x58] sm:$0xff]  }
  0x96   : > { %704 = vmatpush1.bf16.msra.mxu0 %v695_v60  ;;  %v821_v0 = vsel %vm819_vm4, %v816_v61, %v818_v62  ;;  %735 = vmatprep.mubr.bf16.mxu0 %v6140_v6  ;;  %v832_v2 = vsel %vm592_vm1, %v818_v62, 0  ;;  %v6052_v60 = vld [vmem:[%s7099_s3 + $0xa0] ss:$0 sps:$4 sm:$0x33]  }
  0x97   : > { %v951_v1 = vpop.permute.xlu0 %950  ;;  %5183 = vmatprep.subr.msk.bf16.mxu0 %vm592_vm1, %v821_v0  ;;  %v1954_v61 = vsel %vm592_vm1, %v6052_v60, 0  ;;  %v6053_v62 = vld [vmem:[%s7099_s3 + $0x40] sm:$0xff]   ;;  %v6055_v0 = vld [vmem:[%s7099_s3 + $0x48] sm:$0xff]  }
  0x99   : > { %v953_v5 = vpop.permute.xlu1 %952 }
  0x9a   : > { %5606 = vmatmul.mubr.msk.bf16.vlgmr.msra.gmra.mrb[4].mxu1 %vm588_vm3, %v6040_v63  ;;  %v957_v19 = vsel %vm956_vm5, %v951_v1, %v953_v5  ;;  %v6056_v1 = vld [vmem:[%s7099_s3 + $0x8] sm:$0xff]  }
  0x9b   : > { %5610 = vmatpush3.bf16.msra.mxu1 %v832_v2  ;;  %5611 = vmatprep.mubr.msk.bf16.mxu1 %vm6139_vm0, %v6138_v3  ;;  %v955_v9 = vpop.permute.xlu0 %954  ;;  %v963_v22 = vsel %vm592_vm1, %v957_v19, 0  ;;  %v6057_v2 = vld [vmem:[%s7099_s3 + $0x50] sm:$0xff]  }
  0x9c   : > { %5615 = vmatprep.subr.bf16.mxu1 %v6138_v3  ;;  %v969_v13 = vsel %vm592_vm1, %v955_v9, 0  ;;  %v958_v14 = vsel %vm956_vm5, %v953_v5, %v955_v9  ;;  %v6058_v5 = vld [vmem:[%s7099_s3 + $0x10] sm:$0xff]   ;;  %v6060_v9 = vld [vmem:[%s7099_s3 + $0x18] sm:$0xff]   ;;  %vm2335_vm5 = vcmask 130048  }
  0x9d   : > { %v1088_v12 = vpop.permute.xlu1 %1087 }
  0x9f   : > { %v1090_v15 = vpop.permute.xlu0 %1089 }
  0xa0   : > { %v1094_v29 = vsel %vm1093_vm6, %v1088_v12, %v1090_v15  ;;  %v6063_v12 = vld [vmem:[%s7099_s3 + $0x68] sm:$0xff]  }
  0xa1   : > { %5178 = vmatmul.mubr.msk.bf16.vlgmr.msra.gmra.mrb[0].mxu0 %vm588_vm3, %v6040_v63  ;;  %v1092_v16 = vpop.permute.xlu1 %1091  ;;  %v1100_v32 = vsel %vm592_vm1, %v1094_v29, 0  ;;  %v6054_v63 = vld [vmem:[%s7099_s3] sm:$0xff]  }
  0xa2   : > { %835 = vmatpush1.bf16.msra.mxu0 %v826_v11  ;;  %5612 = vmatmul.mubr.msk.bf16.vlgmr.msra.gmra.mrb[8].mxu1 %vm588_vm3, %v6041_v10  ;;  %v1106_v20 = vsel %vm592_vm1, %v1092_v16, 0  ;;  %v1095_v23 = vsel %vm1093_vm6, %v1090_v15, %v1092_v16  ;;  %v6062_v11 = vld [vmem:[%s7099_s3 + $0x20] sm:$0xff]   ;;  %v6066_v15 = vld [vmem:[%s7099_s3 + $0x30] sm:$0xff]   ;;  %v6067_v16 = vld [vmem:[%s7099_s3 + $0x78] sm:$0xff]  }
  0xa3   : > { %5616 = vmatpush3.bf16.msra.mxu1 %v969_v13  ;;  %5617 = vmatprep.mubr.msk.bf16.mxu1 %vm6139_vm0, %v6138_v3  ;;  %v1225_v18 = vpop.permute.xlu0 %1224  ;;  %v6064_v13 = vld [vmem:[%s7099_s3 + $0x28] sm:$0xff]  }
  0xa4   : > { %866 = vmatprep.mubr.bf16.mxu0 %v6140_v6  ;;  %5189 = vmatprep.subr.msk.bf16.mxu0 %vm592_vm1, %v958_v14  ;;  %v6065_v14 = vld [vmem:[%s7099_s3 + $0x70] sm:$0xff]  }
  0xa5   : > { %5621 = vmatprep.subr.bf16.mxu1 %v6138_v3  ;;  %v1227_v21 = vpop.permute.xlu1 %1226 }
  0xa6   : > { %v1231_v40 = vsel %vm1230_vm7, %v1225_v18, %v1227_v21  ;;  %v2040_v18 = vld [vmem:[%s6274_s0] sm:$0x3f]  ;;  %s7103_s0 = smov 108  }
  0xa7   : > { %v1229_v24 = vpop.permute.xlu0 %1228  ;;  %v1237_v42 = vsel %vm592_vm1, %v1231_v40, 0  ;;  %v2083_v19 = vcombine.high %v2040_v18, %v2040_v18 }
  0xa8   : > { %v1243_v27 = vsel %vm592_vm1, %v1229_v24, 0  ;;  %v1232_v35 = vsel %vm1230_vm7, %v1227_v21, %v1229_v24 }
  0xa9   : > { %v1362_v26 = vpop.permute.xlu1 %1361  ;;  %v2097_v21 = vrot.slane %v2083_v19, %v6268_v7 }
  0xaa   : > { %5618 = vmatmul.mubr.msk.bf16.vlgmr.msra.gmra.mrb[12].mxu1 %vm588_vm3, %v6042_v17 }
  0xab   : > { %5622 = vmatpush3.bf16.msra.mxu1 %v1106_v20  ;;  %5623 = vmatprep.mubr.msk.bf16.mxu1 %vm6139_vm0, %v6138_v3  ;;  %v1364_v28 = vpop.permute.xlu0 %1363  ;;  %v2090_v20 = vrot.slane %v2040_v18, %v6268_v7 }
  0xac   : > { %5627 = vmatprep.subr.bf16.mxu1 %v6138_v3  ;;  %v1368_v47 = vsel %vm1367_vm8, %v1362_v26, %v1364_v28  ;;  %2103 = vrot.lane.b32.xlu1 %v2097_v21, %s6144_s1 }
  0xad   : > { %5184 = vmatmul.mubr.msk.bf16.vlgmr.msra.gmra.mrb[0].mxu0 %vm588_vm3, %v6041_v10  ;;  %v1366_v30 = vpop.permute.xlu1 %1365  ;;  %v1374_v49 = vsel %vm592_vm1, %v1368_v47, 0  ;;  %v6061_v10 = vld [vmem:[%s7099_s3 + $0x60] sm:$0xff]  }
  0xae   : > { %972 = vmatpush1.bf16.msra.mxu0 %v963_v22  ;;  %1003 = vmatprep.mubr.bf16.mxu0 %v6140_v6  ;;  %v1380_v34 = vsel %vm592_vm1, %v1366_v30, 0  ;;  %v1369_v43 = vsel %vm1367_vm8, %v1364_v28, %v1366_v30  ;;  %v2098_v22 = vcombine.high %v2090_v20, %v2090_v20 }
  0xaf   : > { %5195 = vmatprep.subr.msk.bf16.mxu0 %vm592_vm1, %v1095_v23  ;;  %v1499_v33 = vpop.permute.xlu0 %1498 }
  0xb0   : > { %2101 = vrot.lane.b32.xlu0 %v2098_v22, %s6144_s1  ;;  %2099 = vrot.lane.b32.xlu1 %v2090_v20, %s6144_s1  ;;  %s7083_s1 = smov 116  }
  0xb1   : > { %v1501_v36 = vpop.permute.xlu1 %1500 }
  0xb2   : > { %5624 = vmatmul.mubr.msk.bf16.vlgmr.msra.gmra.mrb[16].mxu1 %vm588_vm3, %v6043_v25  ;;  %v1505_v51 = vsel %vm1504_vm9, %v1499_v33, %v1501_v36 }
  0xb3   : > { %5628 = vmatpush3.bf16.msra.mxu1 %v1243_v27  ;;  %5629 = vmatprep.mubr.msk.bf16.mxu1 %vm6139_vm0, %v6138_v3  ;;  %v1503_v37 = vpop.permute.xlu0 %1502  ;;  %v1511_v53 = vsel %vm592_vm1, %v1505_v51, 0 }
  0xb4   : > { %5633 = vmatprep.subr.bf16.mxu1 %v6138_v3  ;;  %v1517_v41 = vsel %vm592_vm1, %v1503_v37, 0  ;;  %v1506_v50 = vsel %vm1504_vm9, %v1501_v36, %v1503_v37 }
  0xb5   : > { %v1636_v39 = vpop.permute.xlu1 %1635 }
  0xb7   : > { %v1638_v52 = vpop.permute.xlu0 %1637 }
  0xb8   : > { %v1642_v55 = vsel %vm1641_vm10, %v1636_v39, %v1638_v52 }
  0xb9   : > { %5190 = vmatmul.mubr.msk.bf16.vlgmr.msra.gmra.mrb[0].mxu0 %vm588_vm3, %v6042_v17  ;;  %v1640_v44 = vpop.permute.xlu1 %1639  ;;  %v1648_v56 = vsel %vm592_vm1, %v1642_v55, 0  ;;  %v6068_v17 = vld [vmem:[%s7099_s3 + $0x38] sm:$0xff]  }
  0xba   : > { %1109 = vmatpush1.bf16.msra.mxu0 %v1100_v32  ;;  %5630 = vmatmul.mubr.msk.bf16.vlgmr.msra.gmra.mrb[20].mxu1 %vm588_vm3, %v6044_v31  ;;  %v1654_v46 = vsel %vm592_vm1, %v1640_v44, 0  ;;  %v1643_v54 = vsel %vm1641_vm10, %v1638_v52, %v1640_v44  ;;  %vm2867_vm10 = vcmask 908376  }
  0xbb   : > { %5634 = vmatpush3.bf16.msra.mxu1 %v1380_v34  ;;  %5635 = vmatprep.mubr.msk.bf16.mxu1 %vm6139_vm0, %v6138_v3 }
  0xbc   : > { %1140 = vmatprep.mubr.bf16.mxu0 %v6140_v6  ;;  %5201 = vmatprep.subr.msk.bf16.mxu0 %vm592_vm1, %v1232_v35 }
  0xbd   : > { %5639 = vmatprep.subr.bf16.mxu1 %v6138_v3 }
  0xc2   : > { %5636 = vmatmul.mubr.msk.bf16.vlgmr.msra.gmra.mrb[24].mxu1 %vm588_vm3, %v6045_v38 }
  0xc3   : > { %5640 = vmatpush3.bf16.msra.mxu1 %v1517_v41  ;;  %5641 = vmatprep.mubr.msk.bf16.mxu1 %vm6139_vm0, %v6138_v3 }
  0xc4   : > { %5645 = vmatprep.subr.bf16.mxu1 %v6138_v3 }
  0xc5   : > { %5196 = vmatmul.mubr.msk.bf16.vlgmr.msra.gmra.mrb[0].mxu0 %vm588_vm3, %v6043_v25 }
  0xc6   : > { %1246 = vmatpush1.bf16.msra.mxu0 %v1237_v42  ;;  %1277 = vmatprep.mubr.bf16.mxu0 %v6140_v6 }
  0xc7   : > { %5207 = vmatprep.subr.msk.bf16.mxu0 %vm592_vm1, %v1369_v43 }
  0xca   : > { %5642 = vmatmul.mubr.msk.bf16.vlgmr.msra.gmra.mrb[28].mxu1 %vm588_vm3, %v6046_v45 }
  0xcb   : > { %5646 = vmatpush3.bf16.msra.mxu1 %v1654_v46  ;;  %5647 = vmatprep.mubr.msk.bf16.mxu1 %vm6139_vm0, %v6138_v3 }
  0xcc   : > { %5651 = vmatprep.subr.bf16.mxu1 %v6138_v3 }
  0xd1   : > { %5202 = vmatmul.mubr.msk.bf16.vlgmr.msra.gmra.mrb[0].mxu0 %vm588_vm3, %v6044_v31 }
  0xd2   : > { %1383 = vmatpush1.bf16.msra.mxu0 %v1374_v49  ;;  %5648 = vmatmul.mubr.msk.bf16.vlgmr.msra.gmra.mrb[32].mxu1 %vm588_vm3, %v6047_v48 }
  0xd3   : > { %1414 = vmatprep.mubr.bf16.mxu0 %v6140_v6  ;;  %5213 = vmatprep.subr.msk.bf16.mxu0 %vm592_vm1, %v1506_v50 }
  0xd4   : > { %5661 = vmatprep.mubr.msk.bf16.mxu1 %vm6139_vm0, %v6138_v3  ;;  %5652 = vmatpush3.bf16.msra.mxu1 %v6048_v57 }
  0xd5   : > { %5653 = vmatprep.subr.bf16.mxu1 %v6138_v3 }
  0xd8   : > { %5654 = vmatpush3.bf16.msra.mxu1 %v6049_v58 }
  0xd9   : > { %5655 = vmatprep.subr.bf16.mxu1 %v6138_v3 }
  0xdd   : > { %5208 = vmatmul.mubr.msk.bf16.vlgmr.msra.gmra.mrb[0].mxu0 %vm588_vm3, %v6045_v38 }
  0xde   : > { %1520 = vmatpush1.bf16.msra.mxu0 %v1511_v53  ;;  %1551 = vmatprep.mubr.bf16.mxu0 %v6140_v6 }
  0xdf   : > { %5219 = vmatprep.subr.msk.bf16.mxu0 %vm592_vm1, %v1643_v54 }
  0xe9   : > { %5214 = vmatmul.mubr.msk.bf16.vlgmr.msra.gmra.mrb[0].mxu0 %vm588_vm3, %v6046_v45 }
  0xea   : > { %1657 = vmatpush1.bf16.msra.mxu0 %v1648_v56  ;;  %1688 = vmatprep.mubr.bf16.mxu0 %v6140_v6  ;;  %v6050_v6 = vld [vmem:[%s7099_s3 + $0x90] sm:$0xff]  }
  0xeb   : > { %5656 = vmatpush3.bf16.msra.mxu1 %v6050_v6  ;;  %5449 = vmatprep.subr.bf16.mxu0 %v6053_v62 }
  0xec   : > { %5657 = vmatprep.subr.bf16.mxu1 %v6138_v3 }
  0xef   : > { %5658 = vmatpush3.bf16.msra.mxu1 %v6051_v59 }
  0xf0   : > { %5659 = vmatprep.subr.bf16.mxu1 %v6138_v3 }
  0xf3   : > { %5660 = vmatpush3.bf16.msra.mxu1 %v1954_v61 }
  0xf5   : > { %5220 = vmatmul.mubr.msk.bf16.vlgmr.msra.gmra.mrb[0].mxu0 %vm588_vm3, %v6047_v48 }
  0xf6   : > { %5450 = vmatpush3.bf16.msra.mxu0 %v6054_v63 }
  0xf7   : > { %5451 = vmatprep.subr.bf16.mxu0 %v6055_v0 }
  0xfa   : > { %5452 = vmatpush3.bf16.msra.mxu0 %v6056_v1 }
  0xfb   : > { %5453 = vmatprep.subr.bf16.mxu0 %v6057_v2 }
  0xfe   : > { %5454 = vmatpush3.bf16.msra.mxu0 %v6058_v5 }
  0xff   : > { %5455 = vmatprep.subr.bf16.mxu0 %v6059_v8 }
 0x102   : > { %5456 = vmatpush3.bf16.msra.mxu0 %v6060_v9  ;;  %v1751_v9 = vpop.permute.xlu0 %1750 }
 0x103   : > { %5457 = vmatprep.subr.bf16.mxu0 %v6061_v10 }
 0x106   : > { %5458 = vmatpush3.bf16.msra.mxu0 %v6062_v11 }
 0x107   : > { %5459 = vmatprep.subr.bf16.mxu0 %v6063_v12 }
 0x10a   : > { %5460 = vmatpush3.bf16.msra.mxu0 %v6064_v13  ;;  %v1756_v13 = vpop.permute.xlu1 %1755 }
 0x10b   : > { %5461 = vmatprep.subr.bf16.mxu0 %v6065_v14 }
 0x10e   : > { %5462 = vmatpush3.bf16.msra.mxu0 %v6066_v15 }
 0x10f   : > { %5463 = vmatprep.subr.bf16.mxu0 %v6067_v16 }
 0x112   : > { %5464 = vmatpush3.bf16.msra.mxu0 %v6068_v17 }
 0x113   : > { %5665 = vmatprep.subr.bf16.mxu0 %v6138_v3 }
 0x165   : > { %v679_v23 = vpop.f32.mrb[0].mxu1 }
 0x166   : > { %v5601_v24 = vpop.f32.mrb[1].mxu1 }
 0x167   : > { %v682_v25 = vpop.f32.mrb[2].mxu1 }
 0x168   : > { %v5602_v26 = vpop.f32.mrb[3].mxu1 }
 0x16d   : > { %v780_v27 = vpop.f32.mrb[4].mxu1 }
 0x16e   : > { %v781_v28 = vadd.f32 %v780_v27, %v679_v23  ;;  %v5607_v29 = vpop.f32.mrb[5].mxu1 }
 0x16f   : > { %v783_v30 = vpop.f32.mrb[6].mxu1 }
 0x170   : > { %v784_v31 = vadd.f32 %v783_v30, %v682_v25  ;;  %v5608_v32 = vpop.f32.mrb[7].mxu1 }
 0x175   : > { %v911_v33 = vpop.f32.mrb[8].mxu1 }
 0x176   : > { %v920_v34 = vadd.f32 %v911_v33, %v781_v28  ;;  %v5613_v35 = vpop.f32.mrb[9].mxu1 }
 0x177   : > { %v914_v36 = vpop.f32.mrb[10].mxu1 }
 0x178   : > { %v923_v37 = vadd.f32 %v914_v36, %v784_v31  ;;  %v5614_v38 = vpop.f32.mrb[11].mxu1 }
 0x17d   : > { %v1048_v39 = vpop.f32.mrb[12].mxu1 }
 0x17e   : > { %v1057_v40 = vadd.f32 %v1048_v39, %v920_v34  ;;  %v5619_v41 = vpop.f32.mrb[13].mxu1 }
 0x17f   : > { %v1051_v42 = vpop.f32.mrb[14].mxu1  ;;  %v6070_v41 = vld [vmem:[%s7099_s3 + $0x40] sm:$0xff]  }
 0x180   : > { %v1060_v43 = vadd.f32 %v1051_v42, %v923_v37  ;;  %v5620_v44 = vpop.f32.mrb[15].mxu1  ;;  %v6071_v42 = vld [vmem:[%s7099_s3] sm:$0xff]   ;;  %5477 = vmatprep.subr.bf16.mxu1 %v6070_v41 }
 0x181   : > { %v6073_v44 = vld [vmem:[%s7099_s3 + $0x8] sm:$0xff]  }
 0x185   : > { %v1185_v45 = vpop.f32.mrb[16].mxu1 }
 0x186   : > { %v1194_v46 = vadd.f32 %v1185_v45, %v1057_v40  ;;  %v5625_v47 = vpop.f32.mrb[17].mxu1  ;;  %v6074_v45 = vld [vmem:[%s7099_s3 + $0x50] sm:$0xff]  }
 0x187   : > { %v1188_v48 = vpop.f32.mrb[18].mxu1  ;;  %v6076_v47 = vld [vmem:[%s7099_s3 + $0x58] sm:$0xff]  }
 0x188   : > { %v1197_v49 = vadd.f32 %v1188_v48, %v1060_v43  ;;  %v5626_v50 = vpop.f32.mrb[19].mxu1  ;;  %v6072_v43 = vld [vmem:[%s7099_s3 + $0x48] sm:$0xff]   ;;  %v6077_v48 = vld [vmem:[%s7099_s3 + $0x18] sm:$0xff]  }
 0x189   : > { %v6079_v50 = vld [vmem:[%s7099_s3 + $0x20] sm:$0xff]  }
 0x18d   : > { %v1322_v51 = vpop.f32.mrb[20].mxu1 }
 0x18e   : > { %v1331_v52 = vadd.f32 %v1322_v51, %v1194_v46  ;;  %v5631_v53 = vpop.f32.mrb[21].mxu1  ;;  %v6075_v46 = vld [vmem:[%s7099_s3 + $0x10] sm:$0xff]   ;;  %v6080_v51 = vld [vmem:[%s7099_s3 + $0x68] sm:$0xff]  }
 0x18f   : > { %v1325_v54 = vpop.f32.mrb[22].mxu1  ;;  %v6082_v53 = vld [vmem:[%s7099_s3 + $0x70] sm:$0xff]  }
 0x190   : > { %v1334_v55 = vadd.f32 %v1325_v54, %v1197_v49  ;;  %v5632_v56 = vpop.f32.mrb[23].mxu1  ;;  %v6078_v49 = vld [vmem:[%s7099_s3 + $0x60] sm:$0xff]   ;;  %v6083_v54 = vld [vmem:[%s7099_s3 + $0x30] sm:$0xff]  }
 0x191   : > { %v2104_v56 = vpop.permute.xlu1 %2103 }
 0x195   : > { %v1459_v57 = vpop.f32.mrb[24].mxu1 }
 0x196   : > { %v1468_v58 = vadd.f32 %v1459_v57, %v1331_v52  ;;  %v5637_v6 = vpop.f32.mrb[25].mxu1  ;;  %v6081_v52 = vld [vmem:[%s7099_s3 + $0x28] sm:$0xff]   ;;  %v6085_v57 = vld [vmem:[%s7099_s3 + $0x38] sm:$0xff]  }
 0x197   : > { %v1462_v59 = vpop.f32.mrb[26].mxu1  ;;  %v2100_v6 = vpop.permute.xlu1 %2099 }
 0x198   : > { %v1471_v60 = vadd.f32 %v1462_v59, %v1334_v55  ;;  %v5638_v61 = vpop.f32.mrb[27].mxu1  ;;  %v6084_v55 = vld [vmem:[%s7099_s3 + $0x78] sm:$0xff]  }
 0x199   : > { %v6086_v61 = vld [vmem:[%s7099_s3 + $0x80] sm:$0xff]  }
 0x19d   : > { %v1596_v62 = vpop.f32.mrb[28].mxu1 }
 0x19e   : > { %v1605_v63 = vadd.f32 %v1596_v62, %v1468_v58  ;;  %v5643_v0 = vpop.f32.mrb[29].mxu1  ;;  %v2102_v58 = vpop.permute.xlu0 %2101  ;;  %v6087_v62 = vld [vmem:[%s7099_s3 + $0x88] sm:$0xff]  }
 0x19f   : > { %v1599_v1 = vpop.f32.mrb[30].mxu1  ;;  %v2106_v59 = vsel %vm1093_vm6, %v2102_v58, %v2104_v56  ;;  %v6089_v0 = vld [vmem:[%s7099_s3 + $0x98] sm:$0xff]  }
 0x1a0   : > { %v1608_v2 = vadd.f32 %v1599_v1, %v1471_v60  ;;  %v5644_v5 = vpop.f32.mrb[31].mxu1  ;;  %v2105_v60 = vsel %vm1093_vm6, %v2100_v6, %v2102_v58  ;;  %v6090_v1 = vld [vmem:[%s7099_s3 + $0xa0] ss:$0 sps:$4 sm:$0x33]  }
 0x1a5   : > { %v1733_v8 = vpop.f32.mrb[32].mxu1 }
 0x1a6   : > { %v1742_v10 = vadd.f32 %v1733_v8, %v1605_v63  ;;  %v5649_v11 = vpop.f32.mrb[33].mxu1  ;;  %v6088_v63 = vld [vmem:[%s7099_s3 + $0x90] sm:$0xff]  }
 0x1a7   : > { %v1736_v12 = vpop.f32.mrb[34].mxu1 }
 0x1a8   : > { %v1760_v14 = vadd.f32 %v1751_v9, %v1742_v10  ;;  %v1745_v15 = vadd.f32 %v1736_v12, %v1608_v2  ;;  %v5650_v16 = vpop.f32.mrb[35].mxu1  ;;  %v2236_v2 = vsel %vm592_vm1, %v6090_v1, 0 }
 0x1aa   : > { %v1772_v17 = vmul.f32 0.2, %v1760_v14  ;;  %v1763_v18 = vadd.f32 %v1756_v13, %v1745_v15  ;;  %vm1766_vm11 = vcmp.ge.f32.partialorder %v1760_v14, 0.0 }
 0x1ac   : > { %vm1769_vm12 = vcmp.ge.f32.partialorder %v1763_v18, 0.0  ;;  %v1775_v19 = vmul.f32 0.2, %v1763_v18  ;;  %v1778_v20 = vsel %vm1766_vm11, %v1760_v14, %v1772_v17  ;;  %vm3327_vm11 = vcmask 902232  }
 0x1ae   : > { %v1781_v21 = vsel %vm1769_vm12, %v1763_v18, %v1775_v19  ;;  %vm5105_vm12 = vcmask 1024  }
 0x1af   : > { %v1784_v22 = vpack.c.bf16 %v1781_v21, %v1778_v20  ;;  %v6091_v20 = vld [vmem:[%s7102_s4] sm:$0xff]   ;;  %v2829_v21 = vld [vmem:[%s7061_s5 + $0x8] sm:$0xff] }
 0x1b1   : > { %5662 = vmatmul.mubr.msk.bf16.vlgmr.msra.gmra.mrb[36].mxu1 %vm1949_vm13, %v1784_v22  ;;  %v2828_v22 = vld [vmem:[%s7061_s5] sm:$0xff] }
 0x1b2   : > { %5478 = vmatpush3.bf16.msra.mxu1 %v6071_v42  ;;  %2270 = vmatprep.mubr.bf16.mxu1 %v2106_v59  ;;  %v6095_v42 = vld [vmem:[%s7102_s4 + $0x28] sm:$0xff]  }
 0x1b3   : > { %5479 = vmatprep.subr.bf16.mxu1 %v6072_v43 }
 0x1b6   : > { %5480 = vmatpush3.bf16.msra.mxu1 %v6073_v44  ;;  %v6096_v44 = vld [vmem:[%s7102_s4 + $0x20] sm:$0xff]  }
 0x1b7   : > { %5481 = vmatprep.subr.bf16.mxu1 %v6074_v45 }
 0x1ba   : > { %5482 = vmatpush3.bf16.msra.mxu1 %v6075_v46  ;;  %v6098_v46 = vld [vmem:[%s7102_s4 + $0x38] sm:$0xff]  }
 0x1bb   : > { %5483 = vmatprep.subr.bf16.mxu1 %v6076_v47  ;;  %v6097_v47 = vld [vmem:[%s7102_s4 + $0x30] sm:$0xff]  }
 0x1be   : > { %5484 = vmatpush3.bf16.msra.mxu1 %v6077_v48 }
 0x1bf   : > { %5485 = vmatprep.subr.bf16.mxu1 %v6078_v49  ;;  %v6099_v49 = vld [vmem:[%s7102_s4 + $0x40] sm:$0xff]  }
 0x1c2   : > { %5486 = vmatpush3.bf16.msra.mxu1 %v6079_v50 }
 0x1c3   : > { %5487 = vmatprep.subr.bf16.mxu1 %v6080_v51 }
 0x1c6   : > { %5488 = vmatpush3.bf16.msra.mxu1 %v6081_v52 }
 0x1c7   : > { %5489 = vmatprep.subr.bf16.mxu1 %v6082_v53 }
 0x1c8   : > { %v1690_v23 = vpop.f32.mrb[0].mxu0 }
 0x1c9   : > { %v1758_v24 = vadd.f32 %v1751_v9, %v1690_v23  ;;  %v1692_v25 = vpop.f32.mrb[1].mxu0 }
 0x1ca   : > { %v1759_v26 = vadd.f32 %v1751_v9, %v1692_v25  ;;  %v1694_v27 = vpop.f32.mrb[2].mxu0  ;;  %5490 = vmatpush3.bf16.msra.mxu1 %v6083_v54 }
 0x1cb   : > { %v1770_v28 = vmul.f32 0.2, %v1758_v24  ;;  %v1761_v29 = vadd.f32 %v1756_v13, %v1694_v27  ;;  %v1696_v30 = vpop.f32.mrb[3].mxu0  ;;  %vm1764_vm14 = vcmp.ge.f32.partialorder %v1758_v24, 0.0  ;;  %5491 = vmatprep.subr.bf16.mxu1 %v6084_v55 }
 0x1cc   : > { %v1771_v31 = vmul.f32 0.2, %v1759_v26  ;;  %v1762_v32 = vadd.f32 %v1756_v13, %v1696_v30  ;;  %vm1765_vm15 = vcmp.ge.f32.partialorder %v1759_v26, 0.0 }
 0x1cd   : > { %vm1767_vm2 = vcmp.ge.f32.partialorder %v1761_v29, 0.0  ;;  %v1773_v33 = vmul.f32 0.2, %v1761_v29  ;;  %v1776_v35 = vsel %vm1764_vm14, %v1758_v24, %v1770_v28 }
 0x1ce   : > { %vm1768_vm4 = vcmp.ge.f32.partialorder %v1762_v32, 0.0  ;;  %v1774_v34 = vmul.f32 0.2, %v1762_v32  ;;  %v1777_v38 = vsel %vm1765_vm15, %v1759_v26, %v1771_v31  ;;  %5492 = vmatpush3.bf16.msra.mxu1 %v6085_v57 }
 0x1cf   : > { %v1779_v36 = vsel %vm1767_vm2, %v1761_v29, %v1773_v33  ;;  %5685 = vmatprep.subr.bf16.mxu1 %v6138_v3  ;;  %v6092_v29 = vld [vmem:[%s7102_s4 + $0x8] sm:$0xff]  }
 0x1d0   : > { %v1782_v37 = vpack.c.bf16 %v1779_v36, %v1776_v35  ;;  %v1780_v39 = vsel %vm1768_vm4, %v1762_v32, %v1774_v34  ;;  %v6093_v32 = vld [vmem:[%s7102_s4 + $0x18] sm:$0xff]  }
 0x1d1   : > { %v1783_v40 = vpack.c.bf16 %v1780_v39, %v1777_v38  ;;  %2271 = vmatmul.mubr.bf16.vlgmr.msra.gmra.mrb[40].mxu1 %v2105_v60 }
 0x1d2   : > { %5687 = vmatprep.mubr.msk.bf16.mxu1 %vm6139_vm0, %v6138_v3 }
 0x1d3   : > { %1988 = vmatprep.mubr.bf16.mxu0 %v1783_v40 }
 0x1d4   : > { %1989 = vmatmul.mubr.bf16.vlgmr.msra.gmra.mrb[4].mxu0 %v1782_v37  ;;  %v6094_v37 = vld [vmem:[%s7102_s4 + $0x10] sm:$0xff]  }
 0x1d5   : > { %5675 = vmatprep.mubr.msk.bf16.mxu0 %vm6139_vm0, %v6138_v3  ;;  %5666 = vmatpush3.bf16.msra.mxu0 %v6086_v61 }
 0x1d6   : > { %5667 = vmatprep.subr.bf16.mxu0 %v6138_v3 }
 0x1d9   : > { %5668 = vmatpush3.bf16.msra.mxu0 %v6087_v62 }
 0x1da   : > { %5669 = vmatprep.subr.bf16.mxu0 %v6138_v3 }
 0x1dd   : > { %5670 = vmatpush3.bf16.msra.mxu0 %v6088_v63 }
 0x1de   : > { %5671 = vmatprep.subr.bf16.mxu0 %v6138_v3 }
 0x1e1   : > { %5672 = vmatpush3.bf16.msra.mxu0 %v6089_v0 }
 0x1e2   : > { %5673 = vmatprep.subr.bf16.mxu0 %v6138_v3 }
 0x1e5   : > { %5674 = vmatpush3.bf16.msra.mxu0 %v2236_v2 }
 0x1e6   : > { %5679 = vmatprep.subr.bf16.mxu0 %v6138_v3 }
 0x1e8   : > { %5676 = vmatmul.mubr.msk.bf16.vlgmr.msra.gmra.mrb[8].mxu0 %vm1949_vm13, %v2104_v56 }
 0x1e9   : > { %5681 = vmatprep.mubr.msk.bf16.mxu0 %vm6139_vm0, %v6138_v3 }
 0x284   : > { %v2031_v5 = vpop.f32.mrb[36].mxu1 }
 0x285   : > { %v5663_v8 = vpop.f32.mrb[37].mxu1 }
 0x286   : > { %v2034_v9 = vpop.f32.mrb[38].mxu1 }
 0x287   : > { %v5664_v10 = vpop.f32.mrb[39].mxu1 }
 0x2a4   : > { %v5493_v23 = vpop.f32.mrb[40].mxu1 }
 0x2a5   : > { %v5494_v24 = vpop.f32.mrb[41].mxu1 }
 0x2a6   : > { %v5495_v25 = vadd.f32 %v5494_v24, %v5493_v23  ;;  %v5496_v26 = vpop.f32.mrb[42].mxu1 }
 0x2a7   : > { %v5465_v11 = vpop.f32.mrb[4].mxu0  ;;  %v5497_v27 = vpop.f32.mrb[43].mxu1 }
 0x2a8   : > { %v5466_v12 = vpop.f32.mrb[5].mxu0 }
 0x2a9   : > { %v5467_v13 = vadd.f32 %v5466_v12, %v5465_v11  ;;  %v5468_v14 = vpop.f32.mrb[6].mxu0 }
 0x2aa   : > { %v5469_v15 = vpop.f32.mrb[7].mxu0 }
 0x2ab   : > { %v2032_v16 = vadd.f32 %v5467_v13, %v2031_v5  ;;  %v5470_v17 = vadd.f32 %v5469_v15, %v5468_v14 }
 0x2ad   : > { %v2035_v18 = vadd.f32 %v5470_v17, %v2034_v9 }
 0x2af   : > { %v2038_v19 = vpack.c.bf16 %v2035_v18, %v2032_v16 }
 0x2b1   : > { %2437 = vrot.lane.b32.xlu1 %v2038_v19, %s7100_s30  ;;  %2332 = vrot.lane.b32.xlu0 %v2038_v19, %s7101_s28 }
 0x2b2   : > { %5686 = vmatpush3.bf16.msra.mxu1 %v2038_v19 }
 0x2b3   : > { %5697 = vmatprep.subr.bf16.mxu1 %v6138_v3 }
 0x2b5   : > { %2551 = vrot.lane.b32.xlu1 %v2038_v19, %s7087_s19  ;;  %2494 = vrot.lane.b32.xlu0 %v2038_v19, %s7085_s21 }
 0x2b6   : > { %5688 = vmatmul.mubr.msk.bf16.vlgmr.msra.gmra.mrb[44].mxu1 %vm2335_vm5, %v6091_v20 }
 0x2b7   : > { %5699 = vmatprep.mubr.msk.bf16.mxu1 %vm6139_vm0, %v6138_v3 }
 0x2b9   : > { %2665 = vrot.lane.b32.xlu1 %v2038_v19, %s7103_s0  ;;  %2608 = vrot.lane.b32.xlu0 %v2038_v19, %s7083_s1  ;;  %s7089_s1 = smov 11  }
 0x2bb   : > { %v2312_v33 = vpop.f32.mrb[8].mxu0 }
 0x2bc   : > { %v2313_v34 = vadd.f32 %v5495_v25, %v2312_v33  ;;  %v5677_v35 = vpop.f32.mrb[9].mxu0 }
 0x2bd   : > { %2779 = vrot.lane.b32.xlu1 %v2038_v19, %s7081_s20  ;;  %2722 = vrot.lane.b32.xlu0 %v2038_v19, %s6153_s23  ;;  %v2315_v39 = vpop.f32.mrb[10].mxu0  ;;  %s7105_s20 = smov 106  }
 0x2be   : > { %v2318_v38 = vpack.c.bf16 %v2313_v34, %v2313_v34  ;;  %v5678_v40 = vpop.f32.mrb[11].mxu0 }
 0x2c0   : > { %2319 = vst [vmem:[#allocation5] sm:$0x3] %v2318_v38 }
 0x2c1   : > { %2837 = vperm.xlu1 %6015, %v2829_v21   ;;  %2832 = vperm.xlu0 %6014, %v2828_v22  }
 0x323   : > { %v2333_v28 = vpop.permute.xlu0 %2332  ;;  %v2438_v30 = vpop.permute.xlu1 %2437 }
 0x324   : > { %5680 = vmatpush3.bf16.msra.mxu0 %v2333_v28 }
 0x325   : > { %5691 = vmatprep.subr.bf16.mxu0 %v6138_v3 }
 0x327   : > { %5682 = vmatmul.mubr.msk.bf16.vlgmr.msra.gmra.mrb[12].mxu0 %vm2335_vm5, %v6092_v29  ;;  %v2495_v31 = vpop.permute.xlu0 %2494  ;;  %v2552_v41 = vpop.permute.xlu1 %2551 }
 0x328   : > { %5692 = vmatpush3.bf16.msra.mxu0 %v2438_v30  ;;  %5698 = vmatpush3.bf16.msra.mxu1 %v2495_v31 }
 0x329   : > { %5709 = vmatprep.subr.bf16.mxu1 %v6138_v3  ;;  %5693 = vmatprep.mubr.msk.bf16.mxu0 %vm6139_vm0, %v6138_v3 }
 0x32a   : > { %5703 = vmatprep.subr.bf16.mxu0 %v6138_v3 }
 0x32b   : > { %v2609_v36 = vpop.permute.xlu0 %2608  ;;  %5700 = vmatmul.mubr.msk.bf16.vlgmr.msra.gmra.mrb[48].mxu1 %vm2335_vm5, %v6093_v32  ;;  %v2666_v45 = vpop.permute.xlu1 %2665 }
 0x32c   : > { %5710 = vmatpush3.bf16.msra.mxu1 %v2609_v36  ;;  %5711 = vmatprep.mubr.msk.bf16.mxu1 %vm6139_vm0, %v6138_v3 }
 0x32d   : > { %5721 = vmatprep.subr.bf16.mxu1 %v6138_v3 }
 0x32f   : > { %5694 = vmatmul.mubr.msk.bf16.vlgmr.msra.gmra.mrb[16].mxu0 %vm2335_vm5, %v6094_v37  ;;  %v2723_v43 = vpop.permute.xlu0 %2722  ;;  %v2780_v48 = vpop.permute.xlu1 %2779 }
 0x330   : > { %5704 = vmatpush3.bf16.msra.mxu0 %v2552_v41  ;;  %5705 = vmatprep.mubr.msk.bf16.mxu0 %vm6139_vm0, %v6138_v3 }
 0x331   : > { %5715 = vmatprep.subr.bf16.mxu0 %v6138_v3 }
 0x333   : > { %5712 = vmatmul.mubr.msk.bf16.vlgmr.msra.gmra.mrb[52].mxu1 %vm2335_vm5, %v6095_v42 }
 0x334   : > { %5722 = vmatpush3.bf16.msra.mxu1 %v2723_v43  ;;  %5723 = vmatprep.mubr.msk.bf16.mxu1 %vm6139_vm0, %v6138_v3 }
 0x335   : > { %5733 = vmatprep.subr.bf16.mxu1 %v6138_v3 }
 0x337   : > { %5706 = vmatmul.mubr.msk.bf16.vlgmr.msra.gmra.mrb[20].mxu0 %vm2335_vm5, %v6096_v44 }
 0x338   : > { %5716 = vmatpush3.bf16.msra.mxu0 %v2666_v45  ;;  %5717 = vmatprep.mubr.msk.bf16.mxu0 %vm6139_vm0, %v6138_v3 }
 0x339   : > { %5727 = vmatprep.subr.bf16.mxu0 %v6138_v3 }
 0x33b   : > { %5724 = vmatmul.mubr.msk.bf16.vlgmr.msra.gmra.mrb[56].mxu1 %vm2335_vm5, %v6098_v46 }
 0x33c   : > { %5735 = vmatprep.mubr.msk.bf16.mxu1 %vm6139_vm0, %v6138_v3 }
 0x33f   : > { %5718 = vmatmul.mubr.msk.bf16.vlgmr.msra.gmra.mrb[24].mxu0 %vm2335_vm5, %v6097_v47 }
 0x340   : > { %5728 = vmatpush3.bf16.msra.mxu0 %v2780_v48  ;;  %5729 = vmatprep.mubr.msk.bf16.mxu0 %vm6139_vm0, %v6138_v3  ;;  %v2833_v38 = vpop.permute.xlu0 %2832  ;;  %v2838_v43 = vpop.permute.xlu1 %2837 }
 0x341   : > { %5739 = vmatprep.subr.bf16.mxu0 %v6138_v3 }
 0x347   : > { %5730 = vmatmul.mubr.msk.bf16.vlgmr.msra.gmra.mrb[28].mxu0 %vm2335_vm5, %v6099_v49 }
 0x348   : > { %5741 = vmatprep.mubr.msk.bf16.mxu0 %vm6139_vm0, %v6138_v3 }
 0x389   : > { %v2422_v50 = vpop.f32.mrb[44].mxu1 }
 0x38a   : > { %v5689_v51 = vpop.f32.mrb[45].mxu1 }
 0x38b   : > { %v2425_v52 = vpop.f32.mrb[46].mxu1  ;;  %v2852_v51 = vsub.s32 0, %v6256_v4 }
 0x38c   : > { %v5690_v53 = vpop.f32.mrb[47].mxu1 }
 0x3fa   : > { %v2373_v54 = vpop.f32.mrb[12].mxu0 }
 0x3fb   : > { %v2423_v55 = vadd.f32 %v2422_v50, %v2373_v54  ;;  %v5683_v56 = vpop.f32.mrb[13].mxu0  ;;  %v550_v50 = vld [vmem:[%s7064_s8] sm:$0x1] }
 0x3fc   : > { %v2376_v57 = vpop.f32.mrb[14].mxu0  ;;  %vm2848_vm8 = vcmp.gt.f32.partialorder %v550_v50, 0.0 }
 0x3fd   : > { %v2426_v58 = vadd.f32 %v2425_v52, %v2376_v57  ;;  %v5684_v6 = vpop.f32.mrb[15].mxu0  ;;  %v6128_v52 = vld [vmem:[#allocation3] sm:$0xff] }
 0x3fe   : > { %v2534_v59 = vpop.f32.mrb[48].mxu1  ;;  %v2849_v53 = vsel %vm2848_vm8, 1, %v6128_v52 }
 0x3ff   : > { %v5701_v60 = vpop.f32.mrb[49].mxu1  ;;  %v6686_v54 = vrot.slane %v2849_v53, %v2852_v51 }
 0x400   : > { %v2537_v61 = vpop.f32.mrb[50].mxu1  ;;  %v2870_v60 = vld [vmem:[%s7062_s6] sm:$0x3] }
 0x401   : > { %v5702_v62 = vpop.f32.mrb[51].mxu1  ;;  %vm2854_vm9 = vcmp.eq.s32.totalorder %v6686_v54, 1 }
 0x402   : > { %v2477_v63 = vpop.f32.mrb[16].mxu0  ;;  %v3306_v62 = vld [vmem:[%s7063_s7] sm:$0xf] }
 0x403   : > { %v2484_v0 = vadd.f32 %v2477_v63, %v2423_v55  ;;  %v5695_v1 = vpop.f32.mrb[17].mxu0 }
 0x404   : > { %v2480_v2 = vpop.f32.mrb[18].mxu0  ;;  %v5300_v1 = vld [vmem:[%s7062_s6 + $0x2] sm:$0x3] }
 0x405   : > { %v2485_v5 = vadd.f32 %v2480_v2, %v2426_v58  ;;  %v2541_v8 = vadd.f32 %v2534_v59, %v2484_v0  ;;  %v5696_v9 = vpop.f32.mrb[19].mxu0 }
 0x406   : > { %v2648_v10 = vpop.f32.mrb[52].mxu1 }
 0x407   : > { %v2542_v11 = vadd.f32 %v2537_v61, %v2485_v5  ;;  %v5713_v12 = vpop.f32.mrb[53].mxu1  ;;  %v3313_v61 = vld [vmem:[#allocation5] sm:$0x3] }
 0x408   : > { %v2651_v13 = vpop.f32.mrb[54].mxu1  ;;  %v3314_v63 = vunpack.c.l.bf16 %v3313_v61  ;;  %v5309_v12 = vld [vmem:[%s7062_s6 + $0xa] sm:$0x3] }
 0x409   : > { %v5714_v14 = vpop.f32.mrb[55].mxu1 }
 0x40a   : > { %v2591_v15 = vpop.f32.mrb[20].mxu0  ;;  %v5307_v14 = vld [vmem:[%s7062_s6 + $0x8] sm:$0x3] }
 0x40b   : > { %v2598_v16 = vadd.f32 %v2591_v15, %v2541_v8  ;;  %v5707_v17 = vpop.f32.mrb[21].mxu0  ;;  %v5305_v8 = vld [vmem:[%s7062_s6 + $0x6] sm:$0x3] }
 0x40c   : > { %v2594_v18 = vpop.f32.mrb[22].mxu0  ;;  %v5311_v17 = vld [vmem:[%s7062_s6 + $0xc] sm:$0x3] }
 0x40d   : > { %v2599_v19 = vadd.f32 %v2594_v18, %v2542_v11  ;;  %v2655_v20 = vadd.f32 %v2648_v10, %v2598_v16  ;;  %v5708_v21 = vpop.f32.mrb[23].mxu0  ;;  %v5303_v10 = vld [vmem:[%s7062_s6 + $0x4] sm:$0x3]  ;;  %v5313_v16 = vld [vmem:[%s7062_s6 + $0xe] sm:$0x3] }
 0x40e   : > { %v2762_v22 = vpop.f32.mrb[56].mxu1 }
 0x40f   : > { %v2656_v23 = vadd.f32 %v2651_v13, %v2599_v19  ;;  %v5725_v24 = vpop.f32.mrb[57].mxu1  ;;  %v5315_v19 = vld [vmem:[%s7062_s6 + $0x10] sm:$0x3] }
 0x410   : > { %v2765_v25 = vpop.f32.mrb[58].mxu1 }
 0x411   : > { %v5726_v26 = vpop.f32.mrb[59].mxu1 }
 0x412   : > { %v2705_v27 = vpop.f32.mrb[24].mxu0 }
 0x413   : > { %v2712_v28 = vadd.f32 %v2705_v27, %v2655_v20  ;;  %v5719_v29 = vpop.f32.mrb[25].mxu0 }
 0x414   : > { %v2708_v30 = vpop.f32.mrb[26].mxu0 }
 0x415   : > { %v2713_v31 = vadd.f32 %v2708_v30, %v2656_v23  ;;  %v2769_v32 = vadd.f32 %v2762_v22, %v2712_v28  ;;  %v5720_v33 = vpop.f32.mrb[27].mxu0 }
 0x417   : > { %v2770_v34 = vadd.f32 %v2765_v25, %v2713_v31 }
 0x41a   : > { %v2819_v35 = vpop.f32.mrb[28].mxu0 }
 0x41b   : > { %v2826_v36 = vadd.f32 %v2819_v35, %v2769_v32  ;;  %v5731_v37 = vpop.f32.mrb[29].mxu0 }
 0x41c   : > { %v2822_v39 = vpop.f32.mrb[30].mxu0 }
 0x41d   : > { %v2840_v40 = vadd.f32 %v2833_v38, %v2826_v36  ;;  %v2827_v41 = vadd.f32 %v2822_v39, %v2770_v34  ;;  %v5732_v42 = vpop.f32.mrb[31].mxu0 }
 0x41f   : > { %v2844_v44 = vmul.f32 0.2, %v2840_v40  ;;  %v2841_v45 = vadd.f32 %v2838_v43, %v2827_v41  ;;  %vm2842_vm6 = vcmp.ge.f32.partialorder %v2840_v40, 0.0 }
 0x421   : > { %vm2843_vm7 = vcmp.ge.f32.partialorder %v2841_v45, 0.0  ;;  %v2845_v46 = vmul.f32 0.2, %v2841_v45  ;;  %v2846_v47 = vsel %vm2842_vm6, %v2840_v40, %v2844_v44 }
 0x423   : > { %v2847_v48 = vsel %vm2843_vm7, %v2841_v45, %v2845_v46 }
 0x424   : > { %v6016_v49 = vpack.i.bf16 %v2847_v48, %v2846_v47 }
 0x426   : > { %6017 = vrot.lane.b32.xlu0 %v6016_v49, %s7089_s1 }
 0x498   : > { %v6018_v55 = vpop.permute.xlu0 %6017 }
 0x499   : > { %v6020_v56 = vunpack.i.h.bf16 %v6018_v55  ;;  %v6019_v57 = vunpack.i.l.bf16 %v6018_v55 }
 0x49b   : > { %v2864_v58 = vsel %vm2854_vm9, %v6020_v56, 0.0  ;;  %v2863_v6 = vsel %vm2854_vm9, %v6019_v57, 0.0 }
 0x49c   : > { %v2866_v59 = vpack.c.bf16 %v2864_v58, %v2863_v6 }
 0x49e   : > { %2868 = vst.msk [vmem:[#allocation3] sm:$0xff] %vm2867_vm10, %v2866_v59 }
 0x4a5   : > { %v2869_v4 = vld [vmem:[#allocation3] sm:$0xff] }
 0x4a6   : > { %2965 = vrot.lane.b32.xlu0 %v2869_v4, %s7100_s30  ;;  %2874 = vrot.lane.b32.xlu1 %v2869_v4, %s7101_s28 }
 0x4a7   : > { %5740 = vmatpush3.bf16.msra.mxu0 %v2869_v4 }
 0x4a8   : > { %5751 = vmatprep.subr.bf16.mxu0 %v6138_v3 }
 0x4aa   : > { %3063 = vrot.lane.b32.xlu0 %v2869_v4, %s7087_s19  ;;  %3014 = vrot.lane.b32.xlu1 %v2869_v4, %s7085_s21 }
 0x4ab   : > { %5742 = vmatmul.mubr.msk.bf16.vlgmr.msra.gmra.mrb[32].mxu0 %vm2335_vm5, %v2870_v60 }
 0x4ac   : > { %5753 = vmatprep.mubr.msk.bf16.mxu0 %vm6139_vm0, %v6138_v3 }
 0x4ae   : > { %3161 = vrot.lane.b32.xlu0 %v2869_v4, %s7103_s0  ;;  %3112 = vrot.lane.b32.xlu1 %v2869_v4, %s7104_s27 }
 0x4b2   : > { %3259 = vrot.lane.b32.xlu0 %v2869_v4, %s7105_s20  ;;  %3210 = vrot.lane.b32.xlu1 %v2869_v4, %s6153_s23 }
 0x4b6   : > { %3309 = vperm.xlu1 %6015, %v3306_v62   ;;  %3316 = vrot.lane.b32.xlu0 %v3314_v63, %s7087_s19 }
 0x518   : > { %v2875_v0 = vpop.permute.xlu1 %2874  ;;  %v2966_v2 = vpop.permute.xlu0 %2965 }
 0x519   : > { %5734 = vmatpush3.bf16.msra.mxu1 %v2875_v0 }
 0x51a   : > { %5745 = vmatprep.subr.bf16.mxu1 %v6138_v3 }
 0x51c   : > { %5736 = vmatmul.mubr.msk.bf16.vlgmr.msra.gmra.mrb[60].mxu1 %vm2335_vm5, %v5300_v1  ;;  %v3015_v5 = vpop.permute.xlu1 %3014  ;;  %v3064_v11 = vpop.permute.xlu0 %3063 }
 0x51d   : > { %5746 = vmatpush3.bf16.msra.mxu1 %v2966_v2  ;;  %5752 = vmatpush3.bf16.msra.mxu0 %v3015_v5 }
 0x51e   : > { %5763 = vmatprep.subr.bf16.mxu0 %v6138_v3  ;;  %5747 = vmatprep.mubr.msk.bf16.mxu1 %vm6139_vm0, %v6138_v3 }
 0x51f   : > { %5757 = vmatprep.subr.bf16.mxu1 %v6138_v3 }
 0x520   : > { %v3113_v9 = vpop.permute.xlu1 %3112  ;;  %5754 = vmatmul.mubr.msk.bf16.vlgmr.msra.gmra.mrb[36].mxu0 %vm2335_vm5, %v5305_v8  ;;  %v3162_v15 = vpop.permute.xlu0 %3161 }
 0x521   : > { %5764 = vmatpush3.bf16.msra.mxu0 %v3113_v9  ;;  %5765 = vmatprep.mubr.msk.bf16.mxu0 %vm6139_vm0, %v6138_v3 }
 0x522   : > { %5775 = vmatprep.subr.bf16.mxu0 %v6138_v3 }
 0x524   : > { %5748 = vmatmul.mubr.msk.bf16.vlgmr.msra.gmra.mrb[64].mxu1 %vm2335_vm5, %v5303_v10  ;;  %v3211_v13 = vpop.permute.xlu1 %3210  ;;  %v3260_v18 = vpop.permute.xlu0 %3259 }
 0x525   : > { %5758 = vmatpush3.bf16.msra.mxu1 %v3064_v11  ;;  %5759 = vmatprep.mubr.msk.bf16.mxu1 %vm6139_vm0, %v6138_v3 }
 0x526   : > { %5769 = vmatprep.subr.bf16.mxu1 %v6138_v3 }
 0x528   : > { %5766 = vmatmul.mubr.msk.bf16.vlgmr.msra.gmra.mrb[40].mxu0 %vm2335_vm5, %v5309_v12  ;;  %v3317_v1 = vpop.permute.xlu0 %3316 }
 0x529   : > { %5776 = vmatpush3.bf16.msra.mxu0 %v3211_v13  ;;  %5777 = vmatprep.mubr.msk.bf16.mxu0 %vm6139_vm0, %v6138_v3 }
 0x52a   : > { %5787 = vmatprep.subr.bf16.mxu0 %v6138_v3 }
 0x52c   : > { %5760 = vmatmul.mubr.msk.bf16.vlgmr.msra.gmra.mrb[68].mxu1 %vm2335_vm5, %v5307_v14  ;;  %v6100_v14 = vld [vmem:[%s7065_s9] sm:$0xff]  }
 0x52d   : > { %5770 = vmatpush3.bf16.msra.mxu1 %v3162_v15  ;;  %5771 = vmatprep.mubr.msk.bf16.mxu1 %vm6139_vm0, %v6138_v3  ;;  %v3925_v15 = vld [vmem:[%s7066_s10] sm:$0xff] }
 0x52e   : > { %5781 = vmatprep.subr.bf16.mxu1 %v6138_v3 }
 0x530   : > { %5778 = vmatmul.mubr.msk.bf16.vlgmr.msra.gmra.mrb[44].mxu0 %vm2335_vm5, %v5313_v16 }
 0x531   : > { %5789 = vmatprep.mubr.msk.bf16.mxu0 %vm6139_vm0, %v6138_v3 }
 0x534   : > { %5772 = vmatmul.mubr.msk.bf16.vlgmr.msra.gmra.mrb[72].mxu1 %vm2335_vm5, %v5311_v17 }
 0x535   : > { %5782 = vmatpush3.bf16.msra.mxu1 %v3260_v18  ;;  %5783 = vmatprep.mubr.msk.bf16.mxu1 %vm6139_vm0, %v6138_v3  ;;  %v3310_v61 = vpop.permute.xlu1 %3309  ;;  %v6101_v18 = vld [vmem:[%s7065_s9 + $0x8] sm:$0xff]  }
 0x536   : > { %5793 = vmatprep.subr.bf16.mxu1 %v6138_v3 }
 0x53c   : > { %5784 = vmatmul.mubr.msk.bf16.vlgmr.msra.gmra.mrb[76].mxu1 %vm2335_vm5, %v5315_v19 }
 0x53d   : > { %5795 = vmatprep.mubr.msk.bf16.mxu1 %vm6139_vm0, %v6138_v3 }
 0x57e   : > { %v2957_v20 = vpop.f32.mrb[32].mxu0 }
 0x57f   : > { %v5743_v21 = vpop.f32.mrb[33].mxu0 }
 0x580   : > { %v2960_v22 = vpop.f32.mrb[34].mxu0 }
 0x581   : > { %v5744_v23 = vpop.f32.mrb[35].mxu0 }
 0x582   : > { %v6102_v23 = vld [vmem:[%s7065_s9 + $0x18] sm:$0xff]  }
 0x5ef   : > { %v2914_v24 = vpop.f32.mrb[60].mxu1 }
 0x5f0   : > { %v2958_v25 = vadd.f32 %v2957_v20, %v2914_v24  ;;  %v5737_v26 = vpop.f32.mrb[61].mxu1 }
 0x5f1   : > { %v2917_v27 = vpop.f32.mrb[62].mxu1  ;;  %v6103_v26 = vld [vmem:[%s7065_s9 + $0x10] sm:$0xff]  }
 0x5f2   : > { %v5738_v28 = vpop.f32.mrb[63].mxu1 }
 0x5f3   : > { %v3054_v29 = vpop.f32.mrb[36].mxu0 }
 0x5f4   : > { %v5755_v30 = vpop.f32.mrb[37].mxu0 }
 0x5f5   : > { %v3057_v31 = vpop.f32.mrb[38].mxu0 }
 0x5f6   : > { %v5756_v32 = vpop.f32.mrb[39].mxu0 }
 0x5f7   : > { %v3005_v33 = vpop.f32.mrb[64].mxu1  ;;  %v6105_v32 = vld [vmem:[%s7065_s9 + $0x20] sm:$0xff]  }
 0x5f8   : > { %v3011_v34 = vadd.f32 %v3005_v33, %v2958_v25  ;;  %v5749_v35 = vpop.f32.mrb[65].mxu1 }
 0x5f9   : > { %v3008_v36 = vpop.f32.mrb[66].mxu1  ;;  %v6107_v35 = vld [vmem:[%s7065_s9 + $0x38] sm:$0xff]  }
 0x5fa   : > { %v3060_v37 = vadd.f32 %v3054_v29, %v3011_v34  ;;  %v5750_v38 = vpop.f32.mrb[67].mxu1  ;;  %v6104_v29 = vld [vmem:[%s7065_s9 + $0x28] sm:$0xff]   ;;  %v6106_v36 = vld [vmem:[%s7065_s9 + $0x30] sm:$0xff]  }
 0x5fb   : > { %v3152_v39 = vpop.f32.mrb[40].mxu0 }
 0x5fc   : > { %v5767_v40 = vpop.f32.mrb[41].mxu0 }
 0x5fd   : > { %v3155_v41 = vpop.f32.mrb[42].mxu0 }
 0x5fe   : > { %v5768_v42 = vpop.f32.mrb[43].mxu0 }
 0x5ff   : > { %v3103_v43 = vpop.f32.mrb[68].mxu1 }
 0x600   : > { %v3109_v44 = vadd.f32 %v3103_v43, %v3060_v37  ;;  %v5761_v45 = vpop.f32.mrb[69].mxu1 }
 0x601   : > { %v3106_v46 = vpop.f32.mrb[70].mxu1 }
 0x602   : > { %v3158_v47 = vadd.f32 %v3152_v39, %v3109_v44  ;;  %v5762_v48 = vpop.f32.mrb[71].mxu1  ;;  %v6108_v39 = vld [vmem:[%s7065_s9 + $0x40] sm:$0xff]  }
 0x603   : > { %v3250_v49 = vpop.f32.mrb[44].mxu0 }
 0x604   : > { %v5779_v50 = vpop.f32.mrb[45].mxu0 }
 0x605   : > { %v3253_v51 = vpop.f32.mrb[46].mxu0 }
 0x606   : > { %v5780_v52 = vpop.f32.mrb[47].mxu0 }
 0x607   : > { %v3201_v53 = vpop.f32.mrb[72].mxu1 }
 0x608   : > { %v3207_v55 = vadd.f32 %v3201_v53, %v3158_v47  ;;  %v5773_v56 = vpop.f32.mrb[73].mxu1 }
 0x609   : > { %v3204_v57 = vpop.f32.mrb[74].mxu1 }
 0x60a   : > { %v3256_v58 = vadd.f32 %v3250_v49, %v3207_v55  ;;  %v5774_v6 = vpop.f32.mrb[75].mxu1 }
 0x60f   : > { %v3299_v59 = vpop.f32.mrb[76].mxu1 }
 0x610   : > { %v3305_v4 = vadd.f32 %v3299_v59, %v3256_v58  ;;  %v5785_v60 = vpop.f32.mrb[77].mxu1 }
 0x611   : > { %v3302_v62 = vpop.f32.mrb[78].mxu1 }
 0x612   : > { %v3312_v63 = vadd.f32 %v3310_v61, %v3305_v4  ;;  %v5786_v0 = vpop.f32.mrb[79].mxu1 }
 0x614   : > { %v3319_v2 = vadd.f32 %v3317_v1, %v3312_v63 }
 0x616   : > { %3321 = vrot.lane.b32.xlu1 %v3319_v2, %s7089_s1 }
 0x688   : > { %v3322_v5 = vpop.permute.xlu1 %3321 }
 0x689   : > { %v3324_v8 = vsel %vm2854_vm9, %v3322_v5, 0.0 }
 0x68a   : > { %v3326_v9 = vpack.c.bf16 %v3324_v8, %v3324_v8 }
 0x68c   : > { %3328 = vst.msk [vmem:[#allocation4] sm:$0x3] %vm3327_vm11, %v3326_v9 }
 0x693   : > { %v5326_v10 = vld.sshfl [vmem:[#allocation4] sm:$0x3 pattern:$0x76325410] }
 0x694   : > { %v3329_v11 = vld [vmem:[#allocation4] sm:$0x3]  ;;  %3466 = vrot.lane.b32.xlu1 %v5326_v10, %s7100_s30 }
 0x695   : > { %v3406_v12 = vsel %vm592_vm1, %v3329_v11, 0  ;;  %v3347_v13 = vrot.slane %v3329_v11, %v6268_v7  ;;  %v3926_v7 = vld [vmem:[%s7066_s10 + $0x8] sm:$0xff] }
 0x696   : > { %5794 = vmatpush3.bf16.msra.mxu1 %v3406_v12 }
 0x697   : > { %3348 = vrot.lane.b32.xlu0 %v3347_v13, %s7101_s28  ;;  %5805 = vmatprep.subr.bf16.mxu1 %v6138_v3 }
 0x698   : > { %3602 = vrot.lane.b32.xlu1 %v5326_v10, %s7087_s19 }
 0x699   : > { %5796 = vmatmul.mubr.msk.bf16.vlgmr.msra.gmra.mrb[80].mxu1 %vm588_vm3, %v6100_v14 }
 0x69a   : > { %5807 = vmatprep.mubr.msk.bf16.mxu1 %vm6139_vm0, %v6138_v3 }
 0x69b   : > { %3534 = vrot.lane.b32.xlu0 %v5326_v10, %s7106_s18 }
 0x69c   : > { %3738 = vrot.lane.b32.xlu1 %v5326_v10, %s7103_s0 }
 0x69f   : > { %3670 = vrot.lane.b32.xlu0 %v5326_v10, %s7104_s27 }
 0x6a0   : > { %3874 = vrot.lane.b32.xlu1 %v5326_v10, %s7105_s20 }
 0x6a3   : > { %3806 = vrot.lane.b32.xlu0 %v5326_v10, %s6153_s23 }
 0x6a4   : > { %3934 = vperm.xlu1 %6015, %v3926_v7  }
 0x6a7   : > { %3929 = vperm.xlu0 %6014, %v3925_v15  }
 0x706   : > { %v3467_v19 = vpop.permute.xlu1 %3466 }
 0x707   : > { %v3472_v21 = vsel %vm592_vm1, %v3467_v19, 0 }
 0x709   : > { %v3349_v16 = vpop.permute.xlu0 %3348 }
 0x70a   : > { %v3354_v17 = vsel %vm592_vm1, %v3349_v16, 0  ;;  %v3603_v27 = vpop.permute.xlu1 %3602 }
 0x70b   : > { %5788 = vmatpush3.bf16.msra.mxu0 %v3354_v17  ;;  %v3608_v28 = vsel %vm592_vm1, %v3603_v27, 0 }
 0x70c   : > { %5799 = vmatprep.subr.bf16.mxu0 %v6138_v3 }
 0x70d   : > { %v3535_v20 = vpop.permute.xlu0 %3534 }
 0x70e   : > { %v3540_v22 = vsel %vm592_vm1, %v3535_v20, 0  ;;  %5790 = vmatmul.mubr.msk.bf16.vlgmr.msra.gmra.mrb[48].mxu0 %vm588_vm3, %v6101_v18  ;;  %v3739_v33 = vpop.permute.xlu1 %3738 }
 0x70f   : > { %5800 = vmatpush3.bf16.msra.mxu0 %v3472_v21  ;;  %5806 = vmatpush3.bf16.msra.mxu1 %v3540_v22  ;;  %v3744_v34 = vsel %vm592_vm1, %v3739_v33, 0 }
 0x710   : > { %5817 = vmatprep.subr.bf16.mxu1 %v6138_v3  ;;  %5801 = vmatprep.mubr.msk.bf16.mxu0 %vm6139_vm0, %v6138_v3 }
 0x711   : > { %v3671_v24 = vpop.permute.xlu0 %3670  ;;  %5811 = vmatprep.subr.bf16.mxu0 %v6138_v3 }
 0x712   : > { %v3676_v25 = vsel %vm592_vm1, %v3671_v24, 0  ;;  %5808 = vmatmul.mubr.msk.bf16.vlgmr.msra.gmra.mrb[84].mxu1 %vm588_vm3, %v6102_v23  ;;  %v3875_v37 = vpop.permute.xlu1 %3874 }
 0x713   : > { %5818 = vmatpush3.bf16.msra.mxu1 %v3676_v25  ;;  %5819 = vmatprep.mubr.msk.bf16.mxu1 %vm6139_vm0, %v6138_v3  ;;  %v3880_v38 = vsel %vm592_vm1, %v3875_v37, 0 }
 0x714   : > { %5829 = vmatprep.subr.bf16.mxu1 %v6138_v3 }
 0x715   : > { %v3807_v30 = vpop.permute.xlu0 %3806 }
 0x716   : > { %5802 = vmatmul.mubr.msk.bf16.vlgmr.msra.gmra.mrb[52].mxu0 %vm588_vm3, %v6103_v26  ;;  %v3812_v31 = vsel %vm592_vm1, %v3807_v30, 0  ;;  %vm5093_vm1 = vcmask 812032  }
 0x717   : > { %5812 = vmatpush3.bf16.msra.mxu0 %v3608_v28  ;;  %5813 = vmatprep.mubr.msk.bf16.mxu0 %vm6139_vm0, %v6138_v3 }
 0x718   : > { %5823 = vmatprep.subr.bf16.mxu0 %v6138_v3 }
 0x71a   : > { %5820 = vmatmul.mubr.msk.bf16.vlgmr.msra.gmra.mrb[88].mxu1 %vm588_vm3, %v6104_v29 }
 0x71b   : > { %5830 = vmatpush3.bf16.msra.mxu1 %v3812_v31  ;;  %5831 = vmatprep.mubr.msk.bf16.mxu1 %vm6139_vm0, %v6138_v3 }
 0x71c   : > { %5841 = vmatprep.subr.bf16.mxu1 %v6138_v3 }
 0x71e   : > { %5814 = vmatmul.mubr.msk.bf16.vlgmr.msra.gmra.mrb[56].mxu0 %vm588_vm3, %v6105_v32 }
 0x71f   : > { %5824 = vmatpush3.bf16.msra.mxu0 %v3744_v34  ;;  %5825 = vmatprep.mubr.msk.bf16.mxu0 %vm6139_vm0, %v6138_v3 }
 0x720   : > { %5835 = vmatprep.subr.bf16.mxu0 %v6138_v3 }
 0x722   : > { %5832 = vmatmul.mubr.msk.bf16.vlgmr.msra.gmra.mrb[92].mxu1 %vm588_vm3, %v6107_v35 }
 0x723   : > { %5843 = vmatprep.mubr.msk.bf16.mxu1 %vm6139_vm0, %v6138_v3  ;;  %v3935_v32 = vpop.permute.xlu1 %3934 }
 0x726   : > { %5826 = vmatmul.mubr.msk.bf16.vlgmr.msra.gmra.mrb[60].mxu0 %vm588_vm3, %v6106_v36  ;;  %v3930_v27 = vpop.permute.xlu0 %3929 }
 0x727   : > { %5836 = vmatpush3.bf16.msra.mxu0 %v3880_v38  ;;  %5837 = vmatprep.mubr.msk.bf16.mxu0 %vm6139_vm0, %v6138_v3 }
 0x728   : > { %5847 = vmatprep.subr.bf16.mxu0 %v6138_v3 }
 0x72e   : > { %5838 = vmatmul.mubr.msk.bf16.vlgmr.msra.gmra.mrb[64].mxu0 %vm588_vm3, %v6108_v39  ;;  %vm5103_vm3 = vcmask 7168  }
 0x72f   : > { %5849 = vmatprep.mubr.msk.bf16.mxu0 %vm6139_vm0, %v6138_v3 }
 0x76c   : > { %v3442_v40 = vpop.f32.mrb[80].mxu1 }
 0x76d   : > { %v5797_v41 = vpop.f32.mrb[81].mxu1 }
 0x76e   : > { %v3445_v42 = vpop.f32.mrb[82].mxu1 }
 0x76f   : > { %v5798_v43 = vpop.f32.mrb[83].mxu1 }
 0x770   : > { %v4462_v43 = vld [vmem:[%s7068_s12 + $0x8] sm:$0xff] }
 0x7e1   : > { %v3390_v44 = vpop.f32.mrb[48].mxu0 }
 0x7e2   : > { %v3443_v45 = vadd.f32 %v3442_v40, %v3390_v44  ;;  %v5791_v46 = vpop.f32.mrb[49].mxu0  ;;  %v4461_v44 = vld [vmem:[%s7068_s12] sm:$0xff] }
 0x7e3   : > { %v3393_v47 = vpop.f32.mrb[50].mxu0  ;;  %v6110_v46 = vld [vmem:[%s7067_s11 + $0x8] sm:$0xff]  }
 0x7e4   : > { %v3446_v48 = vadd.f32 %v3445_v42, %v3393_v47  ;;  %v5792_v49 = vpop.f32.mrb[51].mxu0  ;;  %v6109_v42 = vld [vmem:[%s7067_s11] sm:$0xff]  }
 0x7e5   : > { %v3576_v50 = vpop.f32.mrb[84].mxu1  ;;  %v6111_v49 = vld [vmem:[%s7067_s11 + $0x18] sm:$0xff]  }
 0x7e6   : > { %v5809_v51 = vpop.f32.mrb[85].mxu1 }
 0x7e7   : > { %v3579_v52 = vpop.f32.mrb[86].mxu1  ;;  %v6112_v51 = vld [vmem:[%s7067_s11 + $0x10] sm:$0xff]  }
 0x7e8   : > { %v5810_v53 = vpop.f32.mrb[87].mxu1 }
 0x7e9   : > { %v3508_v55 = vpop.f32.mrb[52].mxu0  ;;  %v6113_v53 = vld [vmem:[%s7067_s11 + $0x28] sm:$0xff]  }
 0x7ea   : > { %v3515_v56 = vadd.f32 %v3508_v55, %v3443_v45  ;;  %v5803_v57 = vpop.f32.mrb[53].mxu0 }
 0x7eb   : > { %v3511_v58 = vpop.f32.mrb[54].mxu0 }
 0x7ec   : > { %v3516_v6 = vadd.f32 %v3511_v58, %v3446_v48  ;;  %v3583_v59 = vadd.f32 %v3576_v50, %v3515_v56  ;;  %v5804_v4 = vpop.f32.mrb[55].mxu0  ;;  %v6114_v56 = vld [vmem:[%s7067_s11 + $0x20] sm:$0xff]   ;;  %v6116_v58 = vld [vmem:[%s7067_s11 + $0x38] sm:$0xff]  }
 0x7ed   : > { %v3712_v60 = vpop.f32.mrb[88].mxu1  ;;  %v6117_v4 = vld [vmem:[%s7067_s11 + $0x40] sm:$0xff]  }
 0x7ee   : > { %v3584_v61 = vadd.f32 %v3579_v52, %v3516_v6  ;;  %v5821_v62 = vpop.f32.mrb[89].mxu1  ;;  %v6115_v6 = vld [vmem:[%s7067_s11 + $0x30] sm:$0xff]  }
 0x7ef   : > { %v3715_v63 = vpop.f32.mrb[90].mxu1 }
 0x7f0   : > { %v5822_v0 = vpop.f32.mrb[91].mxu1 }
 0x7f1   : > { %v3644_v1 = vpop.f32.mrb[56].mxu0 }
 0x7f2   : > { %v3651_v2 = vadd.f32 %v3644_v1, %v3583_v59  ;;  %v5815_v5 = vpop.f32.mrb[57].mxu0 }
 0x7f3   : > { %v3647_v8 = vpop.f32.mrb[58].mxu0 }
 0x7f4   : > { %v3652_v9 = vadd.f32 %v3647_v8, %v3584_v61  ;;  %v3719_v10 = vadd.f32 %v3712_v60, %v3651_v2  ;;  %v5816_v11 = vpop.f32.mrb[59].mxu0 }
 0x7f5   : > { %v3848_v12 = vpop.f32.mrb[92].mxu1 }
 0x7f6   : > { %v3720_v13 = vadd.f32 %v3715_v63, %v3652_v9  ;;  %v5833_v14 = vpop.f32.mrb[93].mxu1 }
 0x7f7   : > { %v3851_v7 = vpop.f32.mrb[94].mxu1 }
 0x7f8   : > { %v5834_v15 = vpop.f32.mrb[95].mxu1 }
 0x7f9   : > { %v3780_v16 = vpop.f32.mrb[60].mxu0 }
 0x7fa   : > { %v3787_v17 = vadd.f32 %v3780_v16, %v3719_v10  ;;  %v5827_v18 = vpop.f32.mrb[61].mxu0 }
 0x7fb   : > { %v3783_v19 = vpop.f32.mrb[62].mxu0 }
 0x7fc   : > { %v3788_v20 = vadd.f32 %v3783_v19, %v3720_v13  ;;  %v3855_v21 = vadd.f32 %v3848_v12, %v3787_v17  ;;  %v5828_v22 = vpop.f32.mrb[63].mxu0 }
 0x7fe   : > { %v3856_v23 = vadd.f32 %v3851_v7, %v3788_v20 }
 0x801   : > { %v3916_v24 = vpop.f32.mrb[64].mxu0 }
 0x802   : > { %v3923_v25 = vadd.f32 %v3916_v24, %v3855_v21  ;;  %v5839_v26 = vpop.f32.mrb[65].mxu0 }
 0x803   : > { %v3919_v28 = vpop.f32.mrb[66].mxu0 }
 0x804   : > { %v3937_v29 = vadd.f32 %v3930_v27, %v3923_v25  ;;  %v3924_v30 = vadd.f32 %v3919_v28, %v3856_v23  ;;  %v5840_v31 = vpop.f32.mrb[67].mxu0 }
 0x806   : > { %v3939_v33 = vmax.f32 %v3937_v29, 0.0  ;;  %v3938_v34 = vadd.f32 %v3935_v32, %v3924_v30 }
 0x808   : > { %v3940_v35 = vmax.f32 %v3938_v34, 0.0  ;;  %3943 = vrot.lane.b32.xlu0 %v3939_v33, %s7107_s2 }
 0x80a   : > { %3945 = vrot.lane.b32.xlu1 %v3940_v35, %s7107_s2 }
 0x87a   : > { %v3944_v36 = vpop.permute.xlu0 %3943 }
 0x87b   : > { %v6863_v38 = vsel %vm2854_vm9, %v3944_v36, 0.0 }
 0x87c   : > { %v3946_v37 = vpop.permute.xlu1 %3945 }
 0x87d   : > { %v6867_v39 = vsel %vm2854_vm9, %v3946_v37, 0.0 }
 0x87e   : > { %v3952_v40 = vpack.c.bf16 %v6867_v39, %v6863_v38 }
 0x880   : > { %3953 = vst.msk [vmem:[#allocation6] sm:$0xff] %vm2867_vm10, %v3952_v40 }
 0x887   : > { %v3954_v41 = vld [vmem:[#allocation6] sm:$0xff] }
 0x888   : > { %4070 = vrot.lane.b32.xlu1 %v3954_v41, %s7100_s30  ;;  %3966 = vrot.lane.b32.xlu0 %v3954_v41, %s7101_s28 }
 0x889   : > { %5848 = vmatpush3.bf16.msra.mxu0 %v3954_v41 }
 0x88a   : > { %5859 = vmatprep.subr.bf16.mxu0 %v6138_v3 }
 0x88c   : > { %4184 = vrot.lane.b32.xlu1 %v3954_v41, %s7108_s26  ;;  %4127 = vrot.lane.b32.xlu0 %v3954_v41, %s7106_s18 }
 0x88d   : > { %5850 = vmatmul.mubr.msk.bf16.vlgmr.msra.gmra.mrb[68].mxu0 %vm2335_vm5, %v6109_v42 }
 0x88e   : > { %5861 = vmatprep.mubr.msk.bf16.mxu0 %vm6139_vm0, %v6138_v3 }
 0x890   : > { %4298 = vrot.lane.b32.xlu1 %v3954_v41, %s7103_s0  ;;  %4241 = vrot.lane.b32.xlu0 %v3954_v41, %s7104_s27 }
 0x894   : > { %4412 = vrot.lane.b32.xlu1 %v3954_v41, %s7105_s20  ;;  %4355 = vrot.lane.b32.xlu0 %v3954_v41, %s6153_s23 }
 0x898   : > { %4470 = vperm.xlu1 %6015, %v4462_v43   ;;  %4465 = vperm.xlu0 %6014, %v4461_v44  }
 0x8fa   : > { %v3967_v45 = vpop.permute.xlu0 %3966  ;;  %v4071_v47 = vpop.permute.xlu1 %4070 }
 0x8fb   : > { %5842 = vmatpush3.bf16.msra.mxu1 %v3967_v45 }
 0x8fc   : > { %5853 = vmatprep.subr.bf16.mxu1 %v6138_v3 }
 0x8fe   : > { %5844 = vmatmul.mubr.msk.bf16.vlgmr.msra.gmra.mrb[96].mxu1 %vm2335_vm5, %v6110_v46  ;;  %v4128_v48 = vpop.permute.xlu0 %4127  ;;  %v4185_v52 = vpop.permute.xlu1 %4184 }
 0x8ff   : > { %5854 = vmatpush3.bf16.msra.mxu1 %v4071_v47  ;;  %5860 = vmatpush3.bf16.msra.mxu0 %v4128_v48 }
 0x900   : > { %5871 = vmatprep.subr.bf16.mxu0 %v6138_v3  ;;  %5855 = vmatprep.mubr.msk.bf16.mxu1 %vm6139_vm0, %v6138_v3 }
 0x901   : > { %5865 = vmatprep.subr.bf16.mxu1 %v6138_v3 }
 0x902   : > { %v4242_v50 = vpop.permute.xlu0 %4241  ;;  %5862 = vmatmul.mubr.msk.bf16.vlgmr.msra.gmra.mrb[72].mxu0 %vm2335_vm5, %v6111_v49  ;;  %v4299_v57 = vpop.permute.xlu1 %4298 }
 0x903   : > { %5872 = vmatpush3.bf16.msra.mxu0 %v4242_v50  ;;  %5873 = vmatprep.mubr.msk.bf16.mxu0 %vm6139_vm0, %v6138_v3 }
 0x904   : > { %5883 = vmatprep.subr.bf16.mxu0 %v6138_v3 }
 0x906   : > { %5856 = vmatmul.mubr.msk.bf16.vlgmr.msra.gmra.mrb[100].mxu1 %vm2335_vm5, %v6112_v51  ;;  %v4356_v55 = vpop.permute.xlu0 %4355  ;;  %v4413_v59 = vpop.permute.xlu1 %4412 }
 0x907   : > { %5866 = vmatpush3.bf16.msra.mxu1 %v4185_v52  ;;  %5867 = vmatprep.mubr.msk.bf16.mxu1 %vm6139_vm0, %v6138_v3 }
 0x908   : > { %5877 = vmatprep.subr.bf16.mxu1 %v6138_v3 }
 0x90a   : > { %5874 = vmatmul.mubr.msk.bf16.vlgmr.msra.gmra.mrb[76].mxu0 %vm2335_vm5, %v6113_v53 }
 0x90b   : > { %5884 = vmatpush3.bf16.msra.mxu0 %v4356_v55  ;;  %5885 = vmatprep.mubr.msk.bf16.mxu0 %vm6139_vm0, %v6138_v3 }
 0x90c   : > { %5895 = vmatprep.subr.bf16.mxu0 %v6138_v3 }
 0x90e   : > { %5868 = vmatmul.mubr.msk.bf16.vlgmr.msra.gmra.mrb[104].mxu1 %vm2335_vm5, %v6114_v56 }
 0x90f   : > { %5878 = vmatpush3.bf16.msra.mxu1 %v4299_v57  ;;  %5879 = vmatprep.mubr.msk.bf16.mxu1 %vm6139_vm0, %v6138_v3 }
 0x910   : > { %5889 = vmatprep.subr.bf16.mxu1 %v6138_v3 }
 0x912   : > { %5886 = vmatmul.mubr.msk.bf16.vlgmr.msra.gmra.mrb[80].mxu0 %vm2335_vm5, %v6116_v58 }
 0x913   : > { %5897 = vmatprep.mubr.msk.bf16.mxu0 %vm6139_vm0, %v6138_v3 }
 0x916   : > { %5880 = vmatmul.mubr.msk.bf16.vlgmr.msra.gmra.mrb[108].mxu1 %vm2335_vm5, %v6115_v6 }
 0x917   : > { %5890 = vmatpush3.bf16.msra.mxu1 %v4413_v59  ;;  %5891 = vmatprep.mubr.msk.bf16.mxu1 %vm6139_vm0, %v6138_v3  ;;  %v4466_v50 = vpop.permute.xlu0 %4465  ;;  %v4471_v56 = vpop.permute.xlu1 %4470 }
 0x918   : > { %5901 = vmatprep.subr.bf16.mxu1 %v6138_v3 }
 0x91e   : > { %5892 = vmatmul.mubr.msk.bf16.vlgmr.msra.gmra.mrb[112].mxu1 %vm2335_vm5, %v6117_v4 }
 0x91f   : > { %5903 = vmatprep.mubr.msk.bf16.mxu1 %vm6139_vm0, %v6138_v3 }
 0x960   : > { %v4055_v60 = vpop.f32.mrb[68].mxu0 }
 0x961   : > { %v5851_v61 = vpop.f32.mrb[69].mxu0 }
 0x962   : > { %v4058_v62 = vpop.f32.mrb[70].mxu0 }
 0x963   : > { %v5852_v63 = vpop.f32.mrb[71].mxu0 }
 0x9d1   : > { %v4006_v0 = vpop.f32.mrb[96].mxu1 }
 0x9d2   : > { %v4056_v1 = vadd.f32 %v4055_v60, %v4006_v0  ;;  %v5845_v2 = vpop.f32.mrb[97].mxu1 }
 0x9d3   : > { %v4009_v5 = vpop.f32.mrb[98].mxu1  ;;  %v6118_v2 = vld [vmem:[%s7069_s13] sm:$0xff]  }
 0x9d4   : > { %v4059_v8 = vadd.f32 %v4058_v62, %v4009_v5  ;;  %v5846_v9 = vpop.f32.mrb[99].mxu1  ;;  %v4998_v5 = vld [vmem:[%s7070_s14 + $0x8] sm:$0xff] }
 0x9d5   : > { %v4167_v10 = vpop.f32.mrb[72].mxu0 }
 0x9d6   : > { %v5863_v11 = vpop.f32.mrb[73].mxu0 }
 0x9d7   : > { %v4170_v12 = vpop.f32.mrb[74].mxu0 }
 0x9d8   : > { %v5864_v13 = vpop.f32.mrb[75].mxu0 }
 0x9d9   : > { %v4110_v14 = vpop.f32.mrb[100].mxu1  ;;  %v6120_v13 = vld [vmem:[%s7069_s13 + $0x18] sm:$0xff]  }
 0x9da   : > { %v4117_v7 = vadd.f32 %v4110_v14, %v4056_v1  ;;  %v5857_v15 = vpop.f32.mrb[101].mxu1 }
 0x9db   : > { %v4113_v16 = vpop.f32.mrb[102].mxu1 }
 0x9dc   : > { %v4118_v17 = vadd.f32 %v4113_v16, %v4059_v8  ;;  %v4174_v18 = vadd.f32 %v4167_v10, %v4117_v7  ;;  %v5858_v19 = vpop.f32.mrb[103].mxu1  ;;  %v4997_v8 = vld [vmem:[%s7070_s14] sm:$0xff]  ;;  %v6119_v10 = vld [vmem:[%s7069_s13 + $0x8] sm:$0xff]  }
 0x9dd   : > { %v4281_v20 = vpop.f32.mrb[76].mxu0  ;;  %v6122_v7 = vld [vmem:[%s7069_s13 + $0x28] sm:$0xff]   ;;  %v6123_v16 = vld [vmem:[%s7069_s13 + $0x20] sm:$0xff]   ;;  %v6124_v19 = vld [vmem:[%s7069_s13 + $0x30] sm:$0xff]  }
 0x9de   : > { %v4175_v21 = vadd.f32 %v4170_v12, %v4118_v17  ;;  %v5875_v22 = vpop.f32.mrb[77].mxu0 }
 0x9df   : > { %v4284_v23 = vpop.f32.mrb[78].mxu0 }
 0x9e0   : > { %v5876_v24 = vpop.f32.mrb[79].mxu0 }
 0x9e1   : > { %v4224_v25 = vpop.f32.mrb[104].mxu1 }
 0x9e2   : > { %v4231_v26 = vadd.f32 %v4224_v25, %v4174_v18  ;;  %v5869_v27 = vpop.f32.mrb[105].mxu1  ;;  %v6125_v18 = vld [vmem:[%s7069_s13 + $0x38] sm:$0xff]  }
 0x9e3   : > { %v4227_v28 = vpop.f32.mrb[106].mxu1 }
 0x9e4   : > { %v4232_v29 = vadd.f32 %v4227_v28, %v4175_v21  ;;  %v4288_v30 = vadd.f32 %v4281_v20, %v4231_v26  ;;  %v5870_v31 = vpop.f32.mrb[107].mxu1  ;;  %v6126_v21 = vld [vmem:[%s7069_s13 + $0x40] sm:$0xff]  }
 0x9e5   : > { %v4395_v32 = vpop.f32.mrb[80].mxu0 }
 0x9e6   : > { %v4289_v33 = vadd.f32 %v4284_v23, %v4232_v29  ;;  %v5887_v34 = vpop.f32.mrb[81].mxu0 }
 0x9e7   : > { %v4398_v35 = vpop.f32.mrb[82].mxu0 }
 0x9e8   : > { %v5888_v36 = vpop.f32.mrb[83].mxu0 }
 0x9e9   : > { %v4338_v37 = vpop.f32.mrb[108].mxu1 }
 0x9ea   : > { %v4345_v40 = vadd.f32 %v4338_v37, %v4288_v30  ;;  %v5881_v41 = vpop.f32.mrb[109].mxu1 }
 0x9eb   : > { %v4341_v42 = vpop.f32.mrb[110].mxu1 }
 0x9ec   : > { %v4346_v43 = vadd.f32 %v4341_v42, %v4289_v33  ;;  %v4402_v44 = vadd.f32 %v4395_v32, %v4345_v40  ;;  %v5882_v45 = vpop.f32.mrb[111].mxu1 }
 0x9ee   : > { %v4403_v46 = vadd.f32 %v4398_v35, %v4346_v43 }
 0x9f1   : > { %v4452_v47 = vpop.f32.mrb[112].mxu1 }
 0x9f2   : > { %v4459_v48 = vadd.f32 %v4452_v47, %v4402_v44  ;;  %v5893_v49 = vpop.f32.mrb[113].mxu1 }
 0x9f3   : > { %v4455_v51 = vpop.f32.mrb[114].mxu1 }
 0x9f4   : > { %v4473_v52 = vadd.f32 %v4466_v50, %v4459_v48  ;;  %v4460_v53 = vadd.f32 %v4455_v51, %v4403_v46  ;;  %v5894_v55 = vpop.f32.mrb[115].mxu1 }
 0x9f6   : > { %v4474_v57 = vadd.f32 %v4471_v56, %v4460_v53  ;;  %v4475_v58 = vmax.f32 %v4473_v52, 0.0 }
 0x9f8   : > { %v4476_v6 = vmax.f32 %v4474_v57, 0.0 }
 0x9fa   : > { %v6021_v59 = vpack.i.bf16 %v4476_v6, %v4475_v58 }
 0x9fc   : > { %6022 = vrot.lane.b32.xlu0 %v6021_v59, %s7107_s2 }
 0xa6e   : > { %v6023_v4 = vpop.permute.xlu0 %6022 }
 0xa6f   : > { %v6025_v60 = vunpack.i.h.bf16 %v6023_v4  ;;  %v6024_v61 = vunpack.i.l.bf16 %v6023_v4 }
 0xa71   : > { %v4486_v62 = vsel %vm2854_vm9, %v6025_v60, 0.0  ;;  %v4485_v63 = vsel %vm2854_vm9, %v6024_v61, 0.0 }
 0xa72   : > { %v4488_v0 = vpack.c.bf16 %v4486_v62, %v4485_v63 }
 0xa74   : > { %4489 = vst.msk [vmem:[#allocation7] sm:$0xff] %vm2867_vm10, %v4488_v0 }
 0xa7b   : > { %v4490_v1 = vld [vmem:[#allocation7] sm:$0xff] }
 0xa7c   : > { %4606 = vrot.lane.b32.xlu0 %v4490_v1, %s7100_s30  ;;  %4502 = vrot.lane.b32.xlu1 %v4490_v1, %s7101_s28 }
 0xa7d   : > { %5902 = vmatpush3.bf16.msra.mxu1 %v4490_v1 }
 0xa7e   : > { %5913 = vmatprep.subr.bf16.mxu1 %v6138_v3 }
 0xa80   : > { %4720 = vrot.lane.b32.xlu0 %v4490_v1, %s7108_s26  ;;  %4663 = vrot.lane.b32.xlu1 %v4490_v1, %s7106_s18 }
 0xa81   : > { %5904 = vmatmul.mubr.msk.bf16.vlgmr.msra.gmra.mrb[116].mxu1 %vm2335_vm5, %v6118_v2 }
 0xa82   : > { %5915 = vmatprep.mubr.msk.bf16.mxu1 %vm6139_vm0, %v6138_v3 }
 0xa84   : > { %4834 = vrot.lane.b32.xlu0 %v4490_v1, %s7103_s0  ;;  %4777 = vrot.lane.b32.xlu1 %v4490_v1, %s7104_s27 }
 0xa88   : > { %4948 = vrot.lane.b32.xlu0 %v4490_v1, %s7105_s20  ;;  %4891 = vrot.lane.b32.xlu1 %v4490_v1, %s6153_s23 }
 0xa8c   : > { %5006 = vperm.xlu0 %6014, %v4998_v5   ;;  %5001 = vperm.xlu1 %6015, %v4997_v8  }
 0xa90   : > { %5015 = vrot.lane.b32.xlu0 %v6867_v39, %s7108_s26  ;;  %5013 = vrot.lane.b32.xlu1 %v6863_v38, %s7108_s26  ;;  %v6121_v39 = vld [vmem:[%s7069_s13 + $0x10] sm:$0xff]  }
 0xaee   : > { %v4503_v9 = vpop.permute.xlu1 %4502  ;;  %v4607_v11 = vpop.permute.xlu0 %4606 }
 0xaef   : > { %5896 = vmatpush3.bf16.msra.mxu0 %v4503_v9 }
 0xaf0   : > { %5907 = vmatprep.subr.bf16.mxu0 %v6138_v3 }
 0xaf2   : > { %5898 = vmatmul.mubr.msk.bf16.vlgmr.msra.gmra.mrb[84].mxu0 %vm2335_vm5, %v6119_v10  ;;  %v4664_v12 = vpop.permute.xlu1 %4663  ;;  %v4721_v14 = vpop.permute.xlu0 %4720 }
 0xaf3   : > { %5908 = vmatpush3.bf16.msra.mxu0 %v4607_v11  ;;  %5914 = vmatpush3.bf16.msra.mxu1 %v4664_v12 }
 0xaf4   : > { %5925 = vmatprep.subr.bf16.mxu1 %v6138_v3  ;;  %5909 = vmatprep.mubr.msk.bf16.mxu0 %vm6139_vm0, %v6138_v3 }
 0xaf5   : > { %5919 = vmatprep.subr.bf16.mxu0 %v6138_v3 }
 0xaf6   : > { %v4778_v38 = vpop.permute.xlu1 %4777  ;;  %5916 = vmatmul.mubr.msk.bf16.vlgmr.msra.gmra.mrb[120].mxu1 %vm2335_vm5, %v6120_v13  ;;  %v4835_v17 = vpop.permute.xlu0 %4834 }
 0xaf7   : > { %5926 = vmatpush3.bf16.msra.mxu1 %v4778_v38  ;;  %5927 = vmatprep.mubr.msk.bf16.mxu1 %vm6139_vm0, %v6138_v3 }
 0xaf8   : > { %5937 = vmatprep.subr.bf16.mxu1 %v6138_v3 }
 0xafa   : > { %5910 = vmatmul.mubr.msk.bf16.vlgmr.msra.gmra.mrb[88].mxu0 %vm2335_vm5, %v6121_v39  ;;  %v4892_v15 = vpop.permute.xlu1 %4891  ;;  %v4949_v20 = vpop.permute.xlu0 %4948 }
 0xafb   : > { %5920 = vmatpush3.bf16.msra.mxu0 %v4721_v14  ;;  %5921 = vmatprep.mubr.msk.bf16.mxu0 %vm6139_vm0, %v6138_v3 }
 0xafc   : > { %5931 = vmatprep.subr.bf16.mxu0 %v6138_v3 }
 0xafe   : > { %5928 = vmatmul.mubr.msk.bf16.vlgmr.msra.gmra.mrb[124].mxu1 %vm2335_vm5, %v6122_v7 }
 0xaff   : > { %5938 = vmatpush3.bf16.msra.mxu1 %v4892_v15  ;;  %5939 = vmatprep.mubr.msk.bf16.mxu1 %vm6139_vm0, %v6138_v3 }
 0xb00   : > { %5949 = vmatprep.subr.bf16.mxu1 %v6138_v3 }
 0xb02   : > { %5922 = vmatmul.mubr.msk.bf16.vlgmr.msra.gmra.mrb[92].mxu0 %vm2335_vm5, %v6123_v16 }
 0xb03   : > { %5932 = vmatpush3.bf16.msra.mxu0 %v4835_v17  ;;  %5933 = vmatprep.mubr.msk.bf16.mxu0 %vm6139_vm0, %v6138_v3 }
 0xb04   : > { %5943 = vmatprep.subr.bf16.mxu0 %v6138_v3 }
 0xb06   : > { %5940 = vmatmul.mubr.msk.bf16.vlgmr.msra.gmra.mrb[128].mxu1 %vm2335_vm5, %v6125_v18 }
 0xb07   : > { %5951 = vmatprep.mubr.msk.bf16.mxu1 %vm6139_vm0, %v6138_v3 }
 0xb0a   : > { %5934 = vmatmul.mubr.msk.bf16.vlgmr.msra.gmra.mrb[96].mxu0 %vm2335_vm5, %v6124_v19 }
 0xb0b   : > { %5944 = vmatpush3.bf16.msra.mxu0 %v4949_v20  ;;  %5945 = vmatprep.mubr.msk.bf16.mxu0 %vm6139_vm0, %v6138_v3  ;;  %v5002_v8 = vpop.permute.xlu1 %5001  ;;  %v5007_v9 = vpop.permute.xlu0 %5006  ;;  %vm5089_vm0 = vcmask 818176  }
 0xb0f   : > { %v5014_v7 = vpop.permute.xlu1 %5013  ;;  %v5016_v17 = vpop.permute.xlu0 %5015 }
 0xb12   : > { %5946 = vmatmul.mubr.msk.bf16.vlgmr.msra.gmra.mrb[100].mxu0 %vm2335_vm5, %v6126_v21 }
 0xb54   : > { %v4591_v22 = vpop.f32.mrb[116].mxu1 }
 0xb55   : > { %v5905_v23 = vpop.f32.mrb[117].mxu1 }
 0xb56   : > { %v4594_v24 = vpop.f32.mrb[118].mxu1 }
 0xb57   : > { %v5906_v25 = vpop.f32.mrb[119].mxu1 }
 0xbc5   : > { %v4542_v26 = vpop.f32.mrb[84].mxu0 }
 0xbc6   : > { %v4592_v27 = vadd.f32 %v4591_v22, %v4542_v26  ;;  %v5899_v28 = vpop.f32.mrb[85].mxu0 }
 0xbc7   : > { %v4545_v29 = vpop.f32.mrb[86].mxu0 }
 0xbc8   : > { %v4595_v30 = vadd.f32 %v4594_v24, %v4545_v29  ;;  %v5900_v31 = vpop.f32.mrb[87].mxu0  ;;  %v6127_v29 = vld [vmem:[%s7071_s15] sm:$0x1f]  }
 0xbc9   : > { %v4703_v32 = vpop.f32.mrb[120].mxu1 }
 0xbca   : > { %v5917_v33 = vpop.f32.mrb[121].mxu1 }
 0xbcb   : > { %v4706_v34 = vpop.f32.mrb[122].mxu1 }
 0xbcc   : > { %v5918_v3 = vpop.f32.mrb[123].mxu1 }
 0xbcd   : > { %v4646_v35 = vpop.f32.mrb[88].mxu0  ;;  %v5099_v3 = vld [vmem:[%s7072_s16] sm:$0xff] }
 0xbce   : > { %v4653_v36 = vadd.f32 %v4646_v35, %v4592_v27  ;;  %v5911_v37 = vpop.f32.mrb[89].mxu0 }
 0xbcf   : > { %v4649_v40 = vpop.f32.mrb[90].mxu0  ;;  %v5100_v37 = vld [vmem:[%s7072_s16 + $0x8] sm:$0x3] }
 0xbd0   : > { %v4654_v41 = vadd.f32 %v4649_v40, %v4595_v30  ;;  %v4710_v42 = vadd.f32 %v4703_v32, %v4653_v36  ;;  %v5912_v43 = vpop.f32.mrb[91].mxu0 }
 0xbd1   : > { %v4817_v44 = vpop.f32.mrb[124].mxu1 }
 0xbd2   : > { %v4711_v45 = vadd.f32 %v4706_v34, %v4654_v41  ;;  %v5929_v46 = vpop.f32.mrb[125].mxu1 }
 0xbd3   : > { %v4820_v47 = vpop.f32.mrb[126].mxu1 }
 0xbd4   : > { %v5930_v48 = vpop.f32.mrb[127].mxu1 }
 0xbd5   : > { %v4760_v49 = vpop.f32.mrb[92].mxu0 }
 0xbd6   : > { %v4767_v50 = vadd.f32 %v4760_v49, %v4710_v42  ;;  %v5923_v51 = vpop.f32.mrb[93].mxu0 }
 0xbd7   : > { %v4763_v52 = vpop.f32.mrb[94].mxu0 }
 0xbd8   : > { %v4768_v53 = vadd.f32 %v4763_v52, %v4711_v45  ;;  %v4824_v55 = vadd.f32 %v4817_v44, %v4767_v50  ;;  %v5924_v56 = vpop.f32.mrb[95].mxu0 }
 0xbd9   : > { %v4931_v57 = vpop.f32.mrb[128].mxu1 }
 0xbda   : > { %v4825_v58 = vadd.f32 %v4820_v47, %v4768_v53  ;;  %v5941_v6 = vpop.f32.mrb[129].mxu1 }
 0xbdb   : > { %v4934_v59 = vpop.f32.mrb[130].mxu1 }
 0xbdc   : > { %v5942_v4 = vpop.f32.mrb[131].mxu1 }
 0xbdd   : > { %v4874_v60 = vpop.f32.mrb[96].mxu0 }
 0xbde   : > { %v4881_v61 = vadd.f32 %v4874_v60, %v4824_v55  ;;  %v5935_v62 = vpop.f32.mrb[97].mxu0 }
 0xbdf   : > { %v4877_v63 = vpop.f32.mrb[98].mxu0 }
 0xbe0   : > { %v4882_v0 = vadd.f32 %v4877_v63, %v4825_v58  ;;  %v4938_v1 = vadd.f32 %v4931_v57, %v4881_v61  ;;  %v5936_v2 = vpop.f32.mrb[99].mxu0 }
 0xbe2   : > { %v4939_v5 = vadd.f32 %v4934_v59, %v4882_v0 }
 0xbe5   : > { %v4988_v10 = vpop.f32.mrb[100].mxu0 }
 0xbe6   : > { %v4995_v11 = vadd.f32 %v4988_v10, %v4938_v1  ;;  %v5947_v12 = vpop.f32.mrb[101].mxu0 }
 0xbe7   : > { %v4991_v13 = vpop.f32.mrb[102].mxu0 }
 0xbe8   : > { %v5009_v38 = vadd.f32 %v5002_v8, %v4995_v11  ;;  %v4996_v39 = vadd.f32 %v4991_v13, %v4939_v5  ;;  %v5948_v14 = vpop.f32.mrb[103].mxu0 }
 0xbea   : > { %v5019_v15 = vadd.f32 %v5014_v7, %v5009_v38  ;;  %v5010_v16 = vadd.f32 %v5007_v9, %v4996_v39 }
 0xbec   : > { %v5020_v18 = vadd.f32 %v5016_v17, %v5010_v16  ;;  %v5021_v19 = vmax.f32 %v5019_v15, 0.0 }
 0xbee   : > { %v5022_v20 = vmax.f32 %v5020_v18, 0.0 }
 0xbf0   : > { %v6026_v21 = vpack.i.bf16 %v5022_v20, %v5021_v19 }
 0xbf2   : > { %6027 = vrot.lane.b32.xlu1 %v6026_v21, %s7107_s2  ;;  %s5430_s2 = sshll.u32 %s7110_s25, 4 }
 0xbf3   : > { %s548_s4 = scalar_lea.vmem %s7073_s17, %s5430_s2 }
 0xc64   : > { %v6028_v22 = vpop.permute.xlu1 %6027 }
 0xc65   : > { %v6030_v23 = vunpack.i.h.bf16 %v6028_v22  ;;  %v6029_v24 = vunpack.i.l.bf16 %v6028_v22 }
 0xc67   : > { %v5032_v25 = vsel %vm2854_vm9, %v6030_v23, 0.0  ;;  %v5031_v26 = vsel %vm2854_vm9, %v6029_v24, 0.0 }
 0xc68   : > { %v5035_v27 = vpack.c.bf16 %v5032_v25, %v5031_v26 }
 0xc6a   : > { %5042 = vrot.lane.b32.xlu0 %v5035_v27, %s7108_s26 }
 0xcdc   : > { %v5043_v28 = vpop.permute.xlu0 %5042 }
 0xcdd   : > { %5950 = vmatpush3.bf16.msra.mxu1 %v5043_v28 }
 0xce0   : > { %5952 = vmatmul.mubr.msk.bf16.vlgmr.msra.gmra.mrb[132].mxu1 %vm2335_vm5, %v6127_v29 }
 0xdb3   : > { %v5082_v30 = vpop.f32.mrb[132].mxu1 }
 0xdb4   : > { %v5953_v31 = vpop.f32.mrb[133].mxu1  ;;  %v5090_v32 = vsel %vm5089_vm0, %v5082_v30, 0.0 }
 0xdb5   : > { %v5085_v33 = vpop.f32.mrb[134].mxu1  ;;  %5091 = vadd.xlane.f32.xlu1 %v5090_v32 }
 0xdb6   : > { %v5954_v54 = vpop.f32.mrb[135].mxu1  ;;  %v5094_v34 = vsel %vm5093_vm1, %v5085_v33, 0.0 }
 0xdb7   : > { %5095 = vadd.xlane.f32.xlu0 %v5094_v34 }
 0xe42   : > { %v5092_v35 = vpop.xlane.xlu1 %5091 }
 0xe43   : > { %v5097_v36 = vmul.f32 0.015625, %v5092_v35 }
 0xe44   : > { %v5096_v40 = vpop.xlane.xlu0 %5095 }
 0xe45   : > { %v5101_v41 = vadd.f32 %v5099_v3, %v5097_v36  ;;  %v5098_v42 = vmul.f32 0.015625, %v5096_v40 }
 0xe47   : > { %5104 = vst.msk [vmem:[%s548_s4] sm:$0xff] %vm5103_vm3, %v5101_v41  ;;  %v5102_v43 = vadd.f32 %v5100_v37, %v5098_v42 }
 0xe49   : > { %5106 = vst.msk [vmem:[%s548_s4 + $0x8] sm:$0x3] %vm5105_vm12, %v5102_v43 }
 0xe4a PF: > { %s27_s24 = sadd.s32 1, %s6135_s24  }
 0xe4b   : > { %p24_p4 = scmp.ge.s32.totalorder %s27_s24, 4  }
 0xe4d   :  { %26 = sbr.rel (!%p24_p4) target bundleno = 6 (0x6), region = 166 }

</bundles_post_ra>
